<compile_context>
chip_gen: v7x
topology: tpu7x:2x2x1
jax: 0.10.0
libtpu: 0.0.40
codegen_flags: <defaults>
</compile_context>

<pallas_src>
import functools

import numpy as np
import jax
import jax.numpy as jnp
from jax import lax
from jax.experimental import pallas as pl
from jax.experimental.pallas import tpu as pltpu

BLOCK_SIZE = 3                                  # convs per residual block
BLOCK_DEEP = 5                                  # residual blocks
NUM_LAYERS = 2 + BLOCK_DEEP * BLOCK_SIZE        # 17
CH = 64                                         # uniform padded channel width
CIN_PAD = 16                                    # input channels padded to a bf16 tile
COUT_PAD = 8                                    # output channels written back (use [:3])


# ------------------------------- Pallas kernel ------------------------------ #

def _net_kernel(x_ref, w_ref, b_ref, mask_ref, o_ref, act_ref, pmat_ref, *,
                H, W, bchunk):
    """Whole-network forward for `bchunk` images (one grid step), channel-major.

    x_ref   : (bchunk, CIN_PAD, HW)  f32   NCHW-flattened input images
    w_ref   : (L, CH, 9*CH)          bf16  stacked weights, K order = (dy, dx, cin)
    b_ref   : (L, CH, 1)             f32   stacked biases
    mask_ref: (16, NL)               bf16  rows 0..8 = per-tap validity (1/0) masks
    o_ref   : (bchunk, COUT_PAD, HW) f32   output (channels [0:3] meaningful)
    act_ref : (CH, NL)               bf16  activation scratch, NL = bchunk*HW
    pmat_ref: (9*CH, NL)             bf16  im2col patch-matrix scratch
    """
    HW = H * W
    NL = bchunk * HW
    taps = [(oy, ox) for oy in (-1, 0, 1) for ox in (-1, 0, 1)]  # matches weight K order

    def rotate_lanes(a, d):
        # out[:, q] = a[:, (q + d) % NL]  (cross-image wrap is zeroed by the masks).
        s = d % NL
        if s == 0:
            return a
        return jnp.concatenate([a[:, s:], a[:, :s]], axis=1)

    def conv(layer):
        """3x3 conv as ONE fused-K MXU matmul: (CH,9CH) @ (9CH,NL) -> (CH,NL) f32."""
        a = act_ref[...]                                      # (CH, NL) bf16
        for t, (oy, ox) in enumerate(taps):
            tap = rotate_lanes(a, oy * W + ox)
            if not (oy == 0 and ox == 0):
                tap = tap * mask_ref[t:t + 1, :]              # zero out-of-image taps
            pmat_ref[t * CH:(t + 1) * CH, :] = tap            # aligned full-lane store
        y = jnp.dot(w_ref[layer], pmat_ref[...],
                    preferred_element_type=jnp.float32)       # (CH, NL) f32, lane-dense
        return y + b_ref[layer]                               # bias broadcast over lanes

    # Load input: zero the padded channels once, write the real ones (cast to bf16).
    act_ref[CIN_PAD:, :] = jnp.zeros((CH - CIN_PAD, NL), jnp.bfloat16)
    for b in range(bchunk):
        act_ref[0:CIN_PAD, b * HW:(b + 1) * HW] = x_ref[b].astype(jnp.bfloat16)

    # conv1 + ReLU
    y = jnp.maximum(conv(0), 0.0)
    act_ref[...] = y.astype(jnp.bfloat16)

    # 5 residual blocks under fori_loop (dynamic layer index into stacked weights).
    def block_body(d, y_in):
        y = y_in
        for i in range(BLOCK_SIZE):
            y = jnp.maximum(conv(1 + d * BLOCK_SIZE + i), 0.0)
            if i < BLOCK_SIZE - 1:
                act_ref[...] = y.astype(jnp.bfloat16)
        y = y + y_in                       # residual add AFTER ReLU, no ReLU after add
        act_ref[...] = y.astype(jnp.bfloat16)
        return y

    y = lax.fori_loop(0, BLOCK_DEEP, block_body, y)

    # conv3, no activation; write back only the first COUT_PAD channels.
    y = conv(NUM_LAYERS - 1)
    for b in range(bchunk):
        o_ref[b] = y[0:COUT_PAD, b * HW:(b + 1) * HW]


# ---------------------------------- wrapper ---------------------------------- #

def pack_params(params):
    """One-time packing (OUTSIDE the jitted forward): pad every layer to a uniform
    (3,3,CH,CH)/(CH,) shape and stack into (L, CH, 9*CH) bf16 channel-major weights
    (ready for out = W @ pmat) and (L, CH, 1) f32 biases."""
    w_list, b_list = [], []
    for w, b in params:
        cin, cout = w.shape[2], w.shape[3]
        w = jnp.pad(w, ((0, 0), (0, 0), (0, CH - cin), (0, CH - cout)))
        b = jnp.pad(b, ((0, CH - cout),))
        w_list.append(w.reshape(9 * CH, CH).T)       # (CH, 9*CH), K order (dy, dx, cin)
        b_list.append(b.reshape(CH, 1))
    w_all = jnp.stack(w_list).astype(jnp.bfloat16)   # (17, 64, 576)
    b_all = jnp.stack(b_list).astype(jnp.float32)    # (17, 64, 1)
    return w_all, b_all


def _pick_batch_chunk(n):
    """Images per grid step: amortize per-step overhead / MXU weight pushes, but
    keep >= 2 grid steps so dimension_semantics=('parallel',) feeds both cores."""
    best = 1
    for c in (2, 3, 4):
        if n % c == 0 and n // c >= 2:
            best = c
    return best


def _tap_masks(H, W, bchunk):
    """Trace-time constant per-tap validity masks (1.0 in-image / 0.0 padding)."""
    HW = H * W
    yy = np.arange(HW) // W
    xx = np.arange(HW) % W
    m = np.zeros((16, HW), np.float32)
    t = 0
    for oy in (-1, 0, 1):
        for ox in (-1, 0, 1):
            valid = ((yy + oy >= 0) & (yy + oy <= H - 1) &
                     (xx + ox >= 0) & (xx + ox <= W - 1))
            m[t] = valid.astype(np.float32)
            t += 1
    return jnp.asarray(np.tile(m, (1, bchunk)), dtype=jnp.bfloat16)


@jax.jit
def net_forward(x_nchw, w_all, b_all):
    N, cin, H, W = x_nchw.shape
    HW = H * W
    assert HW % 128 == 0 and cin <= CIN_PAD
    L = w_all.shape[0]
    bchunk = _pick_batch_chunk(N)
    NL = bchunk * HW

    # NCHW is already channel-major: flatten space, pad channels once (tiny ops).
    x = x_nchw.reshape(N, cin, HW).astype(jnp.float32)
    x = jnp.pad(x, ((0, 0), (0, CIN_PAD - cin), (0, 0)))
    tapmask = _tap_masks(H, W, bchunk)

    kernel = functools.partial(_net_kernel, H=H, W=W, bchunk=bchunk)

    out = pl.pallas_call(
        kernel,
        out_shape=jax.ShapeDtypeStruct((N, COUT_PAD, HW), jnp.float32),
        grid_spec=pltpu.PrefetchScalarGridSpec(
            num_scalar_prefetch=0,
            grid=(N // bchunk,),
            in_specs=[
                pl.BlockSpec((bchunk, CIN_PAD, HW), lambda n: (n, 0, 0)),
                pl.BlockSpec((L, CH, 9 * CH), lambda n: (0, 0, 0)),
                pl.BlockSpec((L, CH, 1), lambda n: (0, 0, 0)),
                pl.BlockSpec((16, NL), lambda n: (0, 0)),
            ],
            out_specs=pl.BlockSpec((bchunk, COUT_PAD, HW), lambda n: (n, 0, 0)),
            scratch_shapes=[
                pltpu.VMEM((CH, NL), jnp.bfloat16),        # activation (channel-major)
                pltpu.VMEM((9 * CH, NL), jnp.bfloat16),    # im2col patch matrix
            ],
        ),
        compiler_params=pltpu.CompilerParams(
            dimension_semantics=("parallel",)),
    )(x, w_all, b_all, tapmask)

    # (N, COUT_PAD, H*W) -> NCHW, drop padded output channels. No transposes.
    return out.reshape(N, COUT_PAD, H, W)[:, :3]


# ------------------------------ parameter creation --------------------------- #

def init_params(key):
    """Deterministic init mimicking PyTorch Conv2d defaults (U(-1/sqrt(fan_in), .))."""
    params = []
    channel_plan = [(3, 64)] + [(64, 64)] * (BLOCK_DEEP * BLOCK_SIZE) + [(64, 3)]
    for (cin, cout) in channel_plan:
        key, kw, kb = jax.random.split(key, 3)
        fan_in = cin * 3 * 3
        bound = 1.0 / jnp.sqrt(fan_in)
        w = jax.random.uniform(kw, (3, 3, cin, cout), jnp.float32, -bound, bound)  # HWIO
        b = jax.random.uniform(kb, (cout,), jnp.float32, -bound, bound)
        params.append((w, b))
    return params


# ------------------------------- reference (check) ---------------------------- #

def _ref_conv(x_nhwc, w, b, relu):
    out = jax.lax.conv_general_dilated(
        x_nhwc, w, window_strides=(1, 1), padding="SAME",
        dimension_numbers=("NHWC", "HWIO", "NHWC"))
    out = out + b
    return jnp.maximum(out, 0.0) if relu else out


def net_forward_ref(x_nchw, params):
    x = jnp.transpose(x_nchw, (0, 2, 3, 1))
    out = _ref_conv(x, *params[0], True)
    idx = 1
    for _ in range(BLOCK_DEEP):
        skip = out
        for _ in range(BLOCK_SIZE):
            out = _ref_conv(out, *params[idx], True)
            idx += 1
        out = out + skip
    out = _ref_conv(out, *params[idx], False)
    return jnp.transpose(out, (0, 3, 1, 2))


# ------------------------------------ main ------------------------------------ #

if __name__ == "__main__":
    key = jax.random.PRNGKey(0)
    k_params, k_x = jax.random.split(key)

    params = init_params(k_params)
    w_all, b_all = pack_params(params)           # one-time packing, outside the jit
    x = jax.random.normal(k_x, (2, 3, 16, 16), jnp.float32)   # NCHW like PyTorch

    out = jax.block_until_ready(net_forward(x, w_all, b_all))
    ref = jax.block_until_ready(net_forward_ref(x, params))

    assert out.shape == (2, 3, 16, 16)
    # bf16 MXU inputs / bf16 activation storage (f32 accumulation & residual path)
    # across 17 layers -> same numerics as the previously validated version.
    assert jnp.allclose(out, ref, rtol=2e-2, atol=2e-2), "mismatch vs reference"

    print("KERNEL_OK")
</pallas_src>

<mosaic_0001>
module attributes {stable_mosaic.version = 11 : i64} {
  func.func @_net_kernel(%arg0: i32, %arg1: memref<1x16x256xf32, #tpu.memory_space<vmem>>, %arg2: memref<17x64x576xbf16, #tpu.memory_space<vmem>>, %arg3: memref<17x64x1xf32, #tpu.memory_space<vmem>>, %arg4: memref<16x256xbf16, #tpu.memory_space<vmem>>, %arg5: memref<1x8x256xf32, #tpu.memory_space<vmem>>, %arg6: memref<64x256xbf16, #tpu.memory_space<vmem>>, %arg7: memref<576x256xbf16, #tpu.memory_space<vmem>>) attributes {dimension_semantics = [#tpu.dimension_semantics<parallel>], iteration_bounds = array<i64: 2>, scalar_prefetch = 0 : i64, scratch_operands = 2 : i64, tpu.core_type = #tpu.core_type<tc>, window_params = [{transform_indices = @transform_0, window_bounds = array<i64: 1, 16, 256>}, {pipeline_mode = #tpu.pipeline_mode<synchronous>, transform_indices = @transform_1, window_bounds = array<i64: 17, 64, 576>}, {pipeline_mode = #tpu.pipeline_mode<synchronous>, transform_indices = @transform_2, window_bounds = array<i64: 17, 64, 1>}, {pipeline_mode = #tpu.pipeline_mode<synchronous>, transform_indices = @transform_3, window_bounds = array<i64: 16, 256>}, {transform_indices = @transform_4, window_bounds = array<i64: 1, 8, 256>}]} {
    %cst = arith.constant 0.000000e+00 : bf16
    %0 = vector.broadcast %cst : bf16 to vector<48x256xbf16>
    %c16 = arith.constant 16 : index
    %c0 = arith.constant 0 : index
    %1 = vector.load %arg6[%c16, %c0] : memref<64x256xbf16, #tpu.memory_space<vmem>>, vector<48x256xbf16>
    tpu.vector_store %arg6[%c16, %c0], %0 {strides = array<i32>} : memref<64x256xbf16, #tpu.memory_space<vmem>>, vector<48x256xbf16>,
    %c0_0 = arith.constant 0 : index
    %c0_1 = arith.constant 0 : index
    %c0_2 = arith.constant 0 : index
    %2 = vector.load %arg1[%c0_0, %c0_1, %c0_2] : memref<1x16x256xf32, #tpu.memory_space<vmem>>, vector<1x16x256xf32>
    %3 = vector.shape_cast %2 : vector<1x16x256xf32> to vector<16x256xf32>
    %4 = arith.truncf %3 : vector<16x256xf32> to vector<16x256xbf16>
    %c0_3 = arith.constant 0 : index
    %c0_4 = arith.constant 0 : index
    %5 = vector.load %arg6[%c0_3, %c0_4] : memref<64x256xbf16, #tpu.memory_space<vmem>>, vector<16x256xbf16>
    tpu.vector_store %arg6[%c0_3, %c0_4], %4 {strides = array<i32>} : memref<64x256xbf16, #tpu.memory_space<vmem>>, vector<16x256xbf16>,
    %c0_5 = arith.constant 0 : index
    %c0_6 = arith.constant 0 : index
    %6 = vector.load %arg6[%c0_5, %c0_6] : memref<64x256xbf16, #tpu.memory_space<vmem>>, vector<64x256xbf16>
    %7 = vector.extract_strided_slice %6 {offsets = [0, 239], sizes = [64, 17], strides = [1, 1]} : vector<64x256xbf16> to vector<64x17xbf16>
    %8 = vector.extract_strided_slice %6 {offsets = [0, 0], sizes = [64, 239], strides = [1, 1]} : vector<64x256xbf16> to vector<64x239xbf16>
    %9 = tpu.concatenate %7, %8 in 1 : vector<64x17xbf16>, vector<64x239xbf16> -> vector<64x256xbf16>
    %c0_7 = arith.constant 0 : index
    %c0_8 = arith.constant 0 : index
    %10 = vector.load %arg4[%c0_7, %c0_8] : memref<16x256xbf16, #tpu.memory_space<vmem>>, vector<1x256xbf16>
    %11 = vector.broadcast %10 : vector<1x256xbf16> to vector<64x256xbf16>
    %12 = arith.mulf %9, %11 : vector<64x256xbf16>
    %c0_9 = arith.constant 0 : index
    %c0_10 = arith.constant 0 : index
    %13 = vector.load %arg7[%c0_9, %c0_10] : memref<576x256xbf16, #tpu.memory_space<vmem>>, vector<64x256xbf16>
    tpu.vector_store %arg7[%c0_9, %c0_10], %12 {strides = array<i32>} : memref<576x256xbf16, #tpu.memory_space<vmem>>, vector<64x256xbf16>,
    %14 = vector.extract_strided_slice %6 {offsets = [0, 240], sizes = [64, 16], strides = [1, 1]} : vector<64x256xbf16> to vector<64x16xbf16>
    %15 = vector.extract_strided_slice %6 {offsets = [0, 0], sizes = [64, 240], strides = [1, 1]} : vector<64x256xbf16> to vector<64x240xbf16>
    %16 = tpu.concatenate %14, %15 in 1 : vector<64x16xbf16>, vector<64x240xbf16> -> vector<64x256xbf16>
    %c1 = arith.constant 1 : index
    %c0_11 = arith.constant 0 : index
    %17 = vector.load %arg4[%c1, %c0_11] : memref<16x256xbf16, #tpu.memory_space<vmem>>, vector<1x256xbf16>
    %18 = vector.broadcast %17 : vector<1x256xbf16> to vector<64x256xbf16>
    %19 = arith.mulf %16, %18 : vector<64x256xbf16>
    %c64 = arith.constant 64 : index
    %c0_12 = arith.constant 0 : index
    %20 = vector.load %arg7[%c64, %c0_12] : memref<576x256xbf16, #tpu.memory_space<vmem>>, vector<64x256xbf16>
    tpu.vector_store %arg7[%c64, %c0_12], %19 {strides = array<i32>} : memref<576x256xbf16, #tpu.memory_space<vmem>>, vector<64x256xbf16>,
    %21 = vector.extract_strided_slice %6 {offsets = [0, 241], sizes = [64, 15], strides = [1, 1]} : vector<64x256xbf16> to vector<64x15xbf16>
    %22 = vector.extract_strided_slice %6 {offsets = [0, 0], sizes = [64, 241], strides = [1, 1]} : vector<64x256xbf16> to vector<64x241xbf16>
    %23 = tpu.concatenate %21, %22 in 1 : vector<64x15xbf16>, vector<64x241xbf16> -> vector<64x256xbf16>
    %c2 = arith.constant 2 : index
    %c0_13 = arith.constant 0 : index
    %24 = vector.load %arg4[%c2, %c0_13] : memref<16x256xbf16, #tpu.memory_space<vmem>>, vector<1x256xbf16>
    %25 = vector.broadcast %24 : vector<1x256xbf16> to vector<64x256xbf16>
    %26 = arith.mulf %23, %25 : vector<64x256xbf16>
    %c128 = arith.constant 128 : index
    %c0_14 = arith.constant 0 : index
    %27 = vector.load %arg7[%c128, %c0_14] : memref<576x256xbf16, #tpu.memory_space<vmem>>, vector<64x256xbf16>
    tpu.vector_store %arg7[%c128, %c0_14], %26 {strides = array<i32>} : memref<576x256xbf16, #tpu.memory_space<vmem>>, vector<64x256xbf16>,
    %28 = vector.extract_strided_slice %6 {offsets = [0, 255], sizes = [64, 1], strides = [1, 1]} : vector<64x256xbf16> to vector<64x1xbf16>
    %29 = vector.extract_strided_slice %6 {offsets = [0, 0], sizes = [64, 255], strides = [1, 1]} : vector<64x256xbf16> to vector<64x255xbf16>
    %30 = tpu.concatenate %28, %29 in 1 : vector<64x1xbf16>, vector<64x255xbf16> -> vector<64x256xbf16>
    %c3 = arith.constant 3 : index
    %c0_15 = arith.constant 0 : index
    %31 = vector.load %arg4[%c3, %c0_15] : memref<16x256xbf16, #tpu.memory_space<vmem>>, vector<1x256xbf16>
    %32 = vector.broadcast %31 : vector<1x256xbf16> to vector<64x256xbf16>
    %33 = arith.mulf %30, %32 : vector<64x256xbf16>
    %c192 = arith.constant 192 : index
    %c0_16 = arith.constant 0 : index
    %34 = vector.load %arg7[%c192, %c0_16] : memref<576x256xbf16, #tpu.memory_space<vmem>>, vector<64x256xbf16>
    tpu.vector_store %arg7[%c192, %c0_16], %33 {strides = array<i32>} : memref<576x256xbf16, #tpu.memory_space<vmem>>, vector<64x256xbf16>,
    %c256 = arith.constant 256 : index
    %c0_17 = arith.constant 0 : index
    %35 = vector.load %arg7[%c256, %c0_17] : memref<576x256xbf16, #tpu.memory_space<vmem>>, vector<64x256xbf16>
    tpu.vector_store %arg7[%c256, %c0_17], %6 {strides = array<i32>} : memref<576x256xbf16, #tpu.memory_space<vmem>>, vector<64x256xbf16>,
    %36 = vector.extract_strided_slice %6 {offsets = [0, 1], sizes = [64, 255], strides = [1, 1]} : vector<64x256xbf16> to vector<64x255xbf16>
    %37 = vector.extract_strided_slice %6 {offsets = [0, 0], sizes = [64, 1], strides = [1, 1]} : vector<64x256xbf16> to vector<64x1xbf16>
    %38 = tpu.concatenate %36, %37 in 1 : vector<64x255xbf16>, vector<64x1xbf16> -> vector<64x256xbf16>
    %c5 = arith.constant 5 : index
    %c0_18 = arith.constant 0 : index
    %39 = vector.load %arg4[%c5, %c0_18] : memref<16x256xbf16, #tpu.memory_space<vmem>>, vector<1x256xbf16>
    %40 = vector.broadcast %39 : vector<1x256xbf16> to vector<64x256xbf16>
    %41 = arith.mulf %38, %40 : vector<64x256xbf16>
    %c320 = arith.constant 320 : index
    %c0_19 = arith.constant 0 : index
    %42 = vector.load %arg7[%c320, %c0_19] : memref<576x256xbf16, #tpu.memory_space<vmem>>, vector<64x256xbf16>
    tpu.vector_store %arg7[%c320, %c0_19], %41 {strides = array<i32>} : memref<576x256xbf16, #tpu.memory_space<vmem>>, vector<64x256xbf16>,
    %43 = vector.extract_strided_slice %6 {offsets = [0, 15], sizes = [64, 241], strides = [1, 1]} : vector<64x256xbf16> to vector<64x241xbf16>
    %44 = vector.extract_strided_slice %6 {offsets = [0, 0], sizes = [64, 15], strides = [1, 1]} : vector<64x256xbf16> to vector<64x15xbf16>
    %45 = tpu.concatenate %43, %44 in 1 : vector<64x241xbf16>, vector<64x15xbf16> -> vector<64x256xbf16>
    %c6 = arith.constant 6 : index
    %c0_20 = arith.constant 0 : index
    %46 = vector.load %arg4[%c6, %c0_20] : memref<16x256xbf16, #tpu.memory_space<vmem>>, vector<1x256xbf16>
    %47 = vector.broadcast %46 : vector<1x256xbf16> to vector<64x256xbf16>
    %48 = arith.mulf %45, %47 : vector<64x256xbf16>
    %c384 = arith.constant 384 : index
    %c0_21 = arith.constant 0 : index
    %49 = vector.load %arg7[%c384, %c0_21] : memref<576x256xbf16, #tpu.memory_space<vmem>>, vector<64x256xbf16>
    tpu.vector_store %arg7[%c384, %c0_21], %48 {strides = array<i32>} : memref<576x256xbf16, #tpu.memory_space<vmem>>, vector<64x256xbf16>,
    %50 = vector.extract_strided_slice %6 {offsets = [0, 16], sizes = [64, 240], strides = [1, 1]} : vector<64x256xbf16> to vector<64x240xbf16>
    %51 = vector.extract_strided_slice %6 {offsets = [0, 0], sizes = [64, 16], strides = [1, 1]} : vector<64x256xbf16> to vector<64x16xbf16>
    %52 = tpu.concatenate %50, %51 in 1 : vector<64x240xbf16>, vector<64x16xbf16> -> vector<64x256xbf16>
    %c7 = arith.constant 7 : index
    %c0_22 = arith.constant 0 : index
    %53 = vector.load %arg4[%c7, %c0_22] : memref<16x256xbf16, #tpu.memory_space<vmem>>, vector<1x256xbf16>
    %54 = vector.broadcast %53 : vector<1x256xbf16> to vector<64x256xbf16>
    %55 = arith.mulf %52, %54 : vector<64x256xbf16>
    %c448 = arith.constant 448 : index
    %c0_23 = arith.constant 0 : index
    %56 = vector.load %arg7[%c448, %c0_23] : memref<576x256xbf16, #tpu.memory_space<vmem>>, vector<64x256xbf16>
    tpu.vector_store %arg7[%c448, %c0_23], %55 {strides = array<i32>} : memref<576x256xbf16, #tpu.memory_space<vmem>>, vector<64x256xbf16>,
    %57 = vector.extract_strided_slice %6 {offsets = [0, 17], sizes = [64, 239], strides = [1, 1]} : vector<64x256xbf16> to vector<64x239xbf16>
    %58 = vector.extract_strided_slice %6 {offsets = [0, 0], sizes = [64, 17], strides = [1, 1]} : vector<64x256xbf16> to vector<64x17xbf16>
    %59 = tpu.concatenate %57, %58 in 1 : vector<64x239xbf16>, vector<64x17xbf16> -> vector<64x256xbf16>
    %c8 = arith.constant 8 : index
    %c0_24 = arith.constant 0 : index
    %60 = vector.load %arg4[%c8, %c0_24] : memref<16x256xbf16, #tpu.memory_space<vmem>>, vector<1x256xbf16>
    %61 = vector.broadcast %60 : vector<1x256xbf16> to vector<64x256xbf16>
    %62 = arith.mulf %59, %61 : vector<64x256xbf16>
    %c512 = arith.constant 512 : index
    %c0_25 = arith.constant 0 : index
    %63 = vector.load %arg7[%c512, %c0_25] : memref<576x256xbf16, #tpu.memory_space<vmem>>, vector<64x256xbf16>
    tpu.vector_store %arg7[%c512, %c0_25], %62 {strides = array<i32>} : memref<576x256xbf16, #tpu.memory_space<vmem>>, vector<64x256xbf16>,
    %c0_26 = arith.constant 0 : index
    %c0_27 = arith.constant 0 : index
    %c0_28 = arith.constant 0 : index
    %64 = vector.load %arg2[%c0_26, %c0_27, %c0_28] : memref<17x64x576xbf16, #tpu.memory_space<vmem>>, vector<1x64x576xbf16>
    %65 = vector.shape_cast %64 : vector<1x64x576xbf16> to vector<64x576xbf16>
    %c0_29 = arith.constant 0 : index
    %c0_30 = arith.constant 0 : index
    %66 = vector.load %arg7[%c0_29, %c0_30] : memref<576x256xbf16, #tpu.memory_space<vmem>>, vector<576x256xbf16>
    %cst_31 = arith.constant dense<0.000000e+00> : vector<64x256xf32>
    %67 = tpu.matmul %65, %66, %cst_31 {dimension_numbers = #tpu.dot_dimension_numbers<[1], [0], [0], [1], [0, 0, 1, 1], [], []>} : vector<64x576xbf16>, vector<576x256xbf16>, vector<64x256xf32> -> vector<64x256xf32>
    %c0_32 = arith.constant 0 : index
    %c0_33 = arith.constant 0 : index
    %c0_34 = arith.constant 0 : index
    %68 = vector.load %arg3[%c0_32, %c0_33, %c0_34] : memref<17x64x1xf32, #tpu.memory_space<vmem>>, vector<1x64x1xf32>
    %69 = vector.shape_cast %68 : vector<1x64x1xf32> to vector<64x1xf32>
    %70 = vector.broadcast %69 : vector<64x1xf32> to vector<64x256xf32>
    %71 = arith.addf %67, %70 : vector<64x256xf32>
    %cst_35 = arith.constant 0.000000e+00 : f32
    %72 = vector.broadcast %cst_35 : f32 to vector<64x256xf32>
    %73 = arith.maximumf %71, %72 : vector<64x256xf32>
    %74 = arith.truncf %73 : vector<64x256xf32> to vector<64x256xbf16>
    %c0_36 = arith.constant 0 : index
    %c0_37 = arith.constant 0 : index
    %75 = vector.load %arg6[%c0_36, %c0_37] : memref<64x256xbf16, #tpu.memory_space<vmem>>, vector<64x256xbf16>
    tpu.vector_store %arg6[%c0_36, %c0_37], %74 {strides = array<i32>} : memref<64x256xbf16, #tpu.memory_space<vmem>>, vector<64x256xbf16>,
    %c0_i32 = arith.constant 0 : i32
    %c5_i32 = arith.constant 5 : i32
    %76 = arith.addi %c0_i32, %c5_i32 : i32
    %c1_i32 = arith.constant 1 : i32
    %77 = scf.for %arg8 = %c0_i32 to %76 step %c1_i32 iter_args(%arg9 = %73) -> (vector<64x256xf32>)  : i32 {
      %c3_i32 = arith.constant 3 : i32
      %148 = arith.muli %arg8, %c3_i32 : i32
      %c1_i32_87 = arith.constant 1 : i32
      %149 = arith.addi %c1_i32_87, %148 : i32
      %c0_i32_88 = arith.constant 0 : i32
      %150 = arith.addi %149, %c0_i32_88 : i32
      %c0_89 = arith.constant 0 : index
      %c0_90 = arith.constant 0 : index
      %151 = vector.load %arg6[%c0_89, %c0_90] : memref<64x256xbf16, #tpu.memory_space<vmem>>, vector<64x256xbf16>
      %152 = vector.extract_strided_slice %151 {offsets = [0, 239], sizes = [64, 17], strides = [1, 1]} : vector<64x256xbf16> to vector<64x17xbf16>
      %153 = vector.extract_strided_slice %151 {offsets = [0, 0], sizes = [64, 239], strides = [1, 1]} : vector<64x256xbf16> to vector<64x239xbf16>
      %154 = tpu.concatenate %152, %153 in 1 : vector<64x17xbf16>, vector<64x239xbf16> -> vector<64x256xbf16>
      %c0_91 = arith.constant 0 : index
      %c0_92 = arith.constant 0 : index
      %155 = vector.load %arg4[%c0_91, %c0_92] : memref<16x256xbf16, #tpu.memory_space<vmem>>, vector<1x256xbf16>
      %156 = vector.broadcast %155 : vector<1x256xbf16> to vector<64x256xbf16>
      %157 = arith.mulf %154, %156 : vector<64x256xbf16>
      %c0_93 = arith.constant 0 : index
      %c0_94 = arith.constant 0 : index
      %158 = vector.load %arg7[%c0_93, %c0_94] : memref<576x256xbf16, #tpu.memory_space<vmem>>, vector<64x256xbf16>
      tpu.vector_store %arg7[%c0_93, %c0_94], %157 {strides = array<i32>} : memref<576x256xbf16, #tpu.memory_space<vmem>>, vector<64x256xbf16>,
      %159 = vector.extract_strided_slice %151 {offsets = [0, 240], sizes = [64, 16], strides = [1, 1]} : vector<64x256xbf16> to vector<64x16xbf16>
      %160 = vector.extract_strided_slice %151 {offsets = [0, 0], sizes = [64, 240], strides = [1, 1]} : vector<64x256xbf16> to vector<64x240xbf16>
      %161 = tpu.concatenate %159, %160 in 1 : vector<64x16xbf16>, vector<64x240xbf16> -> vector<64x256xbf16>
      %c1_95 = arith.constant 1 : index
      %c0_96 = arith.constant 0 : index
      %162 = vector.load %arg4[%c1_95, %c0_96] : memref<16x256xbf16, #tpu.memory_space<vmem>>, vector<1x256xbf16>
      %163 = vector.broadcast %162 : vector<1x256xbf16> to vector<64x256xbf16>
      %164 = arith.mulf %161, %163 : vector<64x256xbf16>
      %c64_97 = arith.constant 64 : index
      %c0_98 = arith.constant 0 : index
      %165 = vector.load %arg7[%c64_97, %c0_98] : memref<576x256xbf16, #tpu.memory_space<vmem>>, vector<64x256xbf16>
      tpu.vector_store %arg7[%c64_97, %c0_98], %164 {strides = array<i32>} : memref<576x256xbf16, #tpu.memory_space<vmem>>, vector<64x256xbf16>,
      %166 = vector.extract_strided_slice %151 {offsets = [0, 241], sizes = [64, 15], strides = [1, 1]} : vector<64x256xbf16> to vector<64x15xbf16>
      %167 = vector.extract_strided_slice %151 {offsets = [0, 0], sizes = [64, 241], strides = [1, 1]} : vector<64x256xbf16> to vector<64x241xbf16>
      %168 = tpu.concatenate %166, %167 in 1 : vector<64x15xbf16>, vector<64x241xbf16> -> vector<64x256xbf16>
      %c2_99 = arith.constant 2 : index
      %c0_100 = arith.constant 0 : index
      %169 = vector.load %arg4[%c2_99, %c0_100] : memref<16x256xbf16, #tpu.memory_space<vmem>>, vector<1x256xbf16>
      %170 = vector.broadcast %169 : vector<1x256xbf16> to vector<64x256xbf16>
      %171 = arith.mulf %168, %170 : vector<64x256xbf16>
      %c128_101 = arith.constant 128 : index
      %c0_102 = arith.constant 0 : index
      %172 = vector.load %arg7[%c128_101, %c0_102] : memref<576x256xbf16, #tpu.memory_space<vmem>>, vector<64x256xbf16>
      tpu.vector_store %arg7[%c128_101, %c0_102], %171 {strides = array<i32>} : memref<576x256xbf16, #tpu.memory_space<vmem>>, vector<64x256xbf16>,
      %173 = vector.extract_strided_slice %151 {offsets = [0, 255], sizes = [64, 1], strides = [1, 1]} : vector<64x256xbf16> to vector<64x1xbf16>
      %174 = vector.extract_strided_slice %151 {offsets = [0, 0], sizes = [64, 255], strides = [1, 1]} : vector<64x256xbf16> to vector<64x255xbf16>
      %175 = tpu.concatenate %173, %174 in 1 : vector<64x1xbf16>, vector<64x255xbf16> -> vector<64x256xbf16>
      %c3_103 = arith.constant 3 : index
      %c0_104 = arith.constant 0 : index
      %176 = vector.load %arg4[%c3_103, %c0_104] : memref<16x256xbf16, #tpu.memory_space<vmem>>, vector<1x256xbf16>
      %177 = vector.broadcast %176 : vector<1x256xbf16> to vector<64x256xbf16>
      %178 = arith.mulf %175, %177 : vector<64x256xbf16>
      %c192_105 = arith.constant 192 : index
      %c0_106 = arith.constant 0 : index
      %179 = vector.load %arg7[%c192_105, %c0_106] : memref<576x256xbf16, #tpu.memory_space<vmem>>, vector<64x256xbf16>
      tpu.vector_store %arg7[%c192_105, %c0_106], %178 {strides = array<i32>} : memref<576x256xbf16, #tpu.memory_space<vmem>>, vector<64x256xbf16>,
      %c256_107 = arith.constant 256 : index
      %c0_108 = arith.constant 0 : index
      %180 = vector.load %arg7[%c256_107, %c0_108] : memref<576x256xbf16, #tpu.memory_space<vmem>>, vector<64x256xbf16>
      tpu.vector_store %arg7[%c256_107, %c0_108], %151 {strides = array<i32>} : memref<576x256xbf16, #tpu.memory_space<vmem>>, vector<64x256xbf16>,
      %181 = vector.extract_strided_slice %151 {offsets = [0, 1], sizes = [64, 255], strides = [1, 1]} : vector<64x256xbf16> to vector<64x255xbf16>
      %182 = vector.extract_strided_slice %151 {offsets = [0, 0], sizes = [64, 1], strides = [1, 1]} : vector<64x256xbf16> to vector<64x1xbf16>
      %183 = tpu.concatenate %181, %182 in 1 : vector<64x255xbf16>, vector<64x1xbf16> -> vector<64x256xbf16>
      %c5_109 = arith.constant 5 : index
      %c0_110 = arith.constant 0 : index
      %184 = vector.load %arg4[%c5_109, %c0_110] : memref<16x256xbf16, #tpu.memory_space<vmem>>, vector<1x256xbf16>
      %185 = vector.broadcast %184 : vector<1x256xbf16> to vector<64x256xbf16>
      %186 = arith.mulf %183, %185 : vector<64x256xbf16>
      %c320_111 = arith.constant 320 : index
      %c0_112 = arith.constant 0 : index
      %187 = vector.load %arg7[%c320_111, %c0_112] : memref<576x256xbf16, #tpu.memory_space<vmem>>, vector<64x256xbf16>
      tpu.vector_store %arg7[%c320_111, %c0_112], %186 {strides = array<i32>} : memref<576x256xbf16, #tpu.memory_space<vmem>>, vector<64x256xbf16>,
      %188 = vector.extract_strided_slice %151 {offsets = [0, 15], sizes = [64, 241], strides = [1, 1]} : vector<64x256xbf16> to vector<64x241xbf16>
      %189 = vector.extract_strided_slice %151 {offsets = [0, 0], sizes = [64, 15], strides = [1, 1]} : vector<64x256xbf16> to vector<64x15xbf16>
      %190 = tpu.concatenate %188, %189 in 1 : vector<64x241xbf16>, vector<64x15xbf16> -> vector<64x256xbf16>
      %c6_113 = arith.constant 6 : index
      %c0_114 = arith.constant 0 : index
      %191 = vector.load %arg4[%c6_113, %c0_114] : memref<16x256xbf16, #tpu.memory_space<vmem>>, vector<1x256xbf16>
      %192 = vector.broadcast %191 : vector<1x256xbf16> to vector<64x256xbf16>
      %193 = arith.mulf %190, %192 : vector<64x256xbf16>
      %c384_115 = arith.constant 384 : index
      %c0_116 = arith.constant 0 : index
      %194 = vector.load %arg7[%c384_115, %c0_116] : memref<576x256xbf16, #tpu.memory_space<vmem>>, vector<64x256xbf16>
      tpu.vector_store %arg7[%c384_115, %c0_116], %193 {strides = array<i32>} : memref<576x256xbf16, #tpu.memory_space<vmem>>, vector<64x256xbf16>,
      %195 = vector.extract_strided_slice %151 {offsets = [0, 16], sizes = [64, 240], strides = [1, 1]} : vector<64x256xbf16> to vector<64x240xbf16>
      %196 = vector.extract_strided_slice %151 {offsets = [0, 0], sizes = [64, 16], strides = [1, 1]} : vector<64x256xbf16> to vector<64x16xbf16>
      %197 = tpu.concatenate %195, %196 in 1 : vector<64x240xbf16>, vector<64x16xbf16> -> vector<64x256xbf16>
      %c7_117 = arith.constant 7 : index
      %c0_118 = arith.constant 0 : index
      %198 = vector.load %arg4[%c7_117, %c0_118] : memref<16x256xbf16, #tpu.memory_space<vmem>>, vector<1x256xbf16>
      %199 = vector.broadcast %198 : vector<1x256xbf16> to vector<64x256xbf16>
      %200 = arith.mulf %197, %199 : vector<64x256xbf16>
      %c448_119 = arith.constant 448 : index
      %c0_120 = arith.constant 0 : index
      %201 = vector.load %arg7[%c448_119, %c0_120] : memref<576x256xbf16, #tpu.memory_space<vmem>>, vector<64x256xbf16>
      tpu.vector_store %arg7[%c448_119, %c0_120], %200 {strides = array<i32>} : memref<576x256xbf16, #tpu.memory_space<vmem>>, vector<64x256xbf16>,
      %202 = vector.extract_strided_slice %151 {offsets = [0, 17], sizes = [64, 239], strides = [1, 1]} : vector<64x256xbf16> to vector<64x239xbf16>
      %203 = vector.extract_strided_slice %151 {offsets = [0, 0], sizes = [64, 17], strides = [1, 1]} : vector<64x256xbf16> to vector<64x17xbf16>
      %204 = tpu.concatenate %202, %203 in 1 : vector<64x239xbf16>, vector<64x17xbf16> -> vector<64x256xbf16>
      %c8_121 = arith.constant 8 : index
      %c0_122 = arith.constant 0 : index
      %205 = vector.load %arg4[%c8_121, %c0_122] : memref<16x256xbf16, #tpu.memory_space<vmem>>, vector<1x256xbf16>
      %206 = vector.broadcast %205 : vector<1x256xbf16> to vector<64x256xbf16>
      %207 = arith.mulf %204, %206 : vector<64x256xbf16>
      %c512_123 = arith.constant 512 : index
      %c0_124 = arith.constant 0 : index
      %208 = vector.load %arg7[%c512_123, %c0_124] : memref<576x256xbf16, #tpu.memory_space<vmem>>, vector<64x256xbf16>
      tpu.vector_store %arg7[%c512_123, %c0_124], %207 {strides = array<i32>} : memref<576x256xbf16, #tpu.memory_space<vmem>>, vector<64x256xbf16>,
      %209 = arith.index_cast %150 : i32 to index
      %c0_125 = arith.constant 0 : index
      %c0_126 = arith.constant 0 : index
      %210 = vector.load %arg2[%209, %c0_125, %c0_126] : memref<17x64x576xbf16, #tpu.memory_space<vmem>>, vector<1x64x576xbf16>
      %211 = vector.shape_cast %210 : vector<1x64x576xbf16> to vector<64x576xbf16>
      %c0_127 = arith.constant 0 : index
      %c0_128 = arith.constant 0 : index
      %212 = vector.load %arg7[%c0_127, %c0_128] : memref<576x256xbf16, #tpu.memory_space<vmem>>, vector<576x256xbf16>
      %cst_129 = arith.constant dense<0.000000e+00> : vector<64x256xf32>
      %213 = tpu.matmul %211, %212, %cst_129 {dimension_numbers = #tpu.dot_dimension_numbers<[1], [0], [0], [1], [0, 0, 1, 1], [], []>} : vector<64x576xbf16>, vector<576x256xbf16>, vector<64x256xf32> -> vector<64x256xf32>
      %214 = arith.index_cast %150 : i32 to index
      %c0_130 = arith.constant 0 : index
      %c0_131 = arith.constant 0 : index
      %215 = vector.load %arg3[%214, %c0_130, %c0_131] : memref<17x64x1xf32, #tpu.memory_space<vmem>>, vector<1x64x1xf32>
      %216 = vector.shape_cast %215 : vector<1x64x1xf32> to vector<64x1xf32>
      %217 = vector.broadcast %216 : vector<64x1xf32> to vector<64x256xf32>
      %218 = arith.addf %213, %217 : vector<64x256xf32>
      %cst_132 = arith.constant 0.000000e+00 : f32
      %219 = vector.broadcast %cst_132 : f32 to vector<64x256xf32>
      %220 = arith.maximumf %218, %219 : vector<64x256xf32>
      %221 = arith.truncf %220 : vector<64x256xf32> to vector<64x256xbf16>
      %c0_133 = arith.constant 0 : index
      %c0_134 = arith.constant 0 : index
      %222 = vector.load %arg6[%c0_133, %c0_134] : memref<64x256xbf16, #tpu.memory_space<vmem>>, vector<64x256xbf16>
      tpu.vector_store %arg6[%c0_133, %c0_134], %221 {strides = array<i32>} : memref<64x256xbf16, #tpu.memory_space<vmem>>, vector<64x256xbf16>,
      %c3_i32_135 = arith.constant 3 : i32
      %223 = arith.muli %arg8, %c3_i32_135 : i32
      %c1_i32_136 = arith.constant 1 : i32
      %224 = arith.addi %c1_i32_136, %223 : i32
      %c1_i32_137 = arith.constant 1 : i32
      %225 = arith.addi %224, %c1_i32_137 : i32
      %c0_138 = arith.constant 0 : index
      %c0_139 = arith.constant 0 : index
      %226 = vector.load %arg6[%c0_138, %c0_139] : memref<64x256xbf16, #tpu.memory_space<vmem>>, vector<64x256xbf16>
      %227 = vector.extract_strided_slice %226 {offsets = [0, 239], sizes = [64, 17], strides = [1, 1]} : vector<64x256xbf16> to vector<64x17xbf16>
      %228 = vector.extract_strided_slice %226 {offsets = [0, 0], sizes = [64, 239], strides = [1, 1]} : vector<64x256xbf16> to vector<64x239xbf16>
      %229 = tpu.concatenate %227, %228 in 1 : vector<64x17xbf16>, vector<64x239xbf16> -> vector<64x256xbf16>
      %c0_140 = arith.constant 0 : index
      %c0_141 = arith.constant 0 : index
      %230 = vector.load %arg4[%c0_140, %c0_141] : memref<16x256xbf16, #tpu.memory_space<vmem>>, vector<1x256xbf16>
      %231 = vector.broadcast %230 : vector<1x256xbf16> to vector<64x256xbf16>
      %232 = arith.mulf %229, %231 : vector<64x256xbf16>
      %c0_142 = arith.constant 0 : index
      %c0_143 = arith.constant 0 : index
      %233 = vector.load %arg7[%c0_142, %c0_143] : memref<576x256xbf16, #tpu.memory_space<vmem>>, vector<64x256xbf16>
      tpu.vector_store %arg7[%c0_142, %c0_143], %232 {strides = array<i32>} : memref<576x256xbf16, #tpu.memory_space<vmem>>, vector<64x256xbf16>,
      %234 = vector.extract_strided_slice %226 {offsets = [0, 240], sizes = [64, 16], strides = [1, 1]} : vector<64x256xbf16> to vector<64x16xbf16>
      %235 = vector.extract_strided_slice %226 {offsets = [0, 0], sizes = [64, 240], strides = [1, 1]} : vector<64x256xbf16> to vector<64x240xbf16>
      %236 = tpu.concatenate %234, %235 in 1 : vector<64x16xbf16>, vector<64x240xbf16> -> vector<64x256xbf16>
      %c1_144 = arith.constant 1 : index
      %c0_145 = arith.constant 0 : index
      %237 = vector.load %arg4[%c1_144, %c0_145] : memref<16x256xbf16, #tpu.memory_space<vmem>>, vector<1x256xbf16>
      %238 = vector.broadcast %237 : vector<1x256xbf16> to vector<64x256xbf16>
      %239 = arith.mulf %236, %238 : vector<64x256xbf16>
      %c64_146 = arith.constant 64 : index
      %c0_147 = arith.constant 0 : index
      %240 = vector.load %arg7[%c64_146, %c0_147] : memref<576x256xbf16, #tpu.memory_space<vmem>>, vector<64x256xbf16>
      tpu.vector_store %arg7[%c64_146, %c0_147], %239 {strides = array<i32>} : memref<576x256xbf16, #tpu.memory_space<vmem>>, vector<64x256xbf16>,
      %241 = vector.extract_strided_slice %226 {offsets = [0, 241], sizes = [64, 15], strides = [1, 1]} : vector<64x256xbf16> to vector<64x15xbf16>
      %242 = vector.extract_strided_slice %226 {offsets = [0, 0], sizes = [64, 241], strides = [1, 1]} : vector<64x256xbf16> to vector<64x241xbf16>
      %243 = tpu.concatenate %241, %242 in 1 : vector<64x15xbf16>, vector<64x241xbf16> -> vector<64x256xbf16>
      %c2_148 = arith.constant 2 : index
      %c0_149 = arith.constant 0 : index
      %244 = vector.load %arg4[%c2_148, %c0_149] : memref<16x256xbf16, #tpu.memory_space<vmem>>, vector<1x256xbf16>
      %245 = vector.broadcast %244 : vector<1x256xbf16> to vector<64x256xbf16>
      %246 = arith.mulf %243, %245 : vector<64x256xbf16>
      %c128_150 = arith.constant 128 : index
      %c0_151 = arith.constant 0 : index
      %247 = vector.load %arg7[%c128_150, %c0_151] : memref<576x256xbf16, #tpu.memory_space<vmem>>, vector<64x256xbf16>
      tpu.vector_store %arg7[%c128_150, %c0_151], %246 {strides = array<i32>} : memref<576x256xbf16, #tpu.memory_space<vmem>>, vector<64x256xbf16>,
      %248 = vector.extract_strided_slice %226 {offsets = [0, 255], sizes = [64, 1], strides = [1, 1]} : vector<64x256xbf16> to vector<64x1xbf16>
      %249 = vector.extract_strided_slice %226 {offsets = [0, 0], sizes = [64, 255], strides = [1, 1]} : vector<64x256xbf16> to vector<64x255xbf16>
      %250 = tpu.concatenate %248, %249 in 1 : vector<64x1xbf16>, vector<64x255xbf16> -> vector<64x256xbf16>
      %c3_152 = arith.constant 3 : index
      %c0_153 = arith.constant 0 : index
      %251 = vector.load %arg4[%c3_152, %c0_153] : memref<16x256xbf16, #tpu.memory_space<vmem>>, vector<1x256xbf16>
      %252 = vector.broadcast %251 : vector<1x256xbf16> to vector<64x256xbf16>
      %253 = arith.mulf %250, %252 : vector<64x256xbf16>
      %c192_154 = arith.constant 192 : index
      %c0_155 = arith.constant 0 : index
      %254 = vector.load %arg7[%c192_154, %c0_155] : memref<576x256xbf16, #tpu.memory_space<vmem>>, vector<64x256xbf16>
      tpu.vector_store %arg7[%c192_154, %c0_155], %253 {strides = array<i32>} : memref<576x256xbf16, #tpu.memory_space<vmem>>, vector<64x256xbf16>,
      %c256_156 = arith.constant 256 : index
      %c0_157 = arith.constant 0 : index
      %255 = vector.load %arg7[%c256_156, %c0_157] : memref<576x256xbf16, #tpu.memory_space<vmem>>, vector<64x256xbf16>
      tpu.vector_store %arg7[%c256_156, %c0_157], %226 {strides = array<i32>} : memref<576x256xbf16, #tpu.memory_space<vmem>>, vector<64x256xbf16>,
      %256 = vector.extract_strided_slice %226 {offsets = [0, 1], sizes = [64, 255], strides = [1, 1]} : vector<64x256xbf16> to vector<64x255xbf16>
      %257 = vector.extract_strided_slice %226 {offsets = [0, 0], sizes = [64, 1], strides = [1, 1]} : vector<64x256xbf16> to vector<64x1xbf16>
      %258 = tpu.concatenate %256, %257 in 1 : vector<64x255xbf16>, vector<64x1xbf16> -> vector<64x256xbf16>
      %c5_158 = arith.constant 5 : index
      %c0_159 = arith.constant 0 : index
      %259 = vector.load %arg4[%c5_158, %c0_159] : memref<16x256xbf16, #tpu.memory_space<vmem>>, vector<1x256xbf16>
      %260 = vector.broadcast %259 : vector<1x256xbf16> to vector<64x256xbf16>
      %261 = arith.mulf %258, %260 : vector<64x256xbf16>
      %c320_160 = arith.constant 320 : index
      %c0_161 = arith.constant 0 : index
      %262 = vector.load %arg7[%c320_160, %c0_161] : memref<576x256xbf16, #tpu.memory_space<vmem>>, vector<64x256xbf16>
      tpu.vector_store %arg7[%c320_160, %c0_161], %261 {strides = array<i32>} : memref<576x256xbf16, #tpu.memory_space<vmem>>, vector<64x256xbf16>,
      %263 = vector.extract_strided_slice %226 {offsets = [0, 15], sizes = [64, 241], strides = [1, 1]} : vector<64x256xbf16> to vector<64x241xbf16>
      %264 = vector.extract_strided_slice %226 {offsets = [0, 0], sizes = [64, 15], strides = [1, 1]} : vector<64x256xbf16> to vector<64x15xbf16>
      %265 = tpu.concatenate %263, %264 in 1 : vector<64x241xbf16>, vector<64x15xbf16> -> vector<64x256xbf16>
      %c6_162 = arith.constant 6 : index
      %c0_163 = arith.constant 0 : index
      %266 = vector.load %arg4[%c6_162, %c0_163] : memref<16x256xbf16, #tpu.memory_space<vmem>>, vector<1x256xbf16>
      %267 = vector.broadcast %266 : vector<1x256xbf16> to vector<64x256xbf16>
      %268 = arith.mulf %265, %267 : vector<64x256xbf16>
      %c384_164 = arith.constant 384 : index
      %c0_165 = arith.constant 0 : index
      %269 = vector.load %arg7[%c384_164, %c0_165] : memref<576x256xbf16, #tpu.memory_space<vmem>>, vector<64x256xbf16>
      tpu.vector_store %arg7[%c384_164, %c0_165], %268 {strides = array<i32>} : memref<576x256xbf16, #tpu.memory_space<vmem>>, vector<64x256xbf16>,
      %270 = vector.extract_strided_slice %226 {offsets = [0, 16], sizes = [64, 240], strides = [1, 1]} : vector<64x256xbf16> to vector<64x240xbf16>
      %271 = vector.extract_strided_slice %226 {offsets = [0, 0], sizes = [64, 16], strides = [1, 1]} : vector<64x256xbf16> to vector<64x16xbf16>
      %272 = tpu.concatenate %270, %271 in 1 : vector<64x240xbf16>, vector<64x16xbf16> -> vector<64x256xbf16>
      %c7_166 = arith.constant 7 : index
      %c0_167 = arith.constant 0 : index
      %273 = vector.load %arg4[%c7_166, %c0_167] : memref<16x256xbf16, #tpu.memory_space<vmem>>, vector<1x256xbf16>
      %274 = vector.broadcast %273 : vector<1x256xbf16> to vector<64x256xbf16>
      %275 = arith.mulf %272, %274 : vector<64x256xbf16>
      %c448_168 = arith.constant 448 : index
      %c0_169 = arith.constant 0 : index
      %276 = vector.load %arg7[%c448_168, %c0_169] : memref<576x256xbf16, #tpu.memory_space<vmem>>, vector<64x256xbf16>
      tpu.vector_store %arg7[%c448_168, %c0_169], %275 {strides = array<i32>} : memref<576x256xbf16, #tpu.memory_space<vmem>>, vector<64x256xbf16>,
      %277 = vector.extract_strided_slice %226 {offsets = [0, 17], sizes = [64, 239], strides = [1, 1]} : vector<64x256xbf16> to vector<64x239xbf16>
      %278 = vector.extract_strided_slice %226 {offsets = [0, 0], sizes = [64, 17], strides = [1, 1]} : vector<64x256xbf16> to vector<64x17xbf16>
      %279 = tpu.concatenate %277, %278 in 1 : vector<64x239xbf16>, vector<64x17xbf16> -> vector<64x256xbf16>
      %c8_170 = arith.constant 8 : index
      %c0_171 = arith.constant 0 : index
      %280 = vector.load %arg4[%c8_170, %c0_171] : memref<16x256xbf16, #tpu.memory_space<vmem>>, vector<1x256xbf16>
      %281 = vector.broadcast %280 : vector<1x256xbf16> to vector<64x256xbf16>
      %282 = arith.mulf %279, %281 : vector<64x256xbf16>
      %c512_172 = arith.constant 512 : index
      %c0_173 = arith.constant 0 : index
      %283 = vector.load %arg7[%c512_172, %c0_173] : memref<576x256xbf16, #tpu.memory_space<vmem>>, vector<64x256xbf16>
      tpu.vector_store %arg7[%c512_172, %c0_173], %282 {strides = array<i32>} : memref<576x256xbf16, #tpu.memory_space<vmem>>, vector<64x256xbf16>,
      %284 = arith.index_cast %225 : i32 to index
      %c0_174 = arith.constant 0 : index
      %c0_175 = arith.constant 0 : index
      %285 = vector.load %arg2[%284, %c0_174, %c0_175] : memref<17x64x576xbf16, #tpu.memory_space<vmem>>, vector<1x64x576xbf16>
      %286 = vector.shape_cast %285 : vector<1x64x576xbf16> to vector<64x576xbf16>
      %c0_176 = arith.constant 0 : index
      %c0_177 = arith.constant 0 : index
      %287 = vector.load %arg7[%c0_176, %c0_177] : memref<576x256xbf16, #tpu.memory_space<vmem>>, vector<576x256xbf16>
      %cst_178 = arith.constant dense<0.000000e+00> : vector<64x256xf32>
      %288 = tpu.matmul %286, %287, %cst_178 {dimension_numbers = #tpu.dot_dimension_numbers<[1], [0], [0], [1], [0, 0, 1, 1], [], []>} : vector<64x576xbf16>, vector<576x256xbf16>, vector<64x256xf32> -> vector<64x256xf32>
      %289 = arith.index_cast %225 : i32 to index
      %c0_179 = arith.constant 0 : index
      %c0_180 = arith.constant 0 : index
      %290 = vector.load %arg3[%289, %c0_179, %c0_180] : memref<17x64x1xf32, #tpu.memory_space<vmem>>, vector<1x64x1xf32>
      %291 = vector.shape_cast %290 : vector<1x64x1xf32> to vector<64x1xf32>
      %292 = vector.broadcast %291 : vector<64x1xf32> to vector<64x256xf32>
      %293 = arith.addf %288, %292 : vector<64x256xf32>
      %cst_181 = arith.constant 0.000000e+00 : f32
      %294 = vector.broadcast %cst_181 : f32 to vector<64x256xf32>
      %295 = arith.maximumf %293, %294 : vector<64x256xf32>
      %296 = arith.truncf %295 : vector<64x256xf32> to vector<64x256xbf16>
      %c0_182 = arith.constant 0 : index
      %c0_183 = arith.constant 0 : index
      %297 = vector.load %arg6[%c0_182, %c0_183] : memref<64x256xbf16, #tpu.memory_space<vmem>>, vector<64x256xbf16>
      tpu.vector_store %arg6[%c0_182, %c0_183], %296 {strides = array<i32>} : memref<64x256xbf16, #tpu.memory_space<vmem>>, vector<64x256xbf16>,
      %c3_i32_184 = arith.constant 3 : i32
      %298 = arith.muli %arg8, %c3_i32_184 : i32
      %c1_i32_185 = arith.constant 1 : i32
      %299 = arith.addi %c1_i32_185, %298 : i32
      %c2_i32 = arith.constant 2 : i32
      %300 = arith.addi %299, %c2_i32 : i32
      %c0_186 = arith.constant 0 : index
      %c0_187 = arith.constant 0 : index
      %301 = vector.load %arg6[%c0_186, %c0_187] : memref<64x256xbf16, #tpu.memory_space<vmem>>, vector<64x256xbf16>
      %302 = vector.extract_strided_slice %301 {offsets = [0, 239], sizes = [64, 17], strides = [1, 1]} : vector<64x256xbf16> to vector<64x17xbf16>
      %303 = vector.extract_strided_slice %301 {offsets = [0, 0], sizes = [64, 239], strides = [1, 1]} : vector<64x256xbf16> to vector<64x239xbf16>
      %304 = tpu.concatenate %302, %303 in 1 : vector<64x17xbf16>, vector<64x239xbf16> -> vector<64x256xbf16>
      %c0_188 = arith.constant 0 : index
      %c0_189 = arith.constant 0 : index
      %305 = vector.load %arg4[%c0_188, %c0_189] : memref<16x256xbf16, #tpu.memory_space<vmem>>, vector<1x256xbf16>
      %306 = vector.broadcast %305 : vector<1x256xbf16> to vector<64x256xbf16>
      %307 = arith.mulf %304, %306 : vector<64x256xbf16>
      %c0_190 = arith.constant 0 : index
      %c0_191 = arith.constant 0 : index
      %308 = vector.load %arg7[%c0_190, %c0_191] : memref<576x256xbf16, #tpu.memory_space<vmem>>, vector<64x256xbf16>
      tpu.vector_store %arg7[%c0_190, %c0_191], %307 {strides = array<i32>} : memref<576x256xbf16, #tpu.memory_space<vmem>>, vector<64x256xbf16>,
      %309 = vector.extract_strided_slice %301 {offsets = [0, 240], sizes = [64, 16], strides = [1, 1]} : vector<64x256xbf16> to vector<64x16xbf16>
      %310 = vector.extract_strided_slice %301 {offsets = [0, 0], sizes = [64, 240], strides = [1, 1]} : vector<64x256xbf16> to vector<64x240xbf16>
      %311 = tpu.concatenate %309, %310 in 1 : vector<64x16xbf16>, vector<64x240xbf16> -> vector<64x256xbf16>
      %c1_192 = arith.constant 1 : index
      %c0_193 = arith.constant 0 : index
      %312 = vector.load %arg4[%c1_192, %c0_193] : memref<16x256xbf16, #tpu.memory_space<vmem>>, vector<1x256xbf16>
      %313 = vector.broadcast %312 : vector<1x256xbf16> to vector<64x256xbf16>
      %314 = arith.mulf %311, %313 : vector<64x256xbf16>
      %c64_194 = arith.constant 64 : index
      %c0_195 = arith.constant 0 : index
      %315 = vector.load %arg7[%c64_194, %c0_195] : memref<576x256xbf16, #tpu.memory_space<vmem>>, vector<64x256xbf16>
      tpu.vector_store %arg7[%c64_194, %c0_195], %314 {strides = array<i32>} : memref<576x256xbf16, #tpu.memory_space<vmem>>, vector<64x256xbf16>,
      %316 = vector.extract_strided_slice %301 {offsets = [0, 241], sizes = [64, 15], strides = [1, 1]} : vector<64x256xbf16> to vector<64x15xbf16>
      %317 = vector.extract_strided_slice %301 {offsets = [0, 0], sizes = [64, 241], strides = [1, 1]} : vector<64x256xbf16> to vector<64x241xbf16>
      %318 = tpu.concatenate %316, %317 in 1 : vector<64x15xbf16>, vector<64x241xbf16> -> vector<64x256xbf16>
      %c2_196 = arith.constant 2 : index
      %c0_197 = arith.constant 0 : index
      %319 = vector.load %arg4[%c2_196, %c0_197] : memref<16x256xbf16, #tpu.memory_space<vmem>>, vector<1x256xbf16>
      %320 = vector.broadcast %319 : vector<1x256xbf16> to vector<64x256xbf16>
      %321 = arith.mulf %318, %320 : vector<64x256xbf16>
      %c128_198 = arith.constant 128 : index
      %c0_199 = arith.constant 0 : index
      %322 = vector.load %arg7[%c128_198, %c0_199] : memref<576x256xbf16, #tpu.memory_space<vmem>>, vector<64x256xbf16>
      tpu.vector_store %arg7[%c128_198, %c0_199], %321 {strides = array<i32>} : memref<576x256xbf16, #tpu.memory_space<vmem>>, vector<64x256xbf16>,
      %323 = vector.extract_strided_slice %301 {offsets = [0, 255], sizes = [64, 1], strides = [1, 1]} : vector<64x256xbf16> to vector<64x1xbf16>
      %324 = vector.extract_strided_slice %301 {offsets = [0, 0], sizes = [64, 255], strides = [1, 1]} : vector<64x256xbf16> to vector<64x255xbf16>
      %325 = tpu.concatenate %323, %324 in 1 : vector<64x1xbf16>, vector<64x255xbf16> -> vector<64x256xbf16>
      %c3_200 = arith.constant 3 : index
      %c0_201 = arith.constant 0 : index
      %326 = vector.load %arg4[%c3_200, %c0_201] : memref<16x256xbf16, #tpu.memory_space<vmem>>, vector<1x256xbf16>
      %327 = vector.broadcast %326 : vector<1x256xbf16> to vector<64x256xbf16>
      %328 = arith.mulf %325, %327 : vector<64x256xbf16>
      %c192_202 = arith.constant 192 : index
      %c0_203 = arith.constant 0 : index
      %329 = vector.load %arg7[%c192_202, %c0_203] : memref<576x256xbf16, #tpu.memory_space<vmem>>, vector<64x256xbf16>
      tpu.vector_store %arg7[%c192_202, %c0_203], %328 {strides = array<i32>} : memref<576x256xbf16, #tpu.memory_space<vmem>>, vector<64x256xbf16>,
      %c256_204 = arith.constant 256 : index
      %c0_205 = arith.constant 0 : index
      %330 = vector.load %arg7[%c256_204, %c0_205] : memref<576x256xbf16, #tpu.memory_space<vmem>>, vector<64x256xbf16>
      tpu.vector_store %arg7[%c256_204, %c0_205], %301 {strides = array<i32>} : memref<576x256xbf16, #tpu.memory_space<vmem>>, vector<64x256xbf16>,
      %331 = vector.extract_strided_slice %301 {offsets = [0, 1], sizes = [64, 255], strides = [1, 1]} : vector<64x256xbf16> to vector<64x255xbf16>
      %332 = vector.extract_strided_slice %301 {offsets = [0, 0], sizes = [64, 1], strides = [1, 1]} : vector<64x256xbf16> to vector<64x1xbf16>
      %333 = tpu.concatenate %331, %332 in 1 : vector<64x255xbf16>, vector<64x1xbf16> -> vector<64x256xbf16>
      %c5_206 = arith.constant 5 : index
      %c0_207 = arith.constant 0 : index
      %334 = vector.load %arg4[%c5_206, %c0_207] : memref<16x256xbf16, #tpu.memory_space<vmem>>, vector<1x256xbf16>
      %335 = vector.broadcast %334 : vector<1x256xbf16> to vector<64x256xbf16>
      %336 = arith.mulf %333, %335 : vector<64x256xbf16>
      %c320_208 = arith.constant 320 : index
      %c0_209 = arith.constant 0 : index
      %337 = vector.load %arg7[%c320_208, %c0_209] : memref<576x256xbf16, #tpu.memory_space<vmem>>, vector<64x256xbf16>
      tpu.vector_store %arg7[%c320_208, %c0_209], %336 {strides = array<i32>} : memref<576x256xbf16, #tpu.memory_space<vmem>>, vector<64x256xbf16>,
      %338 = vector.extract_strided_slice %301 {offsets = [0, 15], sizes = [64, 241], strides = [1, 1]} : vector<64x256xbf16> to vector<64x241xbf16>
      %339 = vector.extract_strided_slice %301 {offsets = [0, 0], sizes = [64, 15], strides = [1, 1]} : vector<64x256xbf16> to vector<64x15xbf16>
      %340 = tpu.concatenate %338, %339 in 1 : vector<64x241xbf16>, vector<64x15xbf16> -> vector<64x256xbf16>
      %c6_210 = arith.constant 6 : index
      %c0_211 = arith.constant 0 : index
      %341 = vector.load %arg4[%c6_210, %c0_211] : memref<16x256xbf16, #tpu.memory_space<vmem>>, vector<1x256xbf16>
      %342 = vector.broadcast %341 : vector<1x256xbf16> to vector<64x256xbf16>
      %343 = arith.mulf %340, %342 : vector<64x256xbf16>
      %c384_212 = arith.constant 384 : index
      %c0_213 = arith.constant 0 : index
      %344 = vector.load %arg7[%c384_212, %c0_213] : memref<576x256xbf16, #tpu.memory_space<vmem>>, vector<64x256xbf16>
      tpu.vector_store %arg7[%c384_212, %c0_213], %343 {strides = array<i32>} : memref<576x256xbf16, #tpu.memory_space<vmem>>, vector<64x256xbf16>,
      %345 = vector.extract_strided_slice %301 {offsets = [0, 16], sizes = [64, 240], strides = [1, 1]} : vector<64x256xbf16> to vector<64x240xbf16>
      %346 = vector.extract_strided_slice %301 {offsets = [0, 0], sizes = [64, 16], strides = [1, 1]} : vector<64x256xbf16> to vector<64x16xbf16>
      %347 = tpu.concatenate %345, %346 in 1 : vector<64x240xbf16>, vector<64x16xbf16> -> vector<64x256xbf16>
      %c7_214 = arith.constant 7 : index
      %c0_215 = arith.constant 0 : index
      %348 = vector.load %arg4[%c7_214, %c0_215] : memref<16x256xbf16, #tpu.memory_space<vmem>>, vector<1x256xbf16>
      %349 = vector.broadcast %348 : vector<1x256xbf16> to vector<64x256xbf16>
      %350 = arith.mulf %347, %349 : vector<64x256xbf16>
      %c448_216 = arith.constant 448 : index
      %c0_217 = arith.constant 0 : index
      %351 = vector.load %arg7[%c448_216, %c0_217] : memref<576x256xbf16, #tpu.memory_space<vmem>>, vector<64x256xbf16>
      tpu.vector_store %arg7[%c448_216, %c0_217], %350 {strides = array<i32>} : memref<576x256xbf16, #tpu.memory_space<vmem>>, vector<64x256xbf16>,
      %352 = vector.extract_strided_slice %301 {offsets = [0, 17], sizes = [64, 239], strides = [1, 1]} : vector<64x256xbf16> to vector<64x239xbf16>
      %353 = vector.extract_strided_slice %301 {offsets = [0, 0], sizes = [64, 17], strides = [1, 1]} : vector<64x256xbf16> to vector<64x17xbf16>
      %354 = tpu.concatenate %352, %353 in 1 : vector<64x239xbf16>, vector<64x17xbf16> -> vector<64x256xbf16>
      %c8_218 = arith.constant 8 : index
      %c0_219 = arith.constant 0 : index
      %355 = vector.load %arg4[%c8_218, %c0_219] : memref<16x256xbf16, #tpu.memory_space<vmem>>, vector<1x256xbf16>
      %356 = vector.broadcast %355 : vector<1x256xbf16> to vector<64x256xbf16>
      %357 = arith.mulf %354, %356 : vector<64x256xbf16>
      %c512_220 = arith.constant 512 : index
      %c0_221 = arith.constant 0 : index
      %358 = vector.load %arg7[%c512_220, %c0_221] : memref<576x256xbf16, #tpu.memory_space<vmem>>, vector<64x256xbf16>
      tpu.vector_store %arg7[%c512_220, %c0_221], %357 {strides = array<i32>} : memref<576x256xbf16, #tpu.memory_space<vmem>>, vector<64x256xbf16>,
      %359 = arith.index_cast %300 : i32 to index
      %c0_222 = arith.constant 0 : index
      %c0_223 = arith.constant 0 : index
      %360 = vector.load %arg2[%359, %c0_222, %c0_223] : memref<17x64x576xbf16, #tpu.memory_space<vmem>>, vector<1x64x576xbf16>
      %361 = vector.shape_cast %360 : vector<1x64x576xbf16> to vector<64x576xbf16>
      %c0_224 = arith.constant 0 : index
      %c0_225 = arith.constant 0 : index
      %362 = vector.load %arg7[%c0_224, %c0_225] : memref<576x256xbf16, #tpu.memory_space<vmem>>, vector<576x256xbf16>
      %cst_226 = arith.constant dense<0.000000e+00> : vector<64x256xf32>
      %363 = tpu.matmul %361, %362, %cst_226 {dimension_numbers = #tpu.dot_dimension_numbers<[1], [0], [0], [1], [0, 0, 1, 1], [], []>} : vector<64x576xbf16>, vector<576x256xbf16>, vector<64x256xf32> -> vector<64x256xf32>
      %364 = arith.index_cast %300 : i32 to index
      %c0_227 = arith.constant 0 : index
      %c0_228 = arith.constant 0 : index
      %365 = vector.load %arg3[%364, %c0_227, %c0_228] : memref<17x64x1xf32, #tpu.memory_space<vmem>>, vector<1x64x1xf32>
      %366 = vector.shape_cast %365 : vector<1x64x1xf32> to vector<64x1xf32>
      %367 = vector.broadcast %366 : vector<64x1xf32> to vector<64x256xf32>
      %368 = arith.addf %363, %367 : vector<64x256xf32>
      %cst_229 = arith.constant 0.000000e+00 : f32
      %369 = vector.broadcast %cst_229 : f32 to vector<64x256xf32>
      %370 = arith.maximumf %368, %369 : vector<64x256xf32>
      %371 = arith.addf %370, %arg9 : vector<64x256xf32>
      %372 = arith.truncf %371 : vector<64x256xf32> to vector<64x256xbf16>
      %c0_230 = arith.constant 0 : index
      %c0_231 = arith.constant 0 : index
      %373 = vector.load %arg6[%c0_230, %c0_231] : memref<64x256xbf16, #tpu.memory_space<vmem>>, vector<64x256xbf16>
      tpu.vector_store %arg6[%c0_230, %c0_231], %372 {strides = array<i32>} : memref<64x256xbf16, #tpu.memory_space<vmem>>, vector<64x256xbf16>,
      scf.yield %371 : vector<64x256xf32>
    }
    %c5_i32_38 = arith.constant 5 : i32
    %c0_39 = arith.constant 0 : index
    %c0_40 = arith.constant 0 : index
    %78 = vector.load %arg6[%c0_39, %c0_40] : memref<64x256xbf16, #tpu.memory_space<vmem>>, vector<64x256xbf16>
    %79 = vector.extract_strided_slice %78 {offsets = [0, 239], sizes = [64, 17], strides = [1, 1]} : vector<64x256xbf16> to vector<64x17xbf16>
    %80 = vector.extract_strided_slice %78 {offsets = [0, 0], sizes = [64, 239], strides = [1, 1]} : vector<64x256xbf16> to vector<64x239xbf16>
    %81 = tpu.concatenate %79, %80 in 1 : vector<64x17xbf16>, vector<64x239xbf16> -> vector<64x256xbf16>
    %c0_41 = arith.constant 0 : index
    %c0_42 = arith.constant 0 : index
    %82 = vector.load %arg4[%c0_41, %c0_42] : memref<16x256xbf16, #tpu.memory_space<vmem>>, vector<1x256xbf16>
    %83 = vector.broadcast %82 : vector<1x256xbf16> to vector<64x256xbf16>
    %84 = arith.mulf %81, %83 : vector<64x256xbf16>
    %c0_43 = arith.constant 0 : index
    %c0_44 = arith.constant 0 : index
    %85 = vector.load %arg7[%c0_43, %c0_44] : memref<576x256xbf16, #tpu.memory_space<vmem>>, vector<64x256xbf16>
    tpu.vector_store %arg7[%c0_43, %c0_44], %84 {strides = array<i32>} : memref<576x256xbf16, #tpu.memory_space<vmem>>, vector<64x256xbf16>,
    %86 = vector.extract_strided_slice %78 {offsets = [0, 240], sizes = [64, 16], strides = [1, 1]} : vector<64x256xbf16> to vector<64x16xbf16>
    %87 = vector.extract_strided_slice %78 {offsets = [0, 0], sizes = [64, 240], strides = [1, 1]} : vector<64x256xbf16> to vector<64x240xbf16>
    %88 = tpu.concatenate %86, %87 in 1 : vector<64x16xbf16>, vector<64x240xbf16> -> vector<64x256xbf16>
    %c1_45 = arith.constant 1 : index
    %c0_46 = arith.constant 0 : index
    %89 = vector.load %arg4[%c1_45, %c0_46] : memref<16x256xbf16, #tpu.memory_space<vmem>>, vector<1x256xbf16>
    %90 = vector.broadcast %89 : vector<1x256xbf16> to vector<64x256xbf16>
    %91 = arith.mulf %88, %90 : vector<64x256xbf16>
    %c64_47 = arith.constant 64 : index
    %c0_48 = arith.constant 0 : index
    %92 = vector.load %arg7[%c64_47, %c0_48] : memref<576x256xbf16, #tpu.memory_space<vmem>>, vector<64x256xbf16>
    tpu.vector_store %arg7[%c64_47, %c0_48], %91 {strides = array<i32>} : memref<576x256xbf16, #tpu.memory_space<vmem>>, vector<64x256xbf16>,
    %93 = vector.extract_strided_slice %78 {offsets = [0, 241], sizes = [64, 15], strides = [1, 1]} : vector<64x256xbf16> to vector<64x15xbf16>
    %94 = vector.extract_strided_slice %78 {offsets = [0, 0], sizes = [64, 241], strides = [1, 1]} : vector<64x256xbf16> to vector<64x241xbf16>
    %95 = tpu.concatenate %93, %94 in 1 : vector<64x15xbf16>, vector<64x241xbf16> -> vector<64x256xbf16>
    %c2_49 = arith.constant 2 : index
    %c0_50 = arith.constant 0 : index
    %96 = vector.load %arg4[%c2_49, %c0_50] : memref<16x256xbf16, #tpu.memory_space<vmem>>, vector<1x256xbf16>
    %97 = vector.broadcast %96 : vector<1x256xbf16> to vector<64x256xbf16>
    %98 = arith.mulf %95, %97 : vector<64x256xbf16>
    %c128_51 = arith.constant 128 : index
    %c0_52 = arith.constant 0 : index
    %99 = vector.load %arg7[%c128_51, %c0_52] : memref<576x256xbf16, #tpu.memory_space<vmem>>, vector<64x256xbf16>
    tpu.vector_store %arg7[%c128_51, %c0_52], %98 {strides = array<i32>} : memref<576x256xbf16, #tpu.memory_space<vmem>>, vector<64x256xbf16>,
    %100 = vector.extract_strided_slice %78 {offsets = [0, 255], sizes = [64, 1], strides = [1, 1]} : vector<64x256xbf16> to vector<64x1xbf16>
    %101 = vector.extract_strided_slice %78 {offsets = [0, 0], sizes = [64, 255], strides = [1, 1]} : vector<64x256xbf16> to vector<64x255xbf16>
    %102 = tpu.concatenate %100, %101 in 1 : vector<64x1xbf16>, vector<64x255xbf16> -> vector<64x256xbf16>
    %c3_53 = arith.constant 3 : index
    %c0_54 = arith.constant 0 : index
    %103 = vector.load %arg4[%c3_53, %c0_54] : memref<16x256xbf16, #tpu.memory_space<vmem>>, vector<1x256xbf16>
    %104 = vector.broadcast %103 : vector<1x256xbf16> to vector<64x256xbf16>
    %105 = arith.mulf %102, %104 : vector<64x256xbf16>
    %c192_55 = arith.constant 192 : index
    %c0_56 = arith.constant 0 : index
    %106 = vector.load %arg7[%c192_55, %c0_56] : memref<576x256xbf16, #tpu.memory_space<vmem>>, vector<64x256xbf16>
    tpu.vector_store %arg7[%c192_55, %c0_56], %105 {strides = array<i32>} : memref<576x256xbf16, #tpu.memory_space<vmem>>, vector<64x256xbf16>,
    %c256_57 = arith.constant 256 : index
    %c0_58 = arith.constant 0 : index
    %107 = vector.load %arg7[%c256_57, %c0_58] : memref<576x256xbf16, #tpu.memory_space<vmem>>, vector<64x256xbf16>
    tpu.vector_store %arg7[%c256_57, %c0_58], %78 {strides = array<i32>} : memref<576x256xbf16, #tpu.memory_space<vmem>>, vector<64x256xbf16>,
    %108 = vector.extract_strided_slice %78 {offsets = [0, 1], sizes = [64, 255], strides = [1, 1]} : vector<64x256xbf16> to vector<64x255xbf16>
    %109 = vector.extract_strided_slice %78 {offsets = [0, 0], sizes = [64, 1], strides = [1, 1]} : vector<64x256xbf16> to vector<64x1xbf16>
    %110 = tpu.concatenate %108, %109 in 1 : vector<64x255xbf16>, vector<64x1xbf16> -> vector<64x256xbf16>
    %c5_59 = arith.constant 5 : index
    %c0_60 = arith.constant 0 : index
    %111 = vector.load %arg4[%c5_59, %c0_60] : memref<16x256xbf16, #tpu.memory_space<vmem>>, vector<1x256xbf16>
    %112 = vector.broadcast %111 : vector<1x256xbf16> to vector<64x256xbf16>
    %113 = arith.mulf %110, %112 : vector<64x256xbf16>
    %c320_61 = arith.constant 320 : index
    %c0_62 = arith.constant 0 : index
    %114 = vector.load %arg7[%c320_61, %c0_62] : memref<576x256xbf16, #tpu.memory_space<vmem>>, vector<64x256xbf16>
    tpu.vector_store %arg7[%c320_61, %c0_62], %113 {strides = array<i32>} : memref<576x256xbf16, #tpu.memory_space<vmem>>, vector<64x256xbf16>,
    %115 = vector.extract_strided_slice %78 {offsets = [0, 15], sizes = [64, 241], strides = [1, 1]} : vector<64x256xbf16> to vector<64x241xbf16>
    %116 = vector.extract_strided_slice %78 {offsets = [0, 0], sizes = [64, 15], strides = [1, 1]} : vector<64x256xbf16> to vector<64x15xbf16>
    %117 = tpu.concatenate %115, %116 in 1 : vector<64x241xbf16>, vector<64x15xbf16> -> vector<64x256xbf16>
    %c6_63 = arith.constant 6 : index
    %c0_64 = arith.constant 0 : index
    %118 = vector.load %arg4[%c6_63, %c0_64] : memref<16x256xbf16, #tpu.memory_space<vmem>>, vector<1x256xbf16>
    %119 = vector.broadcast %118 : vector<1x256xbf16> to vector<64x256xbf16>
    %120 = arith.mulf %117, %119 : vector<64x256xbf16>
    %c384_65 = arith.constant 384 : index
    %c0_66 = arith.constant 0 : index
    %121 = vector.load %arg7[%c384_65, %c0_66] : memref<576x256xbf16, #tpu.memory_space<vmem>>, vector<64x256xbf16>
    tpu.vector_store %arg7[%c384_65, %c0_66], %120 {strides = array<i32>} : memref<576x256xbf16, #tpu.memory_space<vmem>>, vector<64x256xbf16>,
    %122 = vector.extract_strided_slice %78 {offsets = [0, 16], sizes = [64, 240], strides = [1, 1]} : vector<64x256xbf16> to vector<64x240xbf16>
    %123 = vector.extract_strided_slice %78 {offsets = [0, 0], sizes = [64, 16], strides = [1, 1]} : vector<64x256xbf16> to vector<64x16xbf16>
    %124 = tpu.concatenate %122, %123 in 1 : vector<64x240xbf16>, vector<64x16xbf16> -> vector<64x256xbf16>
    %c7_67 = arith.constant 7 : index
    %c0_68 = arith.constant 0 : index
    %125 = vector.load %arg4[%c7_67, %c0_68] : memref<16x256xbf16, #tpu.memory_space<vmem>>, vector<1x256xbf16>
    %126 = vector.broadcast %125 : vector<1x256xbf16> to vector<64x256xbf16>
    %127 = arith.mulf %124, %126 : vector<64x256xbf16>
    %c448_69 = arith.constant 448 : index
    %c0_70 = arith.constant 0 : index
    %128 = vector.load %arg7[%c448_69, %c0_70] : memref<576x256xbf16, #tpu.memory_space<vmem>>, vector<64x256xbf16>
    tpu.vector_store %arg7[%c448_69, %c0_70], %127 {strides = array<i32>} : memref<576x256xbf16, #tpu.memory_space<vmem>>, vector<64x256xbf16>,
    %129 = vector.extract_strided_slice %78 {offsets = [0, 17], sizes = [64, 239], strides = [1, 1]} : vector<64x256xbf16> to vector<64x239xbf16>
    %130 = vector.extract_strided_slice %78 {offsets = [0, 0], sizes = [64, 17], strides = [1, 1]} : vector<64x256xbf16> to vector<64x17xbf16>
    %131 = tpu.concatenate %129, %130 in 1 : vector<64x239xbf16>, vector<64x17xbf16> -> vector<64x256xbf16>
    %c8_71 = arith.constant 8 : index
    %c0_72 = arith.constant 0 : index
    %132 = vector.load %arg4[%c8_71, %c0_72] : memref<16x256xbf16, #tpu.memory_space<vmem>>, vector<1x256xbf16>
    %133 = vector.broadcast %132 : vector<1x256xbf16> to vector<64x256xbf16>
    %134 = arith.mulf %131, %133 : vector<64x256xbf16>
    %c512_73 = arith.constant 512 : index
    %c0_74 = arith.constant 0 : index
    %135 = vector.load %arg7[%c512_73, %c0_74] : memref<576x256xbf16, #tpu.memory_space<vmem>>, vector<64x256xbf16>
    tpu.vector_store %arg7[%c512_73, %c0_74], %134 {strides = array<i32>} : memref<576x256xbf16, #tpu.memory_space<vmem>>, vector<64x256xbf16>,
    %c16_75 = arith.constant 16 : index
    %c0_76 = arith.constant 0 : index
    %c0_77 = arith.constant 0 : index
    %136 = vector.load %arg2[%c16_75, %c0_76, %c0_77] : memref<17x64x576xbf16, #tpu.memory_space<vmem>>, vector<1x64x576xbf16>
    %137 = vector.shape_cast %136 : vector<1x64x576xbf16> to vector<64x576xbf16>
    %c0_78 = arith.constant 0 : index
    %c0_79 = arith.constant 0 : index
    %138 = vector.load %arg7[%c0_78, %c0_79] : memref<576x256xbf16, #tpu.memory_space<vmem>>, vector<576x256xbf16>
    %cst_80 = arith.constant dense<0.000000e+00> : vector<64x256xf32>
    %139 = tpu.matmul %137, %138, %cst_80 {dimension_numbers = #tpu.dot_dimension_numbers<[1], [0], [0], [1], [0, 0, 1, 1], [], []>} : vector<64x576xbf16>, vector<576x256xbf16>, vector<64x256xf32> -> vector<64x256xf32>
    %c16_81 = arith.constant 16 : index
    %c0_82 = arith.constant 0 : index
    %c0_83 = arith.constant 0 : index
    %140 = vector.load %arg3[%c16_81, %c0_82, %c0_83] : memref<17x64x1xf32, #tpu.memory_space<vmem>>, vector<1x64x1xf32>
    %141 = vector.shape_cast %140 : vector<1x64x1xf32> to vector<64x1xf32>
    %142 = vector.broadcast %141 : vector<64x1xf32> to vector<64x256xf32>
    %143 = arith.addf %139, %142 : vector<64x256xf32>
    %144 = vector.extract_strided_slice %143 {offsets = [0, 0], sizes = [8, 256], strides = [1, 1]} : vector<64x256xf32> to vector<8x256xf32>
    %c0_84 = arith.constant 0 : index
    %c0_85 = arith.constant 0 : index
    %c0_86 = arith.constant 0 : index
    %145 = vector.load %arg5[%c0_84, %c0_85, %c0_86] : memref<1x8x256xf32, #tpu.memory_space<vmem>>, vector<1x8x256xf32>
    %146 = vector.shape_cast %145 : vector<1x8x256xf32> to vector<8x256xf32>
    %147 = vector.shape_cast %144 : vector<8x256xf32> to vector<1x8x256xf32>
    tpu.vector_store %arg5[%c0_84, %c0_85, %c0_86], %147 {strides = array<i32>} : memref<1x8x256xf32, #tpu.memory_space<vmem>>, vector<1x8x256xf32>,
    return
  }
  func.func @transform_0(%arg0: i32) -> (i32, i32, i32) {
    %c0_i32 = arith.constant 0 : i32
    %c0_i32_0 = arith.constant 0 : i32
    %c0_i32_1 = arith.constant 0 : i32
    return %arg0, %c0_i32, %c0_i32_0 : i32, i32, i32
  }
  func.func @transform_1(%arg0: i32) -> (i32, i32, i32) {
    %c0_i32 = arith.constant 0 : i32
    %c0_i32_0 = arith.constant 0 : i32
    %c0_i32_1 = arith.constant 0 : i32
    %c0_i32_2 = arith.constant 0 : i32
    return %c0_i32, %c0_i32_0, %c0_i32_1 : i32, i32, i32
  }
  func.func @transform_2(%arg0: i32) -> (i32, i32, i32) {
    %c0_i32 = arith.constant 0 : i32
    %c0_i32_0 = arith.constant 0 : i32
    %c0_i32_1 = arith.constant 0 : i32
    %c0_i32_2 = arith.constant 0 : i32
    return %c0_i32, %c0_i32_0, %c0_i32_1 : i32, i32, i32
  }
  func.func @transform_3(%arg0: i32) -> (i32, i32) {
    %c0_i32 = arith.constant 0 : i32
    %c0_i32_0 = arith.constant 0 : i32
    %c0_i32_1 = arith.constant 0 : i32
    return %c0_i32, %c0_i32_0 : i32, i32
  }
  func.func @transform_4(%arg0: i32) -> (i32, i32, i32) {
    %c0_i32 = arith.constant 0 : i32
    %c0_i32_0 = arith.constant 0 : i32
    %c0_i32_1 = arith.constant 0 : i32
    return %arg0, %c0_i32, %c0_i32_0 : i32, i32, i32
  }
}

</mosaic_0001>

<bundles_post_ra>
// kernel: net_forward.1
= control target key start
LH: loop header
LB: loop body
LE: loop exit
PB: predicated region body
PF: predicated region fallthrough
CT: control target
= control target key end

     0   :  { %9 = vsyncpa [#allocation5], 0  ;;  %s7276_s15 = smov 0   ;;  %s9275_s0 = inlined_call_operand.vmem [shape: f32[2,16,256], index: 0, kind: input, shape index: {}]   ;;  %s9276_s1 = inlined_call_operand.hbm [shape: bf16[17,64,576], index: 1, kind: input, shape index: {}]   ;;  %s9277_s2 = inlined_call_operand.vmem [shape: f32[17,64,1], index: 2, kind: input, shape index: {}]   ;;  %s9278_s3 = inlined_call_operand.vmem [shape: bf16[16,256], index: 3, kind: input, shape index: {}]   ;;  %s9279_s4 = inlined_call_operand.vmem [shape: f32[2,8,256], index: 4, kind: output, shape index: {}]  }
   0x1 LB: > { %s7282_s16 = sadd.s32 4294967295, %s7160_s15   ;;  %p6106_p0 = scmp.ge.s32.totalorder %s7160_s15, 1  ;;  %s7160_s15 = sphi %s7276_s15, %s15_s15  }
   0x2   : > { %p135_p1 = scmp.lt.s32.totalorder %s7160_s15, 3  ;;  %s7230_s17 = smov [#allocation4]  }
   0x3   : > { %s147_s18 = sshll.u32 %s7230_s17, 4  ;;  %p9280_p3 = scmp.eq.s32.totalorder %s7282_s16, 0  ;;  %s148_s18 = int_to_ptr.vmem [resolvable:$true] %s147_s18 }
   0x4   : > { %p7286_p2 = pnand %p6106_p0, %p135_p1  ;;  %s7054_s23 = scalar_lea.hbm %s9276_s1, 43520 }
   0x5   : > { %p7055_p6 = scmp.ne.s32.totalorder %s9276_s1, %s7054_s23  ;;  %p7061_p10 = scmp.lt.u32.totalorder %s7054_s23, %s9276_s1 }
   0x6   : > { %s9282_s19 = scalar_select %p7286_p2, 1, 0 }
   0x7   : > { %p6657_p4 = pneg %p7286_p2 }
   0x9   : > { %p7295_p5 = pnand %p9280_p3, %p6657_p4 }
   0xb   : > { %p7056_p7 = pneg %p7295_p5 }
   0xd   : > { %p7057_p8 = pnand %p7056_p7, %p7055_p6 }
   0xf   : > { %p7058_p9 = pneg %p7057_p8 }
  0x11   : > { %p7063_p11 = pnand %p7061_p10, %p7058_p9 }
  0x13   : > { %7066 = shalt.err (!%p7063_p11)
}
  0x14   : > { %s7067_s28 = scalar_lea.vmem %s148_s18, 43520  ;;  %p7075_p1 = scmp.lt.s32.totalorder %s148_s18, %s148_s18 }
  0x15   : > { %p7068_p12 = scmp.ne.s32.totalorder %s148_s18, %s7067_s28  ;;  %p7076_p4 = scmp.lt.s32.totalorder %s7067_s28, %s7067_s28 }
  0x17   : > { %p7070_p13 = pnand %p7068_p12, %p7056_p7  ;;  %p7077_p3 = por %p7076_p4, %p7075_p1 }
  0x19   : > { %p7071_p0 = pneg %p7070_p13 }
  0x1b   : > { %p7078_p2 = pnand %p7077_p3, %p7071_p0 }
  0x1d   : > { %7081 = shalt.err (!%p7078_p2)
}
  0x1e   : > { %s7231_s29 = smov 320   ;;  %s7232_s30 = smov 20  }
  0x1f   : > { %6660 = dma.hbm_to_vmem [thread:$0]  (!%p7295_p5), %s9276_s1, 43520, %s148_s18, [#allocation5], %s7231_s29, %s7231_s29, %s7232_s30  }
  0x20   : > { %p9284_p6 = scmp.ne.s32.totalorder %s9282_s19, 0 }
  0x21   : > { %p9285_p8 = scmp.eq.s32.totalorder (!%p9284_p6), %s7282_s16, 0 }
  0x22   : > { %177 = sbr.rel (%p9284_p6) target bundleno = 2533 (0x9e5), region = 36 }
  0x29   : > { %7155 = dma.done.wait (%p9285_p8), [#allocation5], 43520   ;;  %p9286_p7 = pmov %p9285_p8 }
  0x2a   : > { %p203_p2 = scmp.lt.s32.totalorder %s7282_s16, 1  ;;  %v7233_v0 = vmov 0   ;;  %s7234_s7 = smov 17   ;;  %v6848_v7 = vld [vmem:[#allocation4 + $0x4] ss:$20 sps:$4 sm:$0xff]   ;;  %v295_v9 = vlaneseq  ;;  %vm260_vm0 = vcmask 138240  }
  0x2b   : > { %7157 = vsyncadd (%p9286_p7), [#allocation5], 4294923776  ;;  %242 = vrot.lane.b32.xlu1 %v7233_v0, %s7234_s7  ;;  %563 = vst [vmem:[#allocation3 + $0x118] sm:$0xff] %v7233_v0  ;;  %244 = vrot.lane.b32.xlu0 %v7233_v0, %s7234_s7  ;;  %s7236_s18 = smov 127   ;;  %s7237_s19 = smov 15   ;;  %vm338_vm1 = vcmask 130048  }
  0x2c   : > { %s9289_s16 = smov (!%p203_p2, %s7282_s16), 1  ;;  %6829 = vset.pattern.permute.xlu1 %v7233_v0  ;;  %6828 = vset.pattern.permute.xlu0 %v7233_v0  ;;  %s7238_s20 = smov 113   ;;  %v6851_v8 = vld [vmem:[#allocation4 + $0xc] ss:$20 sps:$4 sm:$0xff]   ;;  %v7459_v13 = vshrl.u32 %v295_v9, 7  ;;  %vm584_vm2 = vcmask 1039360  }
  0x2d   : > { %s6427_s8 = sshll.u32 %s9289_s16, 5  ;;  %s6428_s9 = sshll.u32 %s9289_s16, 4  ;;  %1173 = vmatprep.mubr.bf16.mxu1 %v6848_v7  ;;  %1246 = vmatprep.mubr.bf16.mxu0 %v6851_v8  ;;  %v286_v10 = vld [vmem:[%s9278_s3] sm:$0x11]  ;;  %v610_v22 = vld [vmem:[%s9278_s3] sm:$0x44] }
  0x2e   : > { %s207_s12 = scalar_lea.vmem %s9275_s0, %s6427_s8  ;;  %s7340_s17 = scalar_lea.vmem %s9279_s4, %s6428_s9  ;;  %v6115_v11 = vcombine.low %v286_v10, %v286_v10  ;;  %v6116_v12 = vcombine.high %v286_v10, %v286_v10  ;;  %v7466_v15 = vsub.s32 0, %v7459_v13  ;;  %v364_v19 = vld [vmem:[%s9278_s3] sm:$0x11]  ;;  %v6123_v29 = vcombine.low %v610_v22, %v610_v22 }
  0x2f   : > { %254 = vrot.lane.b32.xlu1 %v7233_v0, %s7234_s7  ;;  %246 = vrot.lane.b32.xlu0 %v7233_v0, %s7234_s7  ;;  %v221_v1 = vld [vmem:[%s207_s12 + $0x8] sm:$0xff]  ;;  %v223_v2 = vld [vmem:[%s207_s12 + $0x18] sm:$0xff]  ;;  %s7235_s16 = smov 16   ;;  %s7239_s21 = smov 1   ;;  %v6117_v23 = vcombine.low %v364_v19, %v364_v19  ;;  %v6118_v24 = vcombine.high %v364_v19, %v364_v19  ;;  %v6124_v30 = vcombine.high %v610_v22, %v610_v22  ;;  %v7503_v46 = vsub.s32 2, %v7459_v13 }
  0x30   : > { %v220_v3 = vld [vmem:[%s207_s12] sm:$0xff]  ;;  %v7342_v4 = vpack.c.bf16 %v223_v2, %v221_v1  ;;  %v222_v5 = vld [vmem:[%s207_s12 + $0x10] sm:$0xff]  ;;  %s7240_s22 = smov 112   ;;  %s7241_s25 = smov 111   ;;  %v293_v14 = vpack.i.b16 %v6115_v11, %v6115_v11  ;;  %v300_v16 = vpack.i.b16 %v6116_v12, %v6116_v12  ;;  %v617_v39 = vshrl.u32 %v6123_v29, 16  ;;  %v985_v22 = vld [vmem:[%s9277_s2 + $0x28] sm:$0xff] }
  0x31   : > { %v7346_v6 = vpack.c.bf16 %v222_v5, %v220_v3  ;;  %v371_v33 = vshrl.u32 %v6117_v23, 16  ;;  %v379_v34 = vshrl.u32 %v6118_v24, 16  ;;  %v625_v40 = vshrl.u32 %v6124_v30, 16  ;;  %v986_v30 = vld [vmem:[%s9277_s2 + $0x30] sm:$0xff]  ;;  %s7777_s23 = smov 0  }
  0x32   : > { %1214 = vmatprep.subr.bf16.mxu0 %v7342_v4  ;;  %v7474_v20 = vrot.slane %v293_v14, %v7466_v15  ;;  %v7477_v21 = vrot.slane %v300_v16, %v7466_v15  ;;  %v618_v50 = vpack.i.b16 %v617_v39, %v617_v39  ;;  %vm418_vm3 = vcmask 121856  }
  0x33   : > { %256 = vrot.lane.b32.xlu1 %v7233_v0, %s7234_s7  ;;  %240 = vrot.lane.b32.xlu0 %v7342_v4, %s7234_s7  ;;  %v372_v43 = vpack.i.b16 %v371_v33, %v371_v33  ;;  %v380_v44 = vpack.i.b16 %v379_v34, %v379_v34  ;;  %v626_v51 = vpack.i.b16 %v625_v40, %v625_v40  ;;  %v444_v33 = vld [vmem:[%s9278_s3] sm:$0x22]  ;;  %vm664_vm4 = vcmask 924672  }
  0x34   : > { %1215 = vmatpush1.bf16.msra.mxu0 %v7346_v6  ;;  %v7524_v3 = vrot.slane %v618_v50, %v7503_v46  ;;  %v6119_v39 = vcombine.low %v444_v33, %v444_v33  ;;  %v6120_v40 = vcombine.high %v444_v33, %v444_v33  ;;  %vm496_vm5 = vcmask 7168  }
  0x35   : > { %1216 = vmatprep.subr.bf16.mxu0 %v7233_v0  ;;  %v7514_v58 = vrot.slane %v372_v43, %v7466_v15  ;;  %v7517_v59 = vrot.slane %v380_v44, %v7466_v15  ;;  %vm742_vm6 = vcmask 916480   ;;  %vm822_vm7 = vcmask 908288  }
  0x36   : > { %vm1128_vm8 = vcmask 523264  }
  0x37   : > { %258 = vrot.lane.b32.xlu1 %v7233_v0, %s7234_s7  ;;  %252 = vrot.lane.b32.xlu0 %v7346_v6, %s7234_s7 }
  0x38   : > { %1217 = vmatpush1.bf16.msra.mxu0 %v7233_v0 }
  0x39   : > { %1218 = vmatprep.subr.bf16.mxu0 %v7233_v0 }
  0x3b   : > { %330 = vrot.lane.b32.xlu1 %v7346_v6, %s7235_s16  ;;  %322 = vrot.lane.b32.xlu0 %v7342_v4, %s7235_s16 }
  0x3c   : > { %1219 = vmatpush1.bf16.msra.mxu0 %v7233_v0 }
  0x3d   : > { %1220 = vmatprep.subr.bf16.mxu0 %v7233_v0 }
  0x3f   : > { %570 = vrot.lane.b32.xlu1 %v7342_v4, %s7236_s18  ;;  %568 = vrot.lane.b32.xlu0 %v7346_v6, %s7236_s18 }
  0x40   : > { %1221 = vmatpush1.bf16.msra.mxu0 %v7233_v0 }
  0x43   : > { %332 = vrot.lane.b32.xlu1 %v7233_v0, %s7235_s16  ;;  %324 = vrot.lane.b32.xlu0 %v7233_v0, %s7235_s16 }
  0x47   : > { %574 = vrot.lane.b32.xlu1 %v7233_v0, %s7236_s18  ;;  %572 = vrot.lane.b32.xlu0 %v7233_v0, %s7236_s18 }
  0x4b   : > { %334 = vrot.lane.b32.xlu1 %v7233_v0, %s7235_s16  ;;  %326 = vrot.lane.b32.xlu0 %v7233_v0, %s7235_s16 }
  0x4f   : > { %578 = vrot.lane.b32.xlu1 %v7233_v0, %s7236_s18  ;;  %576 = vrot.lane.b32.xlu0 %v7233_v0, %s7236_s18 }
  0x53   : > { %336 = vrot.lane.b32.xlu1 %v7233_v0, %s7235_s16  ;;  %328 = vrot.lane.b32.xlu0 %v7233_v0, %s7235_s16 }
  0x57   : > { %582 = vrot.lane.b32.xlu1 %v7233_v0, %s7236_s18  ;;  %580 = vrot.lane.b32.xlu0 %v7233_v0, %s7236_s18 }
  0x5b   : > { %410 = vrot.lane.b32.xlu1 %v7346_v6, %s7237_s19  ;;  %402 = vrot.lane.b32.xlu0 %v7342_v4, %s7237_s19 }
  0x5f   : > { %650 = vrot.lane.b32.xlu1 %v7342_v4, %s7238_s20  ;;  %648 = vrot.lane.b32.xlu0 %v7346_v6, %s7238_s20 }
  0x63   : > { %412 = vrot.lane.b32.xlu1 %v7233_v0, %s7237_s19  ;;  %404 = vrot.lane.b32.xlu0 %v7233_v0, %s7237_s19 }
  0x67   : > { %654 = vrot.lane.b32.xlu1 %v7233_v0, %s7238_s20  ;;  %652 = vrot.lane.b32.xlu0 %v7233_v0, %s7238_s20 }
  0x6b   : > { %414 = vrot.lane.b32.xlu1 %v7233_v0, %s7237_s19  ;;  %406 = vrot.lane.b32.xlu0 %v7233_v0, %s7237_s19 }
  0x6f   : > { %658 = vrot.lane.b32.xlu1 %v7233_v0, %s7238_s20  ;;  %656 = vrot.lane.b32.xlu0 %v7233_v0, %s7238_s20 }
  0x73   : > { %416 = vrot.lane.b32.xlu1 %v7233_v0, %s7237_s19  ;;  %408 = vrot.lane.b32.xlu0 %v7233_v0, %s7237_s19 }
  0x77   : > { %662 = vrot.lane.b32.xlu1 %v7233_v0, %s7238_s20  ;;  %660 = vrot.lane.b32.xlu0 %v7233_v0, %s7238_s20 }
  0x7b   : > { %488 = vrot.lane.b32.xlu1 %v7346_v6, %s7239_s21  ;;  %480 = vrot.lane.b32.xlu0 %v7342_v4, %s7239_s21 }
  0x7f   : > { %728 = vrot.lane.b32.xlu1 %v7342_v4, %s7240_s22  ;;  %726 = vrot.lane.b32.xlu0 %v7346_v6, %s7240_s22 }
  0x83   : > { %490 = vrot.lane.b32.xlu1 %v7233_v0, %s7239_s21  ;;  %482 = vrot.lane.b32.xlu0 %v7233_v0, %s7239_s21 }
  0x87   : > { %732 = vrot.lane.b32.xlu1 %v7233_v0, %s7240_s22  ;;  %730 = vrot.lane.b32.xlu0 %v7233_v0, %s7240_s22 }
  0x8b   : > { %492 = vrot.lane.b32.xlu1 %v7233_v0, %s7239_s21  ;;  %484 = vrot.lane.b32.xlu0 %v7233_v0, %s7239_s21 }
  0x8f   : > { %736 = vrot.lane.b32.xlu1 %v7233_v0, %s7240_s22  ;;  %734 = vrot.lane.b32.xlu0 %v7233_v0, %s7240_s22 }
  0x93   : > { %494 = vrot.lane.b32.xlu1 %v7233_v0, %s7239_s21  ;;  %486 = vrot.lane.b32.xlu0 %v7233_v0, %s7239_s21 }
  0x97   : > { %740 = vrot.lane.b32.xlu1 %v7233_v0, %s7240_s22  ;;  %738 = vrot.lane.b32.xlu0 %v7233_v0, %s7240_s22 }
  0x9b   : > { %808 = vrot.lane.b32.xlu1 %v7342_v4, %s7241_s25  ;;  %806 = vrot.lane.b32.xlu0 %v7346_v6, %s7241_s25  ;;  %v7527_v4 = vrot.slane %v626_v51, %v7503_v46  ;;  %v451_v51 = vpack.i.b16 %v6119_v39, %v6119_v39 }
  0x9d   : > { %v243_v17 = vpop.permute.xlu1 %242  ;;  %v245_v18 = vpop.permute.xlu0 %244 }
  0x9f   : > { %812 = vrot.lane.b32.xlu1 %v7233_v0, %s7241_s25  ;;  %810 = vrot.lane.b32.xlu0 %v7233_v0, %s7241_s25 }
  0xa1   : > { %v255_v25 = vpop.permute.xlu1 %254  ;;  %v247_v26 = vpop.permute.xlu0 %246 }
  0xa2   : > { %v262_v27 = vsel %vm260_vm0, %v255_v25, %v243_v17  ;;  %v276_v28 = vsel %vm260_vm0, %v243_v17, %v255_v25 }
  0xa3   : > { %v308_v31 = vmul.bf16 %v7474_v20, %v276_v28  ;;  %v309_v32 = vmul.bf16 %v7477_v21, %v262_v27  ;;  %816 = vrot.lane.b32.xlu1 %v7233_v0, %s7241_s25  ;;  %814 = vrot.lane.b32.xlu0 %v7233_v0, %s7241_s25  ;;  %v987_v28 = vld [vmem:[%s9277_s2 + $0x38] sm:$0xff] }
  0xa5   : > { %v257_v35 = vpop.permute.xlu1 %256  ;;  %v241_v38 = vpop.permute.xlu0 %240 }
  0xa6   : > { %v263_v36 = vsel %vm260_vm0, %v257_v35, %v245_v18  ;;  %v280_v37 = vsel %vm260_vm0, %v245_v18, %v257_v35 }
  0xa7   : > { %v310_v41 = vmul.bf16 %v7474_v20, %v280_v37  ;;  %v311_v42 = vmul.bf16 %v7477_v21, %v263_v36  ;;  %820 = vrot.lane.b32.xlu1 %v7233_v0, %s7241_s25  ;;  %818 = vrot.lane.b32.xlu0 %v7233_v0, %s7241_s25  ;;  %v981_v37 = vld [vmem:[%s9277_s2 + $0x8] sm:$0xff] }
  0xa9   : > { %v259_v45 = vpop.permute.xlu1 %258  ;;  %v253_v49 = vpop.permute.xlu0 %252 }
  0xaa   : > { %v264_v47 = vsel %vm260_vm0, %v259_v45, %v247_v26  ;;  %v284_v48 = vsel %vm260_vm0, %v247_v26, %v259_v45  ;;  %v261_v54 = vsel %vm260_vm0, %v253_v49, %v241_v38  ;;  %v272_v55 = vsel %vm260_vm0, %v241_v38, %v253_v49  ;;  %v983_v49 = vld [vmem:[%s9277_s2 + $0x18] sm:$0xff] }
  0xab   : > { %v312_v52 = vmul.bf16 %v7474_v20, %v284_v48  ;;  %v313_v53 = vmul.bf16 %v7477_v21, %v264_v47  ;;  %v306_v56 = vmul.bf16 %v7474_v20, %v272_v55  ;;  %v307_v57 = vmul.bf16 %v7477_v21, %v261_v54  ;;  %v984_v21 = vld [vmem:[%s9277_s2 + $0x20] sm:$0xff]  ;;  %1015 = vperm.xlu1 %6829, %v985_v22   ;;  %v982_v54 = vld [vmem:[%s9277_s2 + $0x10] sm:$0xff] }
  0xac   : > { %1010 = vperm.xlu0 %6828, %v984_v21   ;;  %v690_v47 = vld [vmem:[%s9278_s3] sm:$0x88] }
  0xad   : > { %v331_v60 = vpop.permute.xlu1 %330  ;;  %v323_v61 = vpop.permute.xlu0 %322  ;;  %1141 = vmatprep.subr.bf16.mxu1 %v307_v57  ;;  %v6125_v57 = vcombine.low %v690_v47, %v690_v47 }
  0xae   : > { %v339_v62 = vsel %vm338_vm1, %v331_v60, %v323_v61  ;;  %v350_v63 = vsel %vm338_vm1, %v323_v61, %v331_v60  ;;  %1142 = vmatpush1.bf16.msra.mxu1 %v306_v56 }
  0xaf   : > { %v386_v1 = vmul.bf16 %v7514_v58, %v350_v63  ;;  %v387_v2 = vmul.bf16 %v7517_v59, %v339_v62  ;;  %1143 = vmatprep.subr.bf16.mxu1 %v309_v32  ;;  %1020 = vperm.xlu1 %6829, %v986_v30   ;;  %v6126_v62 = vcombine.high %v690_v47, %v690_v47  ;;  %v768_v47 = vld [vmem:[%s9278_s3] sm:$0x88] }
  0xb0   : > { %1025 = vperm.xlu0 %6828, %v987_v28  }
  0xb1   : > { %v571_v5 = vpop.permute.xlu1 %570  ;;  %v569_v6 = vpop.permute.xlu0 %568 }
  0xb2   : > { %v585_v7 = vsel %vm584_vm2, %v569_v6, %v571_v5  ;;  %v596_v8 = vsel %vm584_vm2, %v571_v5, %v569_v6  ;;  %1144 = vmatpush1.bf16.msra.mxu1 %v308_v31 }
  0xb3   : > { %v632_v9 = vmul.bf16 %v7524_v3, %v585_v7  ;;  %v633_v10 = vmul.bf16 %v7527_v4, %v596_v8  ;;  %1145 = vmatprep.subr.bf16.mxu1 %v311_v42 }
  0xb4   : > { %995 = vperm.xlu0 %6828, %v981_v37  }
  0xb5   : > { %v333_v11 = vpop.permute.xlu1 %332  ;;  %v325_v12 = vpop.permute.xlu0 %324  ;;  %1222 = vmatprep.subr.bf16.mxu0 %v633_v10  ;;  %v704_v10 = vpack.i.b16 %v6126_v62, %v6126_v62 }
  0xb6   : > { %v340_v14 = vsel %vm338_vm1, %v333_v11, %v325_v12  ;;  %v354_v16 = vsel %vm338_vm1, %v325_v12, %v333_v11  ;;  %1146 = vmatpush1.bf16.msra.mxu1 %v310_v41  ;;  %1223 = vmatpush1.bf16.msra.mxu0 %v632_v9  ;;  %v980_v41 = vld [vmem:[%s9277_s2] sm:$0xff]  ;;  %v7597_v9 = vsub.s32 3, %v7459_v13 }
  0xb7   : > { %v388_v17 = vmul.bf16 %v7514_v58, %v354_v16  ;;  %v389_v18 = vmul.bf16 %v7517_v59, %v340_v14  ;;  %1147 = vmatprep.subr.bf16.mxu1 %v313_v53  ;;  %990 = vperm.xlu1 %6829, %v980_v41   ;;  %v458_v53 = vpack.i.b16 %v6120_v40, %v6120_v40 }
  0xb8   : > { %1005 = vperm.xlu0 %6828, %v983_v49  }
  0xb9   : > { %v575_v19 = vpop.permute.xlu1 %574  ;;  %v573_v20 = vpop.permute.xlu0 %572 }
  0xba   : > { %v586_v23 = vsel %vm584_vm2, %v573_v20, %v575_v19  ;;  %v600_v24 = vsel %vm584_vm2, %v575_v19, %v573_v20  ;;  %1148 = vmatpush1.bf16.msra.mxu1 %v312_v52  ;;  %v7577_v52 = vsub.s32 1, %v7459_v13  ;;  %v7607_v13 = vrot.slane %v704_v10, %v7597_v9 }
  0xbb   : > { %v634_v25 = vmul.bf16 %v7524_v3, %v586_v23  ;;  %v635_v26 = vmul.bf16 %v7527_v4, %v600_v24  ;;  %1149 = vmatprep.subr.bf16.mxu1 %v387_v2  ;;  %1000 = vperm.xlu1 %6829, %v982_v54  }
  0xbc   : > { %v7587_v2 = vrot.slane %v451_v51, %v7577_v52  ;;  %v7592_v7 = vrot.slane %v458_v53, %v7577_v52 }
  0xbd   : > { %v335_v27 = vpop.permute.xlu1 %334  ;;  %v327_v29 = vpop.permute.xlu0 %326  ;;  %1224 = vmatprep.subr.bf16.mxu0 %v635_v26 }
  0xbe   : > { %v341_v31 = vsel %vm338_vm1, %v335_v27, %v327_v29  ;;  %v358_v32 = vsel %vm338_vm1, %v327_v29, %v335_v27  ;;  %1150 = vmatpush1.bf16.msra.mxu1 %v386_v1  ;;  %1225 = vmatpush1.bf16.msra.mxu0 %v634_v25 }
  0xbf   : > { %v390_v34 = vmul.bf16 %v7514_v58, %v358_v32  ;;  %v391_v35 = vmul.bf16 %v7517_v59, %v341_v31  ;;  %1151 = vmatprep.subr.bf16.mxu1 %v389_v18 }
  0xc1   : > { %v579_v36 = vpop.permute.xlu1 %578  ;;  %v577_v38 = vpop.permute.xlu0 %576 }
  0xc2   : > { %v587_v42 = vsel %vm584_vm2, %v577_v38, %v579_v36  ;;  %v604_v43 = vsel %vm584_vm2, %v579_v36, %v577_v38  ;;  %1152 = vmatpush1.bf16.msra.mxu1 %v388_v17  ;;  %v522_v36 = vld [vmem:[%s9278_s3] sm:$0x22] }
  0xc3   : > { %v636_v44 = vmul.bf16 %v7524_v3, %v587_v42  ;;  %v637_v45 = vmul.bf16 %v7527_v4, %v604_v43  ;;  %1153 = vmatprep.subr.bf16.mxu1 %v391_v35  ;;  %v6121_v41 = vcombine.low %v522_v36, %v522_v36  ;;  %v6122_v42 = vcombine.high %v522_v36, %v522_v36 }
  0xc5   : > { %v337_v48 = vpop.permute.xlu1 %336  ;;  %v329_v50 = vpop.permute.xlu0 %328  ;;  %1226 = vmatprep.subr.bf16.mxu0 %v637_v45  ;;  %v529_v51 = vshrl.u32 %v6121_v41, 16  ;;  %v537_v53 = vshrl.u32 %v6122_v42, 16 }
  0xc6   : > { %v342_v55 = vsel %vm338_vm1, %v337_v48, %v329_v50  ;;  %v362_v56 = vsel %vm338_vm1, %v329_v50, %v337_v48  ;;  %1154 = vmatpush1.bf16.msra.mxu1 %v390_v34  ;;  %1227 = vmatpush1.bf16.msra.mxu0 %v636_v44 }
  0xc7   : > { %v392_v60 = vmul.bf16 %v7514_v58, %v362_v56  ;;  %v393_v61 = vmul.bf16 %v7517_v59, %v342_v55  ;;  %v697_v58 = vpack.i.b16 %v6125_v57, %v6125_v57  ;;  %v6127_v56 = vcombine.low %v768_v47, %v768_v47 }
  0xc8   : > { %v6128_v57 = vcombine.high %v768_v47, %v768_v47 }
  0xc9   : > { %v583_v63 = vpop.permute.xlu1 %582  ;;  %v581_v1 = vpop.permute.xlu0 %580  ;;  %1155 = vmatprep.subr.bf16.mxu1 %v393_v61 }
  0xca   : > { %v588_v5 = vsel %vm584_vm2, %v581_v1, %v583_v63  ;;  %v608_v6 = vsel %vm584_vm2, %v583_v63, %v581_v1  ;;  %1156 = vmatpush1.bf16.msra.mxu1 %v392_v60  ;;  %v530_v1 = vpack.i.b16 %v529_v51, %v529_v51  ;;  %v848_v51 = vld [vmem:[%s9278_s3 + $0x8] sm:$0x11] }
  0xcb   : > { %v638_v59 = vmul.bf16 %v7524_v3, %v588_v5  ;;  %v639_v8 = vmul.bf16 %v7527_v4, %v608_v6  ;;  %v7604_v3 = vrot.slane %v697_v58, %v7597_v9  ;;  %v538_v5 = vpack.i.b16 %v537_v53, %v537_v53 }
  0xcd   : > { %v411_v11 = vpop.permute.xlu1 %410  ;;  %v403_v12 = vpop.permute.xlu0 %402  ;;  %1228 = vmatprep.subr.bf16.mxu0 %v639_v8  ;;  %v783_v8 = vshrl.u32 %v6128_v57, 16 }
  0xce   : > { %v419_v14 = vsel %vm418_vm3, %v411_v11, %v403_v12  ;;  %v430_v16 = vsel %vm418_vm3, %v403_v12, %v411_v11  ;;  %1229 = vmatpush1.bf16.msra.mxu0 %v638_v59  ;;  %v775_v59 = vshrl.u32 %v6127_v56, 16 }
  0xcf   : > { %v464_v17 = vmul.bf16 %v7587_v2, %v430_v16  ;;  %v465_v18 = vmul.bf16 %v7592_v7, %v419_v14  ;;  %v7642_v16 = vrot.slane %v530_v1, %v7577_v52 }
  0xd1   : > { %v651_v4 = vpop.permute.xlu1 %650  ;;  %v649_v19 = vpop.permute.xlu0 %648  ;;  %1157 = vmatprep.subr.bf16.mxu1 %v465_v18  ;;  %v776_v18 = vpack.i.b16 %v775_v59, %v775_v59 }
  0xd2   : > { %v665_v20 = vsel %vm664_vm4, %v649_v19, %v651_v4  ;;  %v676_v21 = vsel %vm664_vm4, %v651_v4, %v649_v19  ;;  %1158 = vmatpush1.bf16.msra.mxu1 %v464_v17  ;;  %v7645_v17 = vrot.slane %v538_v5, %v7577_v52  ;;  %v784_v4 = vpack.i.b16 %v783_v8, %v783_v8 }
  0xd3   : > { %v710_v22 = vmul.bf16 %v7604_v3, %v665_v20  ;;  %v711_v23 = vmul.bf16 %v7607_v13, %v676_v21 }
  0xd5   : > { %v413_v24 = vpop.permute.xlu1 %412  ;;  %v405_v25 = vpop.permute.xlu0 %404  ;;  %1230 = vmatprep.subr.bf16.mxu0 %v711_v23 }
  0xd6   : > { %v420_v26 = vsel %vm418_vm3, %v413_v24, %v405_v25  ;;  %v434_v27 = vsel %vm418_vm3, %v405_v25, %v413_v24  ;;  %1231 = vmatpush1.bf16.msra.mxu0 %v710_v22  ;;  %v7654_v25 = vrot.slane %v776_v18, %v7597_v9 }
  0xd7   : > { %v466_v28 = vmul.bf16 %v7587_v2, %v434_v27  ;;  %v467_v29 = vmul.bf16 %v7592_v7, %v420_v26 }
  0xd9   : > { %v655_v30 = vpop.permute.xlu1 %654  ;;  %v653_v31 = vpop.permute.xlu0 %652  ;;  %1159 = vmatprep.subr.bf16.mxu1 %v467_v29 }
  0xda   : > { %v666_v32 = vsel %vm664_vm4, %v653_v31, %v655_v30  ;;  %v680_v33 = vsel %vm664_vm4, %v655_v30, %v653_v31  ;;  %1160 = vmatpush1.bf16.msra.mxu1 %v466_v28 }
  0xdb   : > { %v712_v34 = vmul.bf16 %v7604_v3, %v666_v32  ;;  %v713_v35 = vmul.bf16 %v7607_v13, %v680_v33 }
  0xdd   : > { %v415_v37 = vpop.permute.xlu1 %414  ;;  %v407_v38 = vpop.permute.xlu0 %406  ;;  %1232 = vmatprep.subr.bf16.mxu0 %v713_v35 }
  0xde   : > { %v421_v39 = vsel %vm418_vm3, %v415_v37, %v407_v38  ;;  %v438_v40 = vsel %vm418_vm3, %v407_v38, %v415_v37  ;;  %1233 = vmatpush1.bf16.msra.mxu0 %v712_v34 }
  0xdf   : > { %v468_v43 = vmul.bf16 %v7587_v2, %v438_v40  ;;  %v469_v44 = vmul.bf16 %v7592_v7, %v421_v39 }
  0xe1   : > { %v659_v45 = vpop.permute.xlu1 %658  ;;  %v657_v48 = vpop.permute.xlu0 %656  ;;  %1161 = vmatprep.subr.bf16.mxu1 %v469_v44 }
  0xe2   : > { %v667_v49 = vsel %vm664_vm4, %v657_v48, %v659_v45  ;;  %v684_v50 = vsel %vm664_vm4, %v659_v45, %v657_v48  ;;  %1162 = vmatpush1.bf16.msra.mxu1 %v468_v43 }
  0xe3   : > { %v714_v54 = vmul.bf16 %v7604_v3, %v667_v49  ;;  %v715_v55 = vmul.bf16 %v7607_v13, %v684_v50 }
  0xe5   : > { %v417_v60 = vpop.permute.xlu1 %416  ;;  %v409_v61 = vpop.permute.xlu0 %408  ;;  %1234 = vmatprep.subr.bf16.mxu0 %v715_v55 }
  0xe6   : > { %v422_v62 = vsel %vm418_vm3, %v417_v60, %v409_v61  ;;  %v442_v63 = vsel %vm418_vm3, %v409_v61, %v417_v60  ;;  %1235 = vmatpush1.bf16.msra.mxu0 %v714_v54  ;;  %v6129_v60 = vcombine.low %v848_v51, %v848_v51  ;;  %v6130_v61 = vcombine.high %v848_v51, %v848_v51  ;;  %v6867_v51 = vld [vmem:[#allocation4 + $0x84] ss:$20 sps:$4 sm:$0xff]  }
  0xe7   : > { %v470_v6 = vmul.bf16 %v7587_v2, %v442_v63  ;;  %v471_v58 = vmul.bf16 %v7592_v7, %v422_v62 }
  0xe8   : > { %v855_v59 = vpack.i.b16 %v6129_v60, %v6129_v60  ;;  %v862_v8 = vpack.i.b16 %v6130_v61, %v6130_v61  ;;  %v6872_v60 = vld [vmem:[#allocation4 + $0x88] ss:$20 sps:$4 sm:$0xff]   ;;  %v6873_v61 = vld [vmem:[#allocation4 + $0x38] ss:$20 sps:$4 sm:$0xff]  }
  0xe9   : > { %v663_v10 = vpop.permute.xlu1 %662  ;;  %v661_v11 = vpop.permute.xlu0 %660  ;;  %1163 = vmatprep.subr.bf16.mxu1 %v471_v58 }
  0xea   : > { %v668_v12 = vsel %vm664_vm4, %v661_v11, %v663_v10  ;;  %v688_v14 = vsel %vm664_vm4, %v663_v10, %v661_v11  ;;  %1164 = vmatpush1.bf16.msra.mxu1 %v470_v6 }
  0xeb   : > { %v716_v2 = vmul.bf16 %v7604_v3, %v668_v12  ;;  %v717_v7 = vmul.bf16 %v7607_v13, %v688_v14  ;;  %v7657_v3 = vrot.slane %v784_v4, %v7597_v9  ;;  %v6846_v12 = vld [vmem:[#allocation4] ss:$20 sps:$4 sm:$0xff]  }
  0xed   : > { %v489_v19 = vpop.permute.xlu1 %488  ;;  %v481_v20 = vpop.permute.xlu0 %480  ;;  %1236 = vmatprep.subr.bf16.mxu0 %v717_v7  ;;  %v6852_v7 = vld [vmem:[#allocation4 + $0x2c] ss:$20 sps:$4 sm:$0xff]  }
  0xee   : > { %v497_v21 = vsel %vm496_vm5, %v489_v19, %v481_v20  ;;  %v508_v22 = vsel %vm496_vm5, %v481_v20, %v489_v19  ;;  %1237 = vmatpush1.bf16.msra.mxu0 %v716_v2 }
  0xef   : > { %v544_v23 = vmul.bf16 %v7642_v16, %v508_v22  ;;  %v545_v24 = vmul.bf16 %v7645_v17, %v497_v21  ;;  %v6849_v21 = vld [vmem:[#allocation4 + $0x8] ss:$20 sps:$4 sm:$0xff]  }
  0xf1   : > { %v729_v13 = vpop.permute.xlu1 %728  ;;  %v727_v26 = vpop.permute.xlu0 %726  ;;  %1165 = vmatprep.subr.bf16.mxu1 %v545_v24 }
  0xf2   : > { %v743_v27 = vsel %vm742_vm6, %v727_v26, %v729_v13  ;;  %v754_v28 = vsel %vm742_vm6, %v729_v13, %v727_v26  ;;  %1166 = vmatpush1.bf16.msra.mxu1 %v544_v23 }
  0xf3   : > { %v790_v29 = vmul.bf16 %v7654_v25, %v743_v27  ;;  %v791_v30 = vmul.bf16 %v7657_v3, %v754_v28  ;;  %v6854_v27 = vld [vmem:[#allocation4 + $0x28] ss:$20 sps:$4 sm:$0xff]  }
  0xf5   : > { %v491_v31 = vpop.permute.xlu1 %490  ;;  %v483_v32 = vpop.permute.xlu0 %482  ;;  %1238 = vmatprep.subr.bf16.mxu0 %v791_v30 }
  0xf6   : > { %v498_v33 = vsel %vm496_vm5, %v491_v31, %v483_v32  ;;  %v512_v34 = vsel %vm496_vm5, %v483_v32, %v491_v31  ;;  %1239 = vmatpush1.bf16.msra.mxu0 %v790_v29  ;;  %v6858_v32 = vld [vmem:[#allocation4 + $0x54] ss:$20 sps:$4 sm:$0xff]  }
  0xf7   : > { %v546_v35 = vmul.bf16 %v7642_v16, %v512_v34  ;;  %v547_v36 = vmul.bf16 %v7645_v17, %v498_v33 }
  0xf9   : > { %v733_v37 = vpop.permute.xlu1 %732  ;;  %v731_v38 = vpop.permute.xlu0 %730  ;;  %1167 = vmatprep.subr.bf16.mxu1 %v547_v36 }
  0xfa   : > { %v744_v39 = vsel %vm742_vm6, %v731_v38, %v733_v37  ;;  %v758_v40 = vsel %vm742_vm6, %v733_v37, %v731_v38  ;;  %1168 = vmatpush1.bf16.msra.mxu1 %v546_v35  ;;  %v6857_v35 = vld [vmem:[#allocation4 + $0x30] ss:$20 sps:$4 sm:$0xff]  }
  0xfb   : > { %v792_v41 = vmul.bf16 %v7654_v25, %v744_v39  ;;  %v793_v42 = vmul.bf16 %v7657_v3, %v758_v40  ;;  %v6861_v38 = vld [vmem:[#allocation4 + $0x5c] ss:$20 sps:$4 sm:$0xff]  }
  0xfd   : > { %v493_v43 = vpop.permute.xlu1 %492  ;;  %v485_v44 = vpop.permute.xlu0 %484  ;;  %1240 = vmatprep.subr.bf16.mxu0 %v793_v42 }
  0xfe   : > { %v499_v45 = vsel %vm496_vm5, %v493_v43, %v485_v44  ;;  %v516_v47 = vsel %vm496_vm5, %v485_v44, %v493_v43  ;;  %1241 = vmatpush1.bf16.msra.mxu0 %v792_v41  ;;  %v6860_v43 = vld [vmem:[#allocation4 + $0x50] ss:$20 sps:$4 sm:$0xff]  }
  0xff   : > { %v548_v48 = vmul.bf16 %v7642_v16, %v516_v47  ;;  %v549_v49 = vmul.bf16 %v7645_v17, %v499_v45  ;;  %v6864_v47 = vld [vmem:[#allocation4 + $0x7c] ss:$20 sps:$4 sm:$0xff]  }
 0x101   : > { %v737_v50 = vpop.permute.xlu1 %736  ;;  %v735_v53 = vpop.permute.xlu0 %734  ;;  %1169 = vmatprep.subr.bf16.mxu1 %v549_v49 }
 0x102   : > { %v745_v54 = vsel %vm742_vm6, %v735_v53, %v737_v50  ;;  %v762_v55 = vsel %vm742_vm6, %v737_v50, %v735_v53  ;;  %1170 = vmatpush1.bf16.msra.mxu1 %v548_v48  ;;  %v6863_v50 = vld [vmem:[#allocation4 + $0x58] ss:$20 sps:$4 sm:$0xff]  }
 0x103   : > { %v794_v56 = vmul.bf16 %v7654_v25, %v745_v54  ;;  %v795_v57 = vmul.bf16 %v7657_v3, %v762_v55  ;;  %v6866_v53 = vld [vmem:[#allocation4 + $0x78] ss:$20 sps:$4 sm:$0xff]   ;;  %v6869_v54 = vld [vmem:[#allocation4 + $0x80] ss:$20 sps:$4 sm:$0xff]  }
 0x104   : > { %v6874_v55 = vld [vmem:[#allocation3 + $0x118] sm:$0xff] }
 0x105   : > { %v495_v62 = vpop.permute.xlu1 %494  ;;  %v487_v63 = vpop.permute.xlu0 %486  ;;  %1242 = vmatprep.subr.bf16.mxu0 %v795_v57  ;;  %v6871_v57 = vld [vmem:[#allocation4 + $0x10] ss:$20 sps:$4 sm:$0xff]  }
 0x106   : > { %v500_v1 = vsel %vm496_vm5, %v495_v62, %v487_v63  ;;  %v520_v5 = vsel %vm496_vm5, %v487_v63, %v495_v62  ;;  %1243 = vmatpush1.bf16.msra.mxu0 %v794_v56  ;;  %v6870_v56 = vld [vmem:[#allocation4 + $0x60] ss:$20 sps:$4 sm:$0xff]  }
 0x107   : > { %v550_v6 = vmul.bf16 %v7642_v16, %v520_v5  ;;  %v551_v58 = vmul.bf16 %v7645_v17, %v500_v1  ;;  %v860_v16 = vrot.slane %v855_v59, %v7466_v15  ;;  %v867_v17 = vrot.slane %v862_v8, %v7466_v15 }
 0x109   : > { %v741_v10 = vpop.permute.xlu1 %740  ;;  %v739_v11 = vpop.permute.xlu0 %738  ;;  %1171 = vmatprep.subr.bf16.mxu1 %v551_v58 }
 0x10a   : > { %v746_v14 = vsel %vm742_vm6, %v739_v11, %v741_v10  ;;  %v766_v2 = vsel %vm742_vm6, %v741_v10, %v739_v11  ;;  %1172 = vmatpush1.bf16.msra.mxu1 %v550_v6 }
 0x10b   : > { %v796_v18 = vmul.bf16 %v7654_v25, %v746_v14  ;;  %v797_v4 = vmul.bf16 %v7657_v3, %v766_v2  ;;  %v6855_v25 = vld [vmem:[#allocation4 + $0x34] ss:$20 sps:$4 sm:$0xff]  }
 0x10d   : > { %v809_v19 = vpop.permute.xlu1 %808  ;;  %v807_v20 = vpop.permute.xlu0 %806  ;;  %1174 = vmatmul.mubr.bf16.vlgmr.msra.gmra.mrb[0].mxu1 %v6846_v12  ;;  %1244 = vmatprep.subr.bf16.mxu0 %v797_v4 }
 0x10e   : > { %v823_v22 = vsel %vm822_vm7, %v807_v20, %v809_v19  ;;  %v834_v23 = vsel %vm822_vm7, %v809_v19, %v807_v20  ;;  %1245 = vmatpush1.bf16.msra.mxu0 %v796_v18  ;;  %1183 = vmatprep.mubr.bf16.mxu1 %v6852_v7 }
 0x10f   : > { %v868_v24 = vmul.bf16 %v860_v16, %v823_v22  ;;  %v869_v13 = vmul.bf16 %v867_v17, %v834_v23 }
 0x111   : > { %v813_v26 = vpop.permute.xlu1 %812  ;;  %v811_v3 = vpop.permute.xlu0 %810  ;;  %1247 = vmatmul.mubr.bf16.vlgmr.msra.gmra.mrb[0].mxu0 %v6849_v21  ;;  %1287 = vmatprep.subr.bf16.mxu0 %v869_v13 }
 0x112   : > { %v824_v28 = vsel %vm822_vm7, %v811_v3, %v813_v26  ;;  %v838_v29 = vsel %vm822_vm7, %v813_v26, %v811_v3  ;;  %6429 = vmatprep.subr.bf16.mxu1 %v869_v13  ;;  %1288 = vmatpush1.bf16.msra.mxu0 %v868_v24 }
 0x113   : > { %v870_v30 = vmul.bf16 %v860_v16, %v824_v28  ;;  %v871_v31 = vmul.bf16 %v867_v17, %v838_v29  ;;  %6433 = vmatpush1.bf16.msra.mxu1 %v868_v24  ;;  %1256 = vmatprep.mubr.bf16.mxu0 %v6855_v25 }
 0x115   : > { %v817_v33 = vpop.permute.xlu1 %816  ;;  %v815_v34 = vpop.permute.xlu0 %814  ;;  %1184 = vmatmul.mubr.bf16.gmra.mrb[4].mxu1 %v6854_v27  ;;  %1289 = vmatprep.subr.bf16.mxu0 %v871_v31 }
 0x116   : > { %v825_v36 = vsel %vm822_vm7, %v815_v34, %v817_v33  ;;  %v842_v37 = vsel %vm822_vm7, %v817_v33, %v815_v34  ;;  %6430 = vmatprep.subr.bf16.mxu1 %v871_v31  ;;  %1290 = vmatpush1.bf16.msra.mxu0 %v870_v30 }
 0x117   : > { %v872_v39 = vmul.bf16 %v860_v16, %v825_v36  ;;  %v873_v40 = vmul.bf16 %v867_v17, %v842_v37  ;;  %6434 = vmatpush1.bf16.msra.mxu1 %v870_v30  ;;  %1193 = vmatprep.mubr.bf16.mxu1 %v6858_v32 }
 0x119   : > { %v821_v41 = vpop.permute.xlu1 %820  ;;  %1257 = vmatmul.mubr.bf16.gmra.mrb[4].mxu0 %v6857_v35  ;;  %v819_v42 = vpop.permute.xlu0 %818  ;;  %1291 = vmatprep.subr.bf16.mxu0 %v873_v40 }
 0x11a   : > { %v826_v44 = vsel %vm822_vm7, %v819_v42, %v821_v41  ;;  %v846_v45 = vsel %vm822_vm7, %v821_v41, %v819_v42  ;;  %1266 = vmatprep.mubr.bf16.mxu0 %v6861_v38  ;;  %6431 = vmatprep.subr.bf16.mxu1 %v873_v40 }
 0x11b   : > { %v874_v48 = vmul.bf16 %v860_v16, %v826_v44  ;;  %v875_v49 = vmul.bf16 %v867_v17, %v846_v45  ;;  %1292 = vmatpush1.bf16.msra.mxu0 %v872_v39  ;;  %6435 = vmatpush1.bf16.msra.mxu1 %v872_v39 }
 0x11d   : > { %1194 = vmatmul.mubr.bf16.gmra.mrb[8].mxu1 %v6860_v43  ;;  %1293 = vmatprep.subr.bf16.mxu0 %v875_v49 }
 0x11e   : > { %1203 = vmatprep.mubr.bf16.mxu1 %v6864_v47  ;;  %6432 = vmatprep.subr.bf16.mxu1 %v875_v49 }
 0x11f   : > { %1294 = vmatpush1.bf16.msra.mxu0 %v874_v48  ;;  %6436 = vmatpush1.bf16.msra.mxu1 %v874_v48 }
 0x121   : > { %1267 = vmatmul.mubr.bf16.gmra.mrb[8].mxu0 %v6863_v50 }
 0x122   : > { %1276 = vmatprep.mubr.bf16.mxu0 %v6867_v51 }
 0x125   : > { %1204 = vmatmul.mubr.bf16.gmra.mrb[12].mxu1 %v6866_v53 }
 0x126   : > { %1339 = vmatprep.mubr.bf16.mxu1 %v6874_v55 }
 0x129   : > { %1277 = vmatmul.mubr.bf16.gmra.mrb[12].mxu0 %v6869_v54 }
 0x12a   : > { %1319 = vmatprep.mubr.bf16.mxu0 %v6874_v55  ;;  %v1016_v2 = vpop.permute.xlu1 %1015 }
 0x12b   : > { %v1011_v10 = vpop.permute.xlu0 %1010 }
 0x12d   : > { %6153 = vmatmul.mubr.msk.bf16.vlgmr.msra.gmra.mrb[16].mxu1 %vm1128_vm8, %v6870_v56 }
 0x12e   : > { %1349 = vmatprep.mubr.bf16.mxu1 %v6874_v55  ;;  %v1021_v25 = vpop.permute.xlu1 %1020 }
 0x12f   : > { %v1026_v29 = vpop.permute.xlu0 %1025 }
 0x131   : > { %6151 = vmatmul.mubr.msk.bf16.vlgmr.msra.gmra.mrb[0].mxu0 %vm1128_vm8, %v6871_v57 }
 0x132   : > { %1329 = vmatprep.mubr.bf16.mxu0 %v6874_v55 }
 0x133   : > { %v996_v48 = vpop.permute.xlu0 %995 }
 0x135   : > { %6154 = vmatmul.mubr.msk.bf16.gmra.mrb[20].mxu1 %vm1128_vm8, %v6872_v60 }
 0x136   : > { %v991_v42 = vpop.permute.xlu1 %990 }
 0x139   : > { %6152 = vmatmul.mubr.msk.bf16.gmra.mrb[4].mxu0 %vm1128_vm8, %v6873_v61 }
 0x1e0   : > { %v1175_v62 = vpop.f32.mrb[0].mxu1 }
 0x1e1   : > { %v1177_v63 = vpop.f32.mrb[1].mxu1  ;;  %v1176_v51 = vadd.f32 %v1175_v62, %v991_v42 }
 0x1e2   : > { %v1179_v1 = vpop.f32.mrb[2].mxu1  ;;  %v1178_v55 = vadd.f32 %v1177_v63, %v991_v42 }
 0x1e3   : > { %v1181_v5 = vpop.f32.mrb[3].mxu1  ;;  %v1180_v60 = vadd.f32 %v1179_v1, %v996_v48 }
 0x1e8   : > { %v7704_v6 = vpop.f32.mrb[4].mxu1 }
 0x1e9   : > { %v7706_v58 = vpop.f32.mrb[5].mxu1 }
 0x1ea   : > { %v7708_v59 = vpop.f32.mrb[6].mxu1 }
 0x1eb   : > { %v7710_v8 = vpop.f32.mrb[7].mxu1 }
 0x1f0   : > { %v1195_v11 = vpop.f32.mrb[8].mxu1 }
 0x1f1   : > { %v1196_v12 = vadd.f32 %v1195_v11, %v1011_v10  ;;  %v1197_v14 = vpop.f32.mrb[9].mxu1 }
 0x1f2   : > { %v1198_v7 = vadd.f32 %v1197_v14, %v1011_v10  ;;  %v1199_v18 = vpop.f32.mrb[10].mxu1  ;;  %v1182_v14 = vadd.f32 %v1181_v5, %v996_v48 }
 0x1f3   : > { %v1200_v4 = vadd.f32 %v1199_v18, %v1016_v2  ;;  %v1201_v16 = vpop.f32.mrb[11].mxu1 }
 0x1f4   : > { %v1268_v17 = vpop.f32.mrb[8].mxu0  ;;  %v1202_v19 = vadd.f32 %v1201_v16, %v1016_v2  ;;  %v1001_v16 = vpop.permute.xlu1 %1000 }
 0x1f5   : > { %v1269_v20 = vadd.f32 %v1268_v17, %v1196_v12  ;;  %v1270_v21 = vpop.f32.mrb[9].mxu0 }
 0x1f6   : > { %v1271_v22 = vadd.f32 %v1270_v21, %v1198_v7  ;;  %v1272_v23 = vpop.f32.mrb[10].mxu0 }
 0x1f7   : > { %v1273_v24 = vadd.f32 %v1272_v23, %v1200_v4  ;;  %v1274_v13 = vpop.f32.mrb[11].mxu0 }
 0x1f8   : > { %v1275_v26 = vadd.f32 %v1274_v13, %v1202_v19  ;;  %v1205_v3 = vpop.f32.mrb[12].mxu1 }
 0x1f9   : > { %v1206_v27 = vadd.f32 %v1205_v3, %v1021_v25  ;;  %v1207_v28 = vpop.f32.mrb[13].mxu1 }
 0x1fa   : > { %v1208_v30 = vadd.f32 %v1207_v28, %v1021_v25  ;;  %v1209_v31 = vpop.f32.mrb[14].mxu1 }
 0x1fb   : > { %v1210_v32 = vadd.f32 %v1209_v31, %v1026_v29  ;;  %v1211_v33 = vpop.f32.mrb[15].mxu1  ;;  %v1188_v31 = vadd.f32 %v7706_v58, %v1001_v16 }
 0x1fc   : > { %v1278_v34 = vpop.f32.mrb[12].mxu0  ;;  %v1212_v35 = vadd.f32 %v1211_v33, %v1026_v29 }
 0x1fd   : > { %v1279_v36 = vadd.f32 %v1278_v34, %v1206_v27  ;;  %v1280_v37 = vpop.f32.mrb[13].mxu0  ;;  %v1186_v27 = vadd.f32 %v7704_v6, %v1001_v16 }
 0x1fe   : > { %v1281_v38 = vadd.f32 %v1280_v37, %v1208_v30  ;;  %v1282_v39 = vpop.f32.mrb[14].mxu0 }
 0x1ff   : > { %v1283_v40 = vadd.f32 %v1282_v39, %v1210_v32  ;;  %v1284_v41 = vpop.f32.mrb[15].mxu0 }
 0x200   : > { %v1285_v43 = vadd.f32 %v1284_v41, %v1212_v35  ;;  %v1341_v44 = vpop.f32.mrb[16].mxu1 }
 0x201   : > { %v7712_v45 = vadd.f32 %v1341_v44, %v1269_v20  ;;  %v1343_v47 = vpop.f32.mrb[17].mxu1 }
 0x202   : > { %v7714_v49 = vadd.f32 %v1343_v47, %v1271_v22  ;;  %v1345_v50 = vpop.f32.mrb[18].mxu1 }
 0x203   : > { %v7716_v53 = vadd.f32 %v1345_v50, %v1273_v24  ;;  %v1347_v54 = vpop.f32.mrb[19].mxu1  ;;  %v1368_v61 = vmax.f32 %v7712_v45, 0.0   ;;  %v1006_v24 = vpop.permute.xlu0 %1005 }
 0x204   : > { %v7718_v56 = vadd.f32 %v1347_v54, %v1275_v26  ;;  %v1321_v57 = vpop.f32.mrb[0].mxu0  ;;  %v1369_v2 = vmax.f32 %v7714_v49, 0.0   ;;  %v1190_v35 = vadd.f32 %v7708_v59, %v1006_v24 }
 0x205   : > { %v1370_v10 = vmax.f32 %v7716_v53, 0.0   ;;  %v7722_v11 = vadd.f32 %v1321_v57, %v1176_v51  ;;  %v1323_v12 = vpop.f32.mrb[1].mxu0 }
 0x206   : > { %v1371_v62 = vmax.f32 %v7718_v56, 0.0   ;;  %v7726_v7 = vadd.f32 %v1323_v12, %v1178_v55  ;;  %v1325_v18 = vpop.f32.mrb[2].mxu0 }
 0x207   : > { %v1380_v63 = vpack.c.bf16 %v1370_v10, %v1368_v61  ;;  %v7732_v1 = vadd.f32 %v1325_v18, %v1180_v60  ;;  %v1327_v4 = vpop.f32.mrb[3].mxu0  ;;  %v1360_v5 = vmax.f32 %v7722_v11, 0.0  }
 0x208   : > { %v1381_v17 = vpack.c.bf16 %v1371_v62, %v1369_v2  ;;  %v6444_v19 = vadd.f32 %v1327_v4, %v1182_v14  ;;  %v1351_v20 = vpop.f32.mrb[20].mxu1  ;;  %v1361_v13 = vmax.f32 %v7726_v7, 0.0  }
 0x209   : > { %1388 = vst [vmem:[#allocation2 + $0x20] sm:$0xff] %v1380_v63  ;;  %v1362_v21 = vmax.f32 %v7732_v1, 0.0   ;;  %v1352_v22 = vadd.f32 %v1351_v20, %v1279_v36  ;;  %v1353_v23 = vpop.f32.mrb[21].mxu1 }
 0x20a   : > { %1389 = vst [vmem:[#allocation2 + $0x28] sm:$0xff] %v1381_v17  ;;  %v1363_v25 = vmax.f32 %v6444_v19, 0.0   ;;  %v1354_v26 = vadd.f32 %v1353_v23, %v1281_v38  ;;  %v1355_v3 = vpop.f32.mrb[22].mxu1  ;;  %v1192_v38 = vadd.f32 %v7710_v8, %v1006_v24 }
 0x20b   : > { %v1376_v28 = vpack.c.bf16 %v1362_v21, %v1360_v5  ;;  %v1356_v29 = vadd.f32 %v1355_v3, %v1283_v40  ;;  %v1357_v30 = vpop.f32.mrb[23].mxu1  ;;  %v1372_v36 = vmax.f32 %v1352_v22, 0.0  }
 0x20c   : > { %v1377_v32 = vpack.c.bf16 %v1363_v25, %v1361_v13  ;;  %v1358_v33 = vadd.f32 %v1357_v30, %v1285_v43  ;;  %v1331_v34 = vpop.f32.mrb[4].mxu0  ;;  %v1373_v42 = vmax.f32 %v1354_v26, 0.0  }
 0x20d   : > { %1384 = vst [vmem:[#allocation2] sm:$0xff] %v1376_v28  ;;  %v1374_v37 = vmax.f32 %v1356_v29, 0.0   ;;  %v6446_v39 = vadd.f32 %v1331_v34, %v1186_v27  ;;  %v1333_v41 = vpop.f32.mrb[5].mxu0 }
 0x20e   : > { %1385 = vst [vmem:[#allocation2 + $0x8] sm:$0xff] %v1377_v32  ;;  %v1375_v6 = vmax.f32 %v1358_v33, 0.0   ;;  %v6448_v44 = vadd.f32 %v1333_v41, %v1188_v31  ;;  %v1335_v40 = vpop.f32.mrb[6].mxu0 }
 0x20f   : > { %v1382_v47 = vpack.c.bf16 %v1374_v37, %v1372_v36  ;;  %v6450_v48 = vadd.f32 %v1335_v40, %v1190_v35  ;;  %v1337_v58 = vpop.f32.mrb[7].mxu0  ;;  %v1364_v50 = vmax.f32 %v6446_v39, 0.0  }
 0x210   : > { %v1383_v49 = vpack.c.bf16 %v1375_v6, %v1373_v42  ;;  %v6452_v43 = vadd.f32 %v1337_v58, %v1192_v38  ;;  %v1365_v51 = vmax.f32 %v6448_v44, 0.0  }
 0x211   : > { %1390 = vst [vmem:[#allocation2 + $0x30] sm:$0xff] %v1382_v47  ;;  %v1366_v59 = vmax.f32 %v6450_v48, 0.0  }
 0x212   : > { %1391 = vst [vmem:[#allocation2 + $0x38] sm:$0xff] %v1383_v49  ;;  %v1367_v54 = vmax.f32 %v6452_v43, 0.0  }
 0x213   : > { %v1378_v55 = vpack.c.bf16 %v1366_v59, %v1364_v50 }
 0x214   : > { %v1379_v56 = vpack.c.bf16 %v1367_v54, %v1365_v51 }
 0x215   : > { %1386 = vst [vmem:[#allocation2 + $0x10] sm:$0xff] %v1378_v55 }
 0x216   : > { %1387 = vst [vmem:[#allocation2 + $0x18] sm:$0xff] %v1379_v56 }
 0x217 LB: >> { %v7832_v45 = vld [vmem:[#allocation2] sm:$0xff]  ;;  %s7242_s24 = smov 127   ;;  %v7838_v53 = vld [vmem:[#allocation2 + $0x8] sm:$0xff]  ;;  %s7243_s26 = smov 17   ;;  %v7250_v27 = vmov 0   ;;  %s7228_s23 = sphi %s7777_s23, %s1397_s23   ;;  %v7224_v5 = vphi %v1360_v5, %v4858_v5   ;;  %v7220_v13 = vphi %v1361_v13, %v4859_v13   ;;  %v7216_v21 = vphi %v1362_v21, %v4860_v21   ;;  %v7212_v25 = vphi %v1363_v25, %v4861_v25   ;;  %v7208_v50 = vphi %v1364_v50, %v4862_v50   ;;  %v7204_v51 = vphi %v1365_v51, %v4863_v51   ;;  %v7200_v59 = vphi %v1366_v59, %v4864_v59   ;;  %v7196_v54 = vphi %v1367_v54, %v4865_v54   ;;  %v7192_v61 = vphi %v1368_v61, %v8857_v61   ;;  %v7188_v2 = vphi %v1369_v2, %v8863_v2   ;;  %v7184_v10 = vphi %v1370_v10, %v8860_v10   ;;  %v7180_v62 = vphi %v1371_v62, %v8866_v62   ;;  %v7176_v36 = vphi %v1372_v36, %v4870_v36   ;;  %v7172_v42 = vphi %v1373_v42, %v4871_v42   ;;  %v7168_v37 = vphi %v1374_v37, %v4872_v37   ;;  %v7164_v6 = vphi %v1375_v6, %v4873_v6  }
 0x218   : >> { %1748 = vrot.lane.b32.xlu0 %v7832_v45, %s7242_s24  ;;  %2390 = vmatprep.subr.bf16.mxu0 %v7838_v53  ;;  %v7849_v60 = vld [vmem:[#allocation2 + $0x28] sm:$0xff]  ;;  %v7851_v11 = vld [vmem:[#allocation2 + $0x20] sm:$0xff]  ;;  %v7861_v14 = vld [vmem:[#allocation2 + $0x30] sm:$0xff]  ;;  %s7244_s27 = smov 113   ;;  %s7245_s28 = smov 16  }
 0x219   : >> { %2391 = vmatpush1.bf16.msra.mxu0 %v7832_v45  ;;  %v7859_v12 = vld [vmem:[#allocation2 + $0x38] sm:$0xff]  ;;  %s7246_s29 = smov 112   ;;  %s7247_s30 = smov 15   ;;  %v1788_v18 = vld [vmem:[%s9278_s3] sm:$0x44]  ;;  %6875 = vset.pattern.permute.xlu0 %v7250_v27 }
 0x21a   : >> { %s6171_s5 = smul.u32 480, %s7228_s23  ;;  %s7248_s8 = smov 1   ;;  %v6163_v63 = vcombine.low %v1788_v18, %v1788_v18  ;;  %v6164_v1 = vcombine.high %v1788_v18, %v1788_v18  ;;  %v1472_v3 = vld [vmem:[%s9278_s3] sm:$0x11]  ;;  %6876 = vset.pattern.permute.xlu1 %v7250_v27  ;;  %v1866_v41 = vld [vmem:[%s9278_s3] sm:$0x88] }
 0x21b   : >> { %s7249_s9 = smov 111   ;;  %v6155_v35 = vcombine.low %v1472_v3, %v1472_v3  ;;  %v6156_v39 = vcombine.high %v1472_v3, %v1472_v3  ;;  %v6165_v58 = vcombine.low %v1866_v41, %v1866_v41  ;;  %v6166_v55 = vcombine.high %v1866_v41, %v1866_v41  ;;  %s6196_s12 = smul.u32 192, %s7228_s23 }
 0x21c   : >> { %v7830_v8 = vld [vmem:[#allocation2 + $0x10] sm:$0xff]  ;;  %1750 = vrot.lane.b32.xlu0 %v7838_v53, %s7242_s24  ;;  %s7943_s6 = scalar_lea.vmem [#allocation4], %s6171_s5  ;;  %v1795_v4 = vshrl.u32 %v6163_v63, 16  ;;  %v1803_v16 = vshrl.u32 %v6164_v1, 16  ;;  %s1397_s23 = sadd.s32 1, %s7228_s23  }
 0x21d   : >> { %1752 = vrot.lane.b32.xlu1 %v7830_v8, %s7242_s24  ;;  %v7840_v57 = vld [vmem:[#allocation2 + $0x18] sm:$0xff]  ;;  %v6895_v7 = vld [vmem:[%s7943_s6 + $0xac] ss:$20 sps:$4 sm:$0xff]   ;;  %v1479_v49 = vpack.i.b16 %v6155_v35, %v6155_v35  ;;  %v1486_v43 = vpack.i.b16 %v6156_v39, %v6156_v39  ;;  %v1880_v18 = vpack.i.b16 %v6166_v55, %v6166_v55  ;;  %s8049_s5 = scalar_lea.vmem %s9277_s2, %s6196_s12  ;;  %p8885_p3 = scmp.ge.s32.totalorder %s1397_s23, 5  }
 0x21e   : >> { %2392 = vmatprep.subr.bf16.mxu0 %v7840_v57  ;;  %2422 = vmatprep.mubr.bf16.mxu0 %v6895_v7  ;;  %v1796_v17 = vpack.i.b16 %v1795_v4, %v1795_v4  ;;  %v1804_v19 = vpack.i.b16 %v1803_v16, %v1803_v16  ;;  %v6907_v20 = vld [vmem:[%s7943_s6 + $0xa4] ss:$20 sps:$4 sm:$0xff]   ;;  %v1873_v7 = vpack.i.b16 %v6165_v58, %v6165_v58 }
 0x21f   : >> { %2393 = vmatpush1.bf16.msra.mxu0 %v7830_v8  ;;  %2349 = vmatprep.mubr.bf16.mxu1 %v6907_v20  ;;  %v8027_v3 = vrot.slane %v1880_v18, %v7597_v9  ;;  %v1548_v58 = vld [vmem:[%s9278_s3] sm:$0x11] }
 0x220   : >> { %2394 = vmatprep.subr.bf16.mxu0 %v7849_v60  ;;  %1756 = vrot.lane.b32.xlu0 %v7851_v11, %s7242_s24  ;;  %v7983_v24 = vrot.slane %v1796_v17, %v7503_v46  ;;  %v1809_v26 = vrot.slane %v1804_v19, %v7503_v46 }
 0x221   : >> { %1754 = vrot.lane.b32.xlu1 %v7840_v57, %s7242_s24 }
 0x223   : >> { %2395 = vmatpush1.bf16.msra.mxu0 %v7851_v11 }
 0x224   : >> { %2396 = vmatprep.subr.bf16.mxu0 %v7859_v12  ;;  %1760 = vrot.lane.b32.xlu0 %v7861_v14, %s7242_s24 }
 0x225   : >> { %1758 = vrot.lane.b32.xlu1 %v7849_v60, %s7242_s24 }
 0x227   : >> { %2397 = vmatpush1.bf16.msra.mxu0 %v7861_v14 }
 0x228   : >> { %1428 = vrot.lane.b32.xlu0 %v7838_v53, %s7243_s26 }
 0x229   : >> { %1762 = vrot.lane.b32.xlu1 %v7859_v12, %s7242_s24 }
 0x22c   : >> { %1826 = vrot.lane.b32.xlu0 %v7832_v45, %s7244_s27 }
 0x22d   : >> { %1440 = vrot.lane.b32.xlu1 %v7832_v45, %s7243_s26 }
 0x230   : >> { %1430 = vrot.lane.b32.xlu0 %v7840_v57, %s7243_s26 }
 0x231   : >> { %1828 = vrot.lane.b32.xlu1 %v7838_v53, %s7244_s27 }
 0x234   : >> { %1830 = vrot.lane.b32.xlu0 %v7830_v8, %s7244_s27 }
 0x235   : >> { %1442 = vrot.lane.b32.xlu1 %v7830_v8, %s7243_s26 }
 0x238   : >> { %1432 = vrot.lane.b32.xlu0 %v7849_v60, %s7243_s26 }
 0x239   : >> { %1832 = vrot.lane.b32.xlu1 %v7840_v57, %s7244_s27 }
 0x23c   : >> { %1834 = vrot.lane.b32.xlu0 %v7851_v11, %s7244_s27 }
 0x23d   : >> { %1444 = vrot.lane.b32.xlu1 %v7851_v11, %s7243_s26 }
 0x240   : >> { %1434 = vrot.lane.b32.xlu0 %v7859_v12, %s7243_s26 }
 0x241   : >> { %1836 = vrot.lane.b32.xlu1 %v7849_v60, %s7244_s27 }
 0x244   : >> { %1838 = vrot.lane.b32.xlu0 %v7861_v14, %s7244_s27 }
 0x245   : >> { %1446 = vrot.lane.b32.xlu1 %v7861_v14, %s7243_s26 }
 0x248   : >> { %1508 = vrot.lane.b32.xlu0 %v7838_v53, %s7245_s28 }
 0x249   : >> { %1840 = vrot.lane.b32.xlu1 %v7859_v12, %s7244_s27 }
 0x24c   : >> { %1902 = vrot.lane.b32.xlu0 %v7832_v45, %s7246_s29 }
 0x24d   : >> { %1516 = vrot.lane.b32.xlu1 %v7832_v45, %s7245_s28 }
 0x250   : >> { %1510 = vrot.lane.b32.xlu0 %v7840_v57, %s7245_s28 }
 0x251   : >> { %1904 = vrot.lane.b32.xlu1 %v7838_v53, %s7246_s29 }
 0x254   : >> { %1906 = vrot.lane.b32.xlu0 %v7830_v8, %s7246_s29 }
 0x255   : >> { %1518 = vrot.lane.b32.xlu1 %v7830_v8, %s7245_s28 }
 0x258   : >> { %1512 = vrot.lane.b32.xlu0 %v7849_v60, %s7245_s28 }
 0x259   : >> { %1908 = vrot.lane.b32.xlu1 %v7840_v57, %s7246_s29 }
 0x25c   : >> { %1910 = vrot.lane.b32.xlu0 %v7851_v11, %s7246_s29 }
 0x25d   : >> { %1520 = vrot.lane.b32.xlu1 %v7851_v11, %s7245_s28 }
 0x260   : >> { %1514 = vrot.lane.b32.xlu0 %v7859_v12, %s7245_s28 }
 0x261   : >> { %1912 = vrot.lane.b32.xlu1 %v7849_v60, %s7246_s29 }
 0x264   : >> { %1914 = vrot.lane.b32.xlu0 %v7861_v14, %s7246_s29 }
 0x265   : >> { %1522 = vrot.lane.b32.xlu1 %v7861_v14, %s7245_s28 }
 0x268   : >> { %1586 = vrot.lane.b32.xlu0 %v7838_v53, %s7247_s30 }
 0x269   : >> { %1916 = vrot.lane.b32.xlu1 %v7859_v12, %s7246_s29 }
 0x26c   : >> { %1588 = vrot.lane.b32.xlu0 %v7840_v57, %s7247_s30 }
 0x26d   : >> { %1594 = vrot.lane.b32.xlu1 %v7832_v45, %s7247_s30 }
 0x270   : >> { %1590 = vrot.lane.b32.xlu0 %v7849_v60, %s7247_s30 }
 0x271   : >> { %1596 = vrot.lane.b32.xlu1 %v7830_v8, %s7247_s30 }
 0x274   : >> { %1592 = vrot.lane.b32.xlu0 %v7859_v12, %s7247_s30 }
 0x275   : >> { %1598 = vrot.lane.b32.xlu1 %v7851_v11, %s7247_s30 }
 0x278   : >> { %1662 = vrot.lane.b32.xlu0 %v7838_v53, %s7248_s8 }
 0x279   : >> { %1600 = vrot.lane.b32.xlu1 %v7861_v14, %s7247_s30 }
 0x27c   : >> { %1980 = vrot.lane.b32.xlu0 %v7832_v45, %s7249_s9 }
 0x27d   : >> { %1670 = vrot.lane.b32.xlu1 %v7832_v45, %s7248_s8 }
 0x280   : >> { %1664 = vrot.lane.b32.xlu0 %v7840_v57, %s7248_s8 }
 0x281   : >> { %1982 = vrot.lane.b32.xlu1 %v7838_v53, %s7249_s9 }
 0x284   : >> { %1984 = vrot.lane.b32.xlu0 %v7830_v8, %s7249_s9 }
 0x285   : >> { %1672 = vrot.lane.b32.xlu1 %v7830_v8, %s7248_s8 }
 0x288   : >> { %1666 = vrot.lane.b32.xlu0 %v7849_v60, %s7248_s8 }
 0x289   : >> { %1986 = vrot.lane.b32.xlu1 %v7840_v57, %s7249_s9 }
 0x28a   : >> { %v1749_v23 = vpop.permute.xlu0 %1748 }
 0x28c   : >> { %1988 = vrot.lane.b32.xlu0 %v7851_v11, %s7249_s9 }
 0x28d   : >> { %1674 = vrot.lane.b32.xlu1 %v7851_v11, %s7248_s8  ;;  %v8012_v11 = vrot.slane %v1479_v49, %v7466_v15 }
 0x28e   : >> { %v1751_v29 = vpop.permute.xlu0 %1750 }
 0x28f   : >> { %v1753_v22 = vpop.permute.xlu1 %1752  ;;  %v1764_v31 = vsel %vm584_vm2, %v1749_v23, %v1751_v29  ;;  %v1774_v32 = vsel %vm584_vm2, %v1751_v29, %v1749_v23  ;;  %v8024_v23 = vrot.slane %v1873_v7, %v7597_v9  ;;  %v6158_v7 = vcombine.high %v1548_v58, %v1548_v58 }
 0x290   : >> { %v1810_v33 = vmul.bf16 %v7983_v24, %v1764_v31  ;;  %v1811_v34 = vmul.bf16 %v1809_v26, %v1774_v32  ;;  %1668 = vrot.lane.b32.xlu0 %v7859_v12, %s7248_s8 }
 0x291   : >> { %1990 = vrot.lane.b32.xlu1 %v7849_v60, %s7249_s9 }
 0x292   : >> { %v1757_v47 = vpop.permute.xlu0 %1756  ;;  %2398 = vmatprep.subr.bf16.mxu0 %v1811_v34 }
 0x293   : >> { %v1755_v28 = vpop.permute.xlu1 %1754  ;;  %2399 = vmatpush1.bf16.msra.mxu0 %v1810_v33 }
 0x294   : >> { %v1778_v30 = vsel %vm584_vm2, %v1755_v28, %v1753_v22  ;;  %v1765_v38 = vsel %vm584_vm2, %v1753_v22, %v1755_v28  ;;  %1992 = vrot.lane.b32.xlu0 %v7861_v14, %s7249_s9 }
 0x295   : >> { %1676 = vrot.lane.b32.xlu1 %v7861_v14, %s7248_s8  ;;  %v1813_v44 = vmul.bf16 %v1809_v26, %v1778_v30  ;;  %v1812_v56 = vmul.bf16 %v7983_v24, %v1765_v38 }
 0x296   : >> { %v1761_v57 = vpop.permute.xlu0 %1760 }
 0x297   : >> { %v1759_v40 = vpop.permute.xlu1 %1758  ;;  %2400 = vmatprep.subr.bf16.mxu0 %v1813_v44 }
 0x298   : >> { %v1782_v48 = vsel %vm584_vm2, %v1759_v40, %v1757_v47  ;;  %v1766_v8 = vsel %vm584_vm2, %v1757_v47, %v1759_v40  ;;  %2401 = vmatpush1.bf16.msra.mxu0 %v1812_v56 }
 0x299   : >> { %1994 = vrot.lane.b32.xlu1 %v7859_v12, %s7249_s9  ;;  %v1815_v45 = vmul.bf16 %v1809_v26, %v1782_v48  ;;  %v8015_v12 = vrot.slane %v1486_v43, %v7466_v15  ;;  %v1814_v63 = vmul.bf16 %v7983_v24, %v1766_v8  ;;  %v6157_v8 = vcombine.low %v1548_v58, %v1548_v58  ;;  %v6204_v58 = vld [vmem:[%s8049_s5 + $0x78] sm:$0xff] }
 0x29a   : >> { %v1429_v16 = vpop.permute.xlu0 %1428 }
 0x29b   : >> { %v1763_v53 = vpop.permute.xlu1 %1762  ;;  %2402 = vmatprep.subr.bf16.mxu0 %v1815_v45  ;;  %v6197_v45 = vld [vmem:[%s8049_s5 + $0x40] sm:$0xff] }
 0x29c   : >> { %v1786_v60 = vsel %vm584_vm2, %v1763_v53, %v1761_v57  ;;  %v1767_v14 = vsel %vm584_vm2, %v1761_v57, %v1763_v53  ;;  %2403 = vmatpush1.bf16.msra.mxu0 %v1814_v63  ;;  %v6198_v53 = vld [vmem:[%s8049_s5 + $0x48] sm:$0xff]  ;;  %2167 = vperm.xlu0 %6875, %v6197_v45  }
 0x29d   : >> { %v1817_v1 = vmul.bf16 %v1809_v26, %v1786_v60  ;;  %v1816_v26 = vmul.bf16 %v7983_v24, %v1767_v14  ;;  %2172 = vperm.xlu1 %6876, %v6198_v53   ;;  %v6200_v14 = vld [vmem:[%s8049_s5 + $0x58] sm:$0xff] }
 0x29e   : >> { %v1827_v29 = vpop.permute.xlu0 %1826 }
 0x29f   : >> { %v1441_v4 = vpop.permute.xlu1 %1440  ;;  %2404 = vmatprep.subr.bf16.mxu0 %v1817_v1  ;;  %v1942_v1 = vld [vmem:[%s9278_s3] sm:$0x88] }
 0x2a0   : >> { %v1448_v17 = vsel %vm260_vm0, %v1441_v4, %v1429_v16  ;;  %v1458_v19 = vsel %vm260_vm0, %v1429_v16, %v1441_v4  ;;  %2405 = vmatpush1.bf16.msra.mxu0 %v1816_v26  ;;  %v6199_v4 = vld [vmem:[%s8049_s5 + $0x50] sm:$0xff]  ;;  %v1563_v26 = vshrl.u32 %v6158_v7, 16  ;;  %2182 = vperm.xlu0 %6875, %v6200_v14  }
 0x2a1   : >> { %v1492_v20 = vmul.bf16 %v8012_v11, %v1458_v19  ;;  %v1493_v22 = vmul.bf16 %v8015_v12, %v1448_v17  ;;  %v1555_v19 = vshrl.u32 %v6157_v8, 16  ;;  %2177 = vperm.xlu1 %6876, %v6199_v4  }
 0x2a2   : >> { %v1431_v35 = vpop.permute.xlu0 %1430 }
 0x2a3   : >> { %v1829_v28 = vpop.permute.xlu1 %1828  ;;  %2317 = vmatprep.subr.bf16.mxu1 %v1493_v22 }
 0x2a4   : >> { %v1842_v30 = vsel %vm664_vm4, %v1827_v29, %v1829_v28  ;;  %v1852_v31 = vsel %vm664_vm4, %v1829_v28, %v1827_v29  ;;  %2318 = vmatpush1.bf16.msra.mxu1 %v1492_v20 }
 0x2a5   : >> { %v1886_v32 = vmul.bf16 %v8024_v23, %v1842_v30  ;;  %v1887_v33 = vmul.bf16 %v8027_v3, %v1852_v31  ;;  %v6167_v30 = vcombine.low %v1942_v1, %v1942_v1  ;;  %v6168_v31 = vcombine.high %v1942_v1, %v1942_v1 }
 0x2a6   : >> { %v1831_v40 = vpop.permute.xlu0 %1830 }
 0x2a7   : >> { %v1443_v34 = vpop.permute.xlu1 %1442  ;;  %2406 = vmatprep.subr.bf16.mxu0 %v1887_v33  ;;  %v6201_v33 = vld [vmem:[%s8049_s5 + $0x60] sm:$0xff] }
 0x2a8   : >> { %v1449_v39 = vsel %vm260_vm0, %v1443_v34, %v1431_v35  ;;  %v1462_v24 = vsel %vm260_vm0, %v1431_v35, %v1443_v34  ;;  %2407 = vmatpush1.bf16.msra.mxu0 %v1886_v32  ;;  %v6202_v32 = vld [vmem:[%s8049_s5 + $0x68] sm:$0xff]  ;;  %2187 = vperm.xlu1 %6876, %v6201_v33  }
 0x2a9   : >> { %v1494_v41 = vmul.bf16 %v8012_v11, %v1462_v24  ;;  %v1495_v38 = vmul.bf16 %v8015_v12, %v1449_v39  ;;  %v1556_v39 = vpack.i.b16 %v1555_v19, %v1555_v19  ;;  %2192 = vperm.xlu0 %6875, %v6202_v32  }
 0x2aa   : >> { %v1433_v56 = vpop.permute.xlu0 %1432 }
 0x2ab   : >> { %v1833_v44 = vpop.permute.xlu1 %1832  ;;  %2319 = vmatprep.subr.bf16.mxu1 %v1495_v38  ;;  %v1564_v38 = vpack.i.b16 %v1563_v26, %v1563_v26 }
 0x2ac   : >> { %v1843_v47 = vsel %vm664_vm4, %v1831_v40, %v1833_v44  ;;  %v1856_v48 = vsel %vm664_vm4, %v1833_v44, %v1831_v40  ;;  %2320 = vmatpush1.bf16.msra.mxu1 %v1494_v41 }
 0x2ad   : >> { %v1888_v49 = vmul.bf16 %v8024_v23, %v1843_v47  ;;  %v1889_v43 = vmul.bf16 %v8027_v3, %v1856_v48  ;;  %v1949_v47 = vshrl.u32 %v6167_v30, 16  ;;  %v1957_v48 = vshrl.u32 %v6168_v31, 16  ;;  %2202 = vperm.xlu0 %6875, %v6204_v58  }
 0x2ae   : >> { %v1835_v17 = vpop.permute.xlu0 %1834  ;;  %v8080_v53 = vrot.slane %v1564_v38, %v7466_v15 }
 0x2af   : >> { %v1445_v55 = vpop.permute.xlu1 %1444  ;;  %2408 = vmatprep.subr.bf16.mxu0 %v1889_v43 }
 0x2b0   : >> { %v1450_v57 = vsel %vm260_vm0, %v1445_v55, %v1433_v56  ;;  %v1466_v60 = vsel %vm260_vm0, %v1433_v56, %v1445_v55  ;;  %2409 = vmatpush1.bf16.msra.mxu0 %v1888_v49  ;;  %v6203_v49 = vld [vmem:[%s8049_s5 + $0x70] sm:$0xff]  ;;  %v8075_v56 = vrot.slane %v1556_v39, %v7466_v15 }
 0x2b1   : >> { %v1496_v18 = vmul.bf16 %v8012_v11, %v1466_v60  ;;  %v1497_v63 = vmul.bf16 %v8015_v12, %v1450_v57  ;;  %v1950_v57 = vpack.i.b16 %v1949_v47, %v1949_v47  ;;  %v1958_v60 = vpack.i.b16 %v1957_v48, %v1957_v48  ;;  %2197 = vperm.xlu1 %6876, %v6203_v49  }
 0x2b2   : >> { %v1435_v35 = vpop.permute.xlu0 %1434 }
 0x2b3   : >> { %v1837_v16 = vpop.permute.xlu1 %1836  ;;  %2321 = vmatprep.subr.bf16.mxu1 %v1497_v63 }
 0x2b4   : >> { %v1844_v20 = vsel %vm664_vm4, %v1835_v17, %v1837_v16  ;;  %v1860_v22 = vsel %vm664_vm4, %v1837_v16, %v1835_v17  ;;  %2322 = vmatpush1.bf16.msra.mxu1 %v1496_v18  ;;  %v8089_v16 = vrot.slane %v1950_v57, %v7597_v9 }
 0x2b5   : >> { %v1890_v28 = vmul.bf16 %v8024_v23, %v1844_v20  ;;  %v1891_v29 = vmul.bf16 %v8027_v3, %v1860_v22 }
 0x2b6   : >> { %v1839_v55 = vpop.permute.xlu0 %1838 }
 0x2b7   : >> { %v1447_v34 = vpop.permute.xlu1 %1446  ;;  %2410 = vmatprep.subr.bf16.mxu0 %v1891_v29 }
 0x2b8   : >> { %v1451_v24 = vsel %vm260_vm0, %v1447_v34, %v1435_v35  ;;  %v1470_v41 = vsel %vm260_vm0, %v1435_v35, %v1447_v34  ;;  %2411 = vmatpush1.bf16.msra.mxu0 %v1890_v28 }
 0x2b9   : >> { %v1498_v44 = vmul.bf16 %v8012_v11, %v1470_v41  ;;  %v1499_v40 = vmul.bf16 %v8015_v12, %v1451_v24 }
 0x2ba   : >> { %v1509_v18 = vpop.permute.xlu0 %1508 }
 0x2bb   : >> { %v1841_v43 = vpop.permute.xlu1 %1840  ;;  %2323 = vmatprep.subr.bf16.mxu1 %v1499_v40 }
 0x2bc   : >> { %v1845_v8 = vsel %vm664_vm4, %v1839_v55, %v1841_v43  ;;  %v1864_v45 = vsel %vm664_vm4, %v1841_v43, %v1839_v55  ;;  %2324 = vmatpush1.bf16.msra.mxu1 %v1498_v44  ;;  %v1626_v43 = vld [vmem:[%s9278_s3] sm:$0x22] }
 0x2bd   : >> { %v1892_v11 = vmul.bf16 %v8024_v23, %v1845_v8  ;;  %v1893_v12 = vmul.bf16 %v8027_v3, %v1864_v45  ;;  %v8092_v23 = vrot.slane %v1958_v60, %v7597_v9  ;;  %v6159_v60 = vcombine.low %v1626_v43, %v1626_v43 }
 0x2be   : >> { %v1903_v17 = vpop.permute.xlu0 %1902 }
 0x2bf   : >> { %v1517_v7 = vpop.permute.xlu1 %1516  ;;  %2412 = vmatprep.subr.bf16.mxu0 %v1893_v12 }
 0x2c0   : >> { %v1524_v63 = vsel %vm338_vm1, %v1517_v7, %v1509_v18  ;;  %v1534_v14 = vsel %vm338_vm1, %v1509_v18, %v1517_v7  ;;  %2413 = vmatpush1.bf16.msra.mxu0 %v1892_v11  ;;  %v6160_v7 = vcombine.high %v1626_v43, %v1626_v43 }
 0x2c1   : >> { %v1570_v1 = vmul.bf16 %v8075_v56, %v1534_v14  ;;  %v1571_v4 = vmul.bf16 %v8080_v53, %v1524_v63 }
 0x2c2   : >> { %v1511_v29 = vpop.permute.xlu0 %1510 }
 0x2c3   : >> { %v1905_v3 = vpop.permute.xlu1 %1904  ;;  %2325 = vmatprep.subr.bf16.mxu1 %v1571_v4 }
 0x2c4   : >> { %v1918_v19 = vsel %vm742_vm6, %v1903_v17, %v1905_v3  ;;  %v1928_v20 = vsel %vm742_vm6, %v1905_v3, %v1903_v17  ;;  %2326 = vmatpush1.bf16.msra.mxu1 %v1570_v1  ;;  %v1633_v17 = vpack.i.b16 %v6159_v60, %v6159_v60 }
 0x2c5   : >> { %v1964_v22 = vmul.bf16 %v8089_v16, %v1918_v19  ;;  %v1965_v26 = vmul.bf16 %v8092_v23, %v1928_v20  ;;  %v1640_v19 = vpack.i.b16 %v6160_v7, %v6160_v7 }
 0x2c6   : >> { %v1907_v35 = vpop.permute.xlu0 %1906 }
 0x2c7   : >> { %v1519_v28 = vpop.permute.xlu1 %1518  ;;  %2414 = vmatprep.subr.bf16.mxu0 %v1965_v26 }
 0x2c8   : >> { %v1525_v30 = vsel %vm338_vm1, %v1519_v28, %v1511_v29  ;;  %v1538_v31 = vsel %vm338_vm1, %v1511_v29, %v1519_v28  ;;  %2415 = vmatpush1.bf16.msra.mxu0 %v1964_v22  ;;  %v1702_v29 = vld [vmem:[%s9278_s3] sm:$0x22] }
 0x2c9   : >> { %v1572_v32 = vmul.bf16 %v8075_v56, %v1538_v31  ;;  %v1573_v33 = vmul.bf16 %v8080_v53, %v1525_v30  ;;  %v1638_v30 = vrot.slane %v1633_v17, %v7577_v52  ;;  %v1645_v31 = vrot.slane %v1640_v19, %v7577_v52 }
 0x2ca   : >> { %v1513_v40 = vpop.permute.xlu0 %1512 }
 0x2cb   : >> { %v1909_v34 = vpop.permute.xlu1 %1908  ;;  %2327 = vmatprep.subr.bf16.mxu1 %v1573_v33 }
 0x2cc   : >> { %v1919_v39 = vsel %vm742_vm6, %v1907_v35, %v1909_v34  ;;  %v1932_v24 = vsel %vm742_vm6, %v1909_v34, %v1907_v35  ;;  %2328 = vmatpush1.bf16.msra.mxu1 %v1572_v32  ;;  %v6161_v34 = vcombine.low %v1702_v29, %v1702_v29  ;;  %v6893_v35 = vld [vmem:[%s7943_s6 + $0xa8] ss:$20 sps:$4 sm:$0xff]  }
 0x2cd   : >> { %v1966_v41 = vmul.bf16 %v8089_v16, %v1919_v39  ;;  %v1967_v38 = vmul.bf16 %v8092_v23, %v1932_v24 }
 0x2ce   : >> { %v1911_v8 = vpop.permute.xlu0 %1910 }
 0x2cf   : >> { %v1521_v44 = vpop.permute.xlu1 %1520  ;;  %2416 = vmatprep.subr.bf16.mxu0 %v1967_v38  ;;  %v6896_v38 = vld [vmem:[%s7943_s6 + $0xd4] ss:$20 sps:$4 sm:$0xff]  }
 0x2d0   : >> { %v1526_v47 = vsel %vm338_vm1, %v1521_v44, %v1513_v40  ;;  %v1542_v48 = vsel %vm338_vm1, %v1513_v40, %v1521_v44  ;;  %2417 = vmatpush1.bf16.msra.mxu0 %v1966_v41  ;;  %v6162_v41 = vcombine.high %v1702_v29, %v1702_v29 }
 0x2d1   : >> { %v1574_v58 = vmul.bf16 %v8075_v56, %v1542_v48  ;;  %v1575_v49 = vmul.bf16 %v8080_v53, %v1526_v47  ;;  %v1709_v47 = vshrl.u32 %v6161_v34, 16 }
 0x2d2   : >> { %v1515_v63 = vpop.permute.xlu0 %1514 }
 0x2d3   : >> { %v1913_v55 = vpop.permute.xlu1 %1912  ;;  %2329 = vmatprep.subr.bf16.mxu1 %v1575_v49  ;;  %v1717_v49 = vshrl.u32 %v6162_v41, 16  ;;  %v6902_v41 = vld [vmem:[%s7943_s6 + $0x124] ss:$20 sps:$4 sm:$0xff]  }
 0x2d4   : >> { %v1920_v45 = vsel %vm742_vm6, %v1911_v8, %v1913_v55  ;;  %v1936_v11 = vsel %vm742_vm6, %v1913_v55, %v1911_v8  ;;  %2330 = vmatpush1.bf16.msra.mxu1 %v1574_v58  ;;  %v2020_v8 = vld [vmem:[%s9278_s3 + $0x8] sm:$0x11] }
 0x2d5   : >> { %v1968_v12 = vmul.bf16 %v8089_v16, %v1920_v45  ;;  %v1969_v57 = vmul.bf16 %v8092_v23, %v1936_v11 }
 0x2d6   : >> { %v1915_v22 = vpop.permute.xlu0 %1914 }
 0x2d7   : >> { %v1523_v18 = vpop.permute.xlu1 %1522  ;;  %2418 = vmatprep.subr.bf16.mxu0 %v1969_v57  ;;  %v6898_v57 = vld [vmem:[%s7943_s6 + $0xd0] ss:$20 sps:$4 sm:$0xff]  }
 0x2d8   : >> { %v1527_v14 = vsel %vm338_vm1, %v1523_v18, %v1515_v63  ;;  %v1546_v1 = vsel %vm338_vm1, %v1515_v63, %v1523_v18  ;;  %2419 = vmatpush1.bf16.msra.mxu0 %v1968_v12  ;;  %v1710_v12 = vpack.i.b16 %v1709_v47, %v1709_v47  ;;  %v1718_v18 = vpack.i.b16 %v1717_v49, %v1717_v49  ;;  %v6899_v63 = vld [vmem:[%s7943_s6 + $0xfc] ss:$20 sps:$4 sm:$0xff]  }
 0x2d9   : >> { %v1576_v4 = vmul.bf16 %v8075_v56, %v1546_v1  ;;  %v1577_v3 = vmul.bf16 %v8080_v53, %v1527_v14 }
 0x2da   : >> { %v1587_v33 = vpop.permute.xlu0 %1586 }
 0x2db   : >> { %v1917_v20 = vpop.permute.xlu1 %1916  ;;  %2331 = vmatprep.subr.bf16.mxu1 %v1577_v3  ;;  %v6170_v3 = vcombine.high %v2020_v8, %v2020_v8 }
 0x2dc   : >> { %v1921_v26 = vsel %vm742_vm6, %v1915_v22, %v1917_v20  ;;  %v1940_v28 = vsel %vm742_vm6, %v1917_v20, %v1915_v22  ;;  %2332 = vmatpush1.bf16.msra.mxu1 %v1576_v4  ;;  %v6169_v4 = vcombine.low %v2020_v8, %v2020_v8  ;;  %v8144_v20 = vrot.slane %v1710_v12, %v7577_v52 }
 0x2dd   : >> { %v1970_v56 = vmul.bf16 %v8089_v16, %v1921_v26  ;;  %v1971_v53 = vmul.bf16 %v8092_v23, %v1940_v28  ;;  %v8149_v28 = vrot.slane %v1718_v18, %v7577_v52 }
 0x2de   : >> { %v1589_v23 = vpop.permute.xlu0 %1588 }
 0x2df   : >> { %v1595_v32 = vpop.permute.xlu1 %1594  ;;  %2420 = vmatprep.subr.bf16.mxu0 %v1971_v53  ;;  %v2027_v53 = vpack.i.b16 %v6169_v4, %v6169_v4 }
 0x2e0   : >> { %v1602_v39 = vsel %vm418_vm3, %v1595_v32, %v1587_v33  ;;  %v1612_v24 = vsel %vm418_vm3, %v1587_v33, %v1595_v32  ;;  %2421 = vmatpush1.bf16.msra.mxu0 %v1970_v56  ;;  %v2034_v32 = vpack.i.b16 %v6170_v3, %v6170_v3 }
 0x2e1   : >> { %v1646_v44 = vmul.bf16 %v1638_v30, %v1612_v24  ;;  %v1647_v16 = vmul.bf16 %v1645_v31, %v1602_v39 }
 0x2e2   : >> { %v1591_v11 = vpop.permute.xlu0 %1590 }
 0x2e3   : >> { %v1597_v40 = vpop.permute.xlu1 %1596  ;;  %2333 = vmatprep.subr.bf16.mxu1 %v1647_v16  ;;  %2423 = vmatmul.mubr.bf16.vlgmr.msra.gmra.mrb[0].mxu0 %v6893_v35  ;;  %v6901_v35 = vld [vmem:[%s7943_s6 + $0xf8] ss:$20 sps:$4 sm:$0xff]  }
 0x2e4   : >> { %v1603_v48 = vsel %vm418_vm3, %v1597_v40, %v1589_v23  ;;  %v1616_v58 = vsel %vm418_vm3, %v1589_v23, %v1597_v40  ;;  %2334 = vmatpush1.bf16.msra.mxu1 %v1646_v44  ;;  %2432 = vmatprep.mubr.bf16.mxu0 %v6896_v38 }
 0x2e5   : >> { %v1648_v43 = vmul.bf16 %v1638_v30, %v1616_v58  ;;  %v1649_v55 = vmul.bf16 %v1645_v31, %v1603_v48 }
 0x2e6   : >> { %v1593_v19 = vpop.permute.xlu0 %1592 }
 0x2e7   : >> { %v1599_v45 = vpop.permute.xlu1 %1598  ;;  %2335 = vmatprep.subr.bf16.mxu1 %v1649_v55  ;;  %v6904_v55 = vld [vmem:[%s7943_s6 + $0x120] ss:$20 sps:$4 sm:$0xff]  }
 0x2e8   : >> { %v1604_v60 = vsel %vm418_vm3, %v1599_v45, %v1591_v11  ;;  %v1620_v7 = vsel %vm418_vm3, %v1591_v11, %v1599_v45  ;;  %2336 = vmatpush1.bf16.msra.mxu1 %v1648_v43 }
 0x2e9   : >> { %v1650_v14 = vmul.bf16 %v1638_v30, %v1620_v7  ;;  %v1651_v1 = vmul.bf16 %v1645_v31, %v1604_v60 }
 0x2ea   : >> { %v1663_v34 = vpop.permute.xlu0 %1662 }
 0x2eb   : >> { %v1601_v17 = vpop.permute.xlu1 %1600  ;;  %2337 = vmatprep.subr.bf16.mxu1 %v1651_v1  ;;  %2433 = vmatmul.mubr.bf16.gmra.mrb[4].mxu0 %v6898_v57 }
 0x2ec   : >> { %v1605_v22 = vsel %vm418_vm3, %v1601_v17, %v1593_v19  ;;  %v1624_v26 = vsel %vm418_vm3, %v1593_v19, %v1601_v17  ;;  %2338 = vmatpush1.bf16.msra.mxu1 %v1650_v14  ;;  %2442 = vmatprep.mubr.bf16.mxu0 %v6899_v63 }
 0x2ed   : >> { %v1652_v29 = vmul.bf16 %v1638_v30, %v1624_v26  ;;  %v1653_v56 = vmul.bf16 %v1645_v31, %v1605_v22  ;;  %v8158_v30 = vrot.slane %v2027_v53, %v7466_v15  ;;  %v8161_v31 = vrot.slane %v2034_v32, %v7466_v15 }
 0x2ee   : >> { %v1981_v40 = vpop.permute.xlu0 %1980 }
 0x2ef   : >> { %v1671_v33 = vpop.permute.xlu1 %1670  ;;  %2339 = vmatprep.subr.bf16.mxu1 %v1653_v56 }
 0x2f0   : >> { %v1678_v39 = vsel %vm496_vm5, %v1671_v33, %v1663_v34  ;;  %v1688_v24 = vsel %vm496_vm5, %v1663_v34, %v1671_v33  ;;  %2340 = vmatpush1.bf16.msra.mxu1 %v1652_v29 }
 0x2f1   : >> { %v1724_v38 = vmul.bf16 %v8144_v20, %v1688_v24  ;;  %v1725_v44 = vmul.bf16 %v8149_v28, %v1678_v39 }
 0x2f2   : >> { %v1665_v43 = vpop.permute.xlu0 %1664 }
 0x2f3   : >> { %v1983_v16 = vpop.permute.xlu1 %1982  ;;  %2341 = vmatprep.subr.bf16.mxu1 %v1725_v44  ;;  %2443 = vmatmul.mubr.bf16.gmra.mrb[8].mxu0 %v6901_v35 }
 0x2f4   : >> { %v1996_v23 = vsel %vm822_vm7, %v1981_v40, %v1983_v16  ;;  %v2006_v47 = vsel %vm822_vm7, %v1983_v16, %v1981_v40  ;;  %2342 = vmatpush1.bf16.msra.mxu1 %v1724_v38  ;;  %2452 = vmatprep.mubr.bf16.mxu0 %v6902_v41  ;;  %v6905_v40 = vld [vmem:[%s7943_s6 + $0xa0] ss:$20 sps:$4 sm:$0xff]  }
 0x2f5   : >> { %v2040_v48 = vmul.bf16 %v8158_v30, %v1996_v23  ;;  %v2041_v58 = vmul.bf16 %v8161_v31, %v2006_v47 }
 0x2f6   : >> { %v1985_v60 = vpop.permute.xlu0 %1984 }
 0x2f7   : >> { %v1673_v49 = vpop.permute.xlu1 %1672  ;;  %2463 = vmatprep.subr.bf16.mxu0 %v2041_v58 }
 0x2f8   : >> { %v1679_v8 = vsel %vm496_vm5, %v1673_v49, %v1665_v43  ;;  %v1692_v45 = vsel %vm496_vm5, %v1665_v43, %v1673_v49  ;;  %2464 = vmatpush1.bf16.msra.mxu0 %v2040_v48  ;;  %v6909_v48 = vld [vmem:[%s7943_s6 + $0xcc] ss:$20 sps:$4 sm:$0xff]   ;;  %v6911_v49 = vld [vmem:[%s7943_s6 + $0xc8] ss:$20 sps:$4 sm:$0xff]  }
 0x2f9   : >> { %v1726_v11 = vmul.bf16 %v8144_v20, %v1692_v45  ;;  %v1727_v12 = vmul.bf16 %v8149_v28, %v1679_v8  ;;  %v6913_v43 = vld [vmem:[%s7943_s6 + $0xf4] ss:$20 sps:$4 sm:$0xff]   ;;  %v6919_v45 = vld [vmem:[%s7943_s6 + $0x118] ss:$20 sps:$4 sm:$0xff]  }
 0x2fa   : >> { %v1667_v4 = vpop.permute.xlu0 %1666  ;;  %v6916_v8 = vld [vmem:[%s7943_s6 + $0x100] ss:$20 sps:$4 sm:$0xff]  }
 0x2fb   : >> { %v1987_v57 = vpop.permute.xlu1 %1986  ;;  %2343 = vmatprep.subr.bf16.mxu1 %v1727_v12  ;;  %2453 = vmatmul.mubr.bf16.gmra.mrb[12].mxu0 %v6904_v55  ;;  %v6912_v55 = vld [vmem:[%s7943_s6 + $0xd8] ss:$20 sps:$4 sm:$0xff]  }
 0x2fc   : >> { %v1997_v7 = vsel %vm822_vm7, %v1985_v60, %v1987_v57  ;;  %v2010_v18 = vsel %vm822_vm7, %v1987_v57, %v1985_v60  ;;  %2344 = vmatpush1.bf16.msra.mxu1 %v1726_v11  ;;  %2495 = vmatprep.mubr.bf16.mxu0 %v7250_v27  ;;  %v6920_v11 = vld [vmem:[%s7943_s6 + $0x128] ss:$20 sps:$4 sm:$0xff]  }
 0x2fd   : >> { %v2042_v63 = vmul.bf16 %v8158_v30, %v1997_v7  ;;  %v2043_v14 = vmul.bf16 %v8161_v31, %v2010_v18 }
 0x2fe   : >> { %v1989_v29 = vpop.permute.xlu0 %1988 }
 0x2ff   : >> { %v1675_v1 = vpop.permute.xlu1 %1674  ;;  %2465 = vmatprep.subr.bf16.mxu0 %v2043_v14 }
 0x300   : >> { %v1680_v3 = vsel %vm496_vm5, %v1675_v1, %v1667_v4  ;;  %v1696_v17 = vsel %vm496_vm5, %v1667_v4, %v1675_v1  ;;  %2466 = vmatpush1.bf16.msra.mxu0 %v2042_v63 }
 0x301   : >> { %v1728_v19 = vmul.bf16 %v8144_v20, %v1696_v17  ;;  %v1729_v22 = vmul.bf16 %v8149_v28, %v1680_v3 }
 0x302   : >> { %v1669_v35 = vpop.permute.xlu0 %1668 }
 0x303   : >> { %v1991_v26 = vpop.permute.xlu1 %1990  ;;  %2345 = vmatprep.subr.bf16.mxu1 %v1729_v22 }
 0x304   : >> { %v1998_v56 = vsel %vm822_vm7, %v1989_v29, %v1991_v26  ;;  %v2014_v53 = vsel %vm822_vm7, %v1991_v26, %v1989_v29  ;;  %2346 = vmatpush1.bf16.msra.mxu1 %v1728_v19 }
 0x305   : >> { %v2044_v32 = vmul.bf16 %v8158_v30, %v1998_v56  ;;  %v2045_v33 = vmul.bf16 %v8161_v31, %v2014_v53 }
 0x306   : >> { %v1993_v16 = vpop.permute.xlu0 %1992 }
 0x307   : >> { %v1677_v34 = vpop.permute.xlu1 %1676  ;;  %2467 = vmatprep.subr.bf16.mxu0 %v2045_v33 }
 0x308   : >> { %2468 = vmatpush1.bf16.msra.mxu0 %v2044_v32  ;;  %v1681_v39 = vsel %vm496_vm5, %v1677_v34, %v1669_v35  ;;  %v1700_v24 = vsel %vm496_vm5, %v1669_v35, %v1677_v34 }
 0x309   : >> { %v1730_v41 = vmul.bf16 %v8144_v20, %v1700_v24  ;;  %v1731_v38 = vmul.bf16 %v8149_v28, %v1681_v39  ;;  %v6908_v28 = vld [vmem:[%s7943_s6 + $0xb0] ss:$20 sps:$4 sm:$0xff]  }
 0x30b   : >> { %v1995_v44 = vpop.permute.xlu1 %1994  ;;  %2347 = vmatprep.subr.bf16.mxu1 %v1731_v38 }
 0x30c   : >> { %v1999_v23 = vsel %vm822_vm7, %v1993_v16, %v1995_v44  ;;  %v2018_v47 = vsel %vm822_vm7, %v1995_v44, %v1993_v16  ;;  %2348 = vmatpush1.bf16.msra.mxu1 %v1730_v41 }
 0x30d   : >> { %v2046_v58 = vmul.bf16 %v8158_v30, %v1999_v23  ;;  %v2047_v20 = vmul.bf16 %v8161_v31, %v2018_v47  ;;  %v6915_v30 = vld [vmem:[%s7943_s6 + $0xf0] ss:$20 sps:$4 sm:$0xff]  }
 0x30e   : >> { %v6917_v31 = vld [vmem:[%s7943_s6 + $0x11c] ss:$20 sps:$4 sm:$0xff]  }
 0x30f   : >> { %2350 = vmatmul.mubr.bf16.vlgmr.msra.gmra.mrb[0].mxu1 %v6905_v40  ;;  %2469 = vmatprep.subr.bf16.mxu0 %v2047_v20 }
 0x310   : >> { %2470 = vmatpush1.bf16.msra.mxu0 %v2046_v58  ;;  %2359 = vmatprep.mubr.bf16.mxu1 %v6909_v48 }
 0x313   : >> { %6225 = vmatmul.mubr.msk.bf16.vlgmr.msra.gmra.mrb[0].mxu0 %vm1128_vm8, %v6908_v28 }
 0x314   : >> { %2505 = vmatprep.mubr.bf16.mxu0 %v7250_v27 }
 0x317   : >> { %2360 = vmatmul.mubr.bf16.gmra.mrb[4].mxu1 %v6911_v49 }
 0x318   : >> { %2369 = vmatprep.mubr.bf16.mxu1 %v6913_v43 }
 0x31b   : >> { %6226 = vmatmul.mubr.msk.bf16.gmra.mrb[4].mxu0 %vm1128_vm8, %v6912_v55  ;;  %v2168_v12 = vpop.permute.xlu0 %2167 }
 0x31c   : >> { %2515 = vmatprep.mubr.bf16.mxu0 %v7250_v27  ;;  %v2173_v63 = vpop.permute.xlu1 %2172 }
 0x31f   : >> { %2370 = vmatmul.mubr.bf16.gmra.mrb[8].mxu1 %v6915_v30  ;;  %v2183_v40 = vpop.permute.xlu0 %2182 }
 0x320   : >> { %2379 = vmatprep.mubr.bf16.mxu1 %v6917_v31  ;;  %v2178_v56 = vpop.permute.xlu1 %2177 }
 0x323   : >> { %6227 = vmatmul.mubr.msk.bf16.gmra.mrb[8].mxu0 %vm1128_vm8, %v6916_v8 }
 0x324   : >> { %2525 = vmatprep.mubr.bf16.mxu0 %v7250_v27 }
 0x327   : >> { %2380 = vmatmul.mubr.bf16.gmra.mrb[12].mxu1 %v6919_v45 }
 0x32b   : >> { %6228 = vmatmul.mubr.msk.bf16.gmra.mrb[12].mxu0 %vm1128_vm8, %v6920_v11 }
 0x3e2   : >> { %v2351_v57 = vpop.f32.mrb[0].mxu1 }
 0x3e3   : >> { %v2352_v60 = vadd.f32 %v2351_v57, %v2168_v12  ;;  %v2353_v7 = vpop.f32.mrb[1].mxu1 }
 0x3e4   : >> { %v2354_v18 = vadd.f32 %v2353_v7, %v2168_v12  ;;  %v2355_v14 = vpop.f32.mrb[2].mxu1  ;;  %v2188_v12 = vpop.permute.xlu1 %2187 }
 0x3e5   : >> { %v2357_v1 = vpop.f32.mrb[3].mxu1  ;;  %v2356_v3 = vadd.f32 %v2355_v14, %v2173_v63 }
 0x3e6   : >> { %v2497_v4 = vpop.f32.mrb[0].mxu0  ;;  %v2358_v22 = vadd.f32 %v2357_v1, %v2173_v63 }
 0x3e7   : >> { %v6494_v17 = vadd.f32 %v2497_v4, %v2352_v60  ;;  %v2499_v19 = vpop.f32.mrb[1].mxu0 }
 0x3e8   : >> { %v6496_v26 = vadd.f32 %v2499_v19, %v2354_v18  ;;  %v2501_v29 = vpop.f32.mrb[2].mxu0 }
 0x3e9   : >> { %v6498_v53 = vadd.f32 %v2501_v29, %v2356_v3  ;;  %v2503_v32 = vpop.f32.mrb[3].mxu0  ;;  %v2536_v35 = vmax.f32 %v6494_v17, 0.0 }
 0x3ea   : >> { %v6500_v33 = vadd.f32 %v2503_v32, %v2358_v22  ;;  %v2361_v34 = vpop.f32.mrb[4].mxu1  ;;  %v2537_v38 = vmax.f32 %v6496_v26, 0.0  ;;  %v2193_v22 = vpop.permute.xlu0 %2192 }
 0x3eb   : >> { %v2538_v39 = vmax.f32 %v6498_v53, 0.0  ;;  %v2362_v24 = vadd.f32 %v2361_v34, %v2178_v56  ;;  %v2363_v41 = vpop.f32.mrb[5].mxu1 }
 0x3ec   : >> { %v2539_v44 = vmax.f32 %v6500_v33, 0.0  ;;  %v2364_v16 = vadd.f32 %v2363_v41, %v2178_v56  ;;  %v2365_v23 = vpop.f32.mrb[6].mxu1 }
 0x3ed   : >> { %v8211_v47 = vpack.c.bf16 %v2538_v39, %v2536_v35  ;;  %v2367_v48 = vpop.f32.mrb[7].mxu1  ;;  %v2366_v28 = vadd.f32 %v2365_v23, %v2183_v40  ;;  %v2198_v23 = vpop.permute.xlu1 %2197 }
 0x3ee   : >> { %v8213_v58 = vpack.c.bf16 %v2539_v44, %v2537_v38  ;;  %v2507_v20 = vpop.f32.mrb[4].mxu0  ;;  %v2368_v55 = vadd.f32 %v2367_v48, %v2183_v40 }
 0x3ef   : >> { %v6502_v49 = vadd.f32 %v2507_v20, %v2362_v24  ;;  %v2509_v43 = vpop.f32.mrb[5].mxu0  ;;  %2593 = vrot.lane.b32.xlu0 %v8211_v47, %s7243_s26 }
 0x3f0   : >> { %v6504_v30 = vadd.f32 %v2509_v43, %v2364_v16  ;;  %v2511_v31 = vpop.f32.mrb[6].mxu0  ;;  %2581 = vrot.lane.b32.xlu1 %v8213_v58, %s7243_s26 }
 0x3f1   : >> { %v6506_v8 = vadd.f32 %v2511_v31, %v2366_v28  ;;  %v2513_v45 = vpop.f32.mrb[7].mxu0  ;;  %v2540_v60 = vmax.f32 %v6502_v49, 0.0 }
 0x3f2   : >> { %v6508_v11 = vadd.f32 %v2513_v45, %v2368_v55  ;;  %v2371_v57 = vpop.f32.mrb[8].mxu1  ;;  %v2541_v14 = vmax.f32 %v6504_v30, 0.0  ;;  %v2203_v30 = vpop.permute.xlu0 %2202 }
 0x3f3   : >> { %v2542_v7 = vmax.f32 %v6506_v8, 0.0  ;;  %v2372_v18 = vadd.f32 %v2371_v57, %v2188_v12  ;;  %v2373_v63 = vpop.f32.mrb[9].mxu1 }
 0x3f4   : >> { %v2543_v1 = vmax.f32 %v6508_v11, 0.0  ;;  %v2375_v4 = vpop.f32.mrb[10].mxu1  ;;  %v2374_v26 = vadd.f32 %v2373_v63, %v2188_v12 }
 0x3f5   : >> { %v8219_v3 = vpack.c.bf16 %v2542_v7, %v2540_v60  ;;  %v2377_v17 = vpop.f32.mrb[11].mxu1  ;;  %v2376_v56 = vadd.f32 %v2375_v4, %v2193_v22 }
 0x3f6   : >> { %v8221_v19 = vpack.c.bf16 %v2543_v1, %v2541_v14  ;;  %v2517_v29 = vpop.f32.mrb[8].mxu0  ;;  %v2378_v33 = vadd.f32 %v2377_v17, %v2193_v22 }
 0x3f7   : >> { %v6510_v53 = vadd.f32 %v2517_v29, %v2372_v18  ;;  %v2519_v32 = vpop.f32.mrb[9].mxu0  ;;  %2595 = vrot.lane.b32.xlu0 %v8219_v3, %s7243_s26 }
 0x3f8   : >> { %v6512_v34 = vadd.f32 %v2519_v32, %v2374_v26  ;;  %v2521_v35 = vpop.f32.mrb[10].mxu0  ;;  %2583 = vrot.lane.b32.xlu1 %v8221_v19, %s7243_s26  ;;  %v2625_v32 = vld [vmem:[%s9278_s3] sm:$0x11] }
 0x3f9   : >> { %v6514_v39 = vadd.f32 %v2521_v35, %v2376_v56  ;;  %v2523_v24 = vpop.f32.mrb[11].mxu0  ;;  %v2544_v44 = vmax.f32 %v6510_v53, 0.0  ;;  %v6933_v53 = vld [vmem:[%s7943_s6 + $0x144] ss:$20 sps:$4 sm:$0xff]  }
 0x3fa   : >> { %v6516_v41 = vadd.f32 %v2523_v24, %v2378_v33  ;;  %v2381_v38 = vpop.f32.mrb[12].mxu1  ;;  %v2545_v48 = vmax.f32 %v6512_v34, 0.0  ;;  %3502 = vmatprep.mubr.bf16.mxu1 %v6933_v53  ;;  %v6229_v33 = vcombine.low %v2625_v32, %v2625_v32  ;;  %v6230_v34 = vcombine.high %v2625_v32, %v2625_v32  ;;  %v6271_v32 = vld [vmem:[%s8049_s5 + $0x80] sm:$0xff] }
 0x3fb   : >> { %v2546_v16 = vmax.f32 %v6514_v39, 0.0  ;;  %v2383_v40 = vpop.f32.mrb[13].mxu1  ;;  %v2382_v43 = vadd.f32 %v2381_v38, %v2198_v23 }
 0x3fc   : >> { %v2547_v20 = vmax.f32 %v6516_v41, 0.0  ;;  %v2385_v28 = vpop.f32.mrb[14].mxu1  ;;  %v2384_v8 = vadd.f32 %v2383_v40, %v2198_v23  ;;  %v2632_v35 = vpack.i.b16 %v6229_v33, %v6229_v33  ;;  %v2639_v39 = vpack.i.b16 %v6230_v34, %v6230_v34 }
 0x3fd   : >> { %v8227_v49 = vpack.c.bf16 %v2546_v16, %v2544_v44  ;;  %v2387_v55 = vpop.f32.mrb[15].mxu1  ;;  %v2386_v11 = vadd.f32 %v2385_v28, %v2203_v30 }
 0x3fe   : >> { %v8229_v31 = vpack.c.bf16 %v2547_v20, %v2545_v48  ;;  %v2527_v45 = vpop.f32.mrb[12].mxu0  ;;  %v2388_v60 = vadd.f32 %v2387_v55, %v2203_v30  ;;  %v8336_v24 = vrot.slane %v2632_v35, %v7466_v15  ;;  %v2644_v41 = vrot.slane %v2639_v39, %v7466_v15 }
 0x3ff   : >> { %v6518_v12 = vadd.f32 %v2527_v45, %v2382_v43  ;;  %v2529_v57 = vpop.f32.mrb[13].mxu0  ;;  %2597 = vrot.lane.b32.xlu0 %v8227_v49, %s7243_s26  ;;  %v2701_v45 = vld [vmem:[%s9278_s3] sm:$0x11] }
 0x400   : >> { %v6520_v7 = vadd.f32 %v2529_v57, %v2384_v8  ;;  %v2531_v18 = vpop.f32.mrb[14].mxu0  ;;  %2585 = vrot.lane.b32.xlu1 %v8229_v31, %s7243_s26 }
 0x401   : >> { %v6522_v63 = vadd.f32 %v2531_v18, %v2386_v11  ;;  %v2533_v14 = vpop.f32.mrb[15].mxu0  ;;  %v2548_v4 = vmax.f32 %v6518_v12, 0.0  ;;  %v6231_v11 = vcombine.low %v2701_v45, %v2701_v45  ;;  %v6232_v12 = vcombine.high %v2701_v45, %v2701_v45  ;;  %v2779_v45 = vld [vmem:[%s9278_s3] sm:$0x22] }
 0x402   : >> { %v6524_v1 = vadd.f32 %v2533_v14, %v2388_v60  ;;  %v2549_v22 = vmax.f32 %v6520_v7, 0.0 }
 0x403   : >> { %v2550_v17 = vmax.f32 %v6522_v63, 0.0 }
 0x404   : >> { %v2551_v26 = vmax.f32 %v6524_v1, 0.0  ;;  %v2708_v1 = vshrl.u32 %v6231_v11, 16 }
 0x405   : >> { %v8235_v29 = vpack.c.bf16 %v2550_v17, %v2548_v4  ;;  %v2716_v4 = vshrl.u32 %v6232_v12, 16  ;;  %v6272_v17 = vld [vmem:[%s8049_s5 + $0x88] sm:$0xff] }
 0x406   : >> { %v8237_v56 = vpack.c.bf16 %v2551_v26, %v2549_v22  ;;  %v2709_v22 = vpack.i.b16 %v2708_v1, %v2708_v1 }
 0x407   : >> { %2599 = vrot.lane.b32.xlu0 %v8235_v29, %s7243_s26  ;;  %v2717_v26 = vpack.i.b16 %v2716_v4, %v2716_v4  ;;  %v6277_v4 = vld [vmem:[%s8049_s5 + $0xb0] sm:$0xff] }
 0x408   : >> { %2587 = vrot.lane.b32.xlu1 %v8237_v56, %s7243_s26 }
 0x40b   : >> { %2669 = vrot.lane.b32.xlu0 %v8211_v47, %s7245_s28 }
 0x40c   : >> { %2661 = vrot.lane.b32.xlu1 %v8213_v58, %s7245_s28 }
 0x40f   : >> { %2671 = vrot.lane.b32.xlu0 %v8219_v3, %s7245_s28 }
 0x410   : >> { %2663 = vrot.lane.b32.xlu1 %v8221_v19, %s7245_s28 }
 0x413   : >> { %2673 = vrot.lane.b32.xlu0 %v8227_v49, %s7245_s28 }
 0x414   : >> { %2665 = vrot.lane.b32.xlu1 %v8229_v31, %s7245_s28 }
 0x417   : >> { %2675 = vrot.lane.b32.xlu0 %v8235_v29, %s7245_s28 }
 0x418   : >> { %2667 = vrot.lane.b32.xlu1 %v8237_v56, %s7245_s28 }
 0x41b   : >> { %2747 = vrot.lane.b32.xlu0 %v8211_v47, %s7247_s30 }
 0x41c   : >> { %2739 = vrot.lane.b32.xlu1 %v8213_v58, %s7247_s30 }
 0x41f   : >> { %2749 = vrot.lane.b32.xlu0 %v8219_v3, %s7247_s30 }
 0x420   : >> { %2741 = vrot.lane.b32.xlu1 %v8221_v19, %s7247_s30 }
 0x423   : >> { %2751 = vrot.lane.b32.xlu0 %v8227_v49, %s7247_s30 }
 0x424   : >> { %2743 = vrot.lane.b32.xlu1 %v8229_v31, %s7247_s30 }
 0x427   : >> { %2753 = vrot.lane.b32.xlu0 %v8235_v29, %s7247_s30 }
 0x428   : >> { %2745 = vrot.lane.b32.xlu1 %v8237_v56, %s7247_s30 }
 0x42b   : >> { %2823 = vrot.lane.b32.xlu0 %v8211_v47, %s7248_s8 }
 0x42c   : >> { %2815 = vrot.lane.b32.xlu1 %v8213_v58, %s7248_s8 }
 0x42f   : >> { %2825 = vrot.lane.b32.xlu0 %v8219_v3, %s7248_s8 }
 0x430   : >> { %2817 = vrot.lane.b32.xlu1 %v8221_v19, %s7248_s8 }
 0x433   : >> { %2827 = vrot.lane.b32.xlu0 %v8227_v49, %s7248_s8 }
 0x434   : >> { %2819 = vrot.lane.b32.xlu1 %v8229_v31, %s7248_s8 }
 0x437   : >> { %2829 = vrot.lane.b32.xlu0 %v8235_v29, %s7248_s8 }
 0x438   : >> { %2821 = vrot.lane.b32.xlu1 %v8237_v56, %s7248_s8 }
 0x43b   : >> { %2903 = vrot.lane.b32.xlu0 %v8213_v58, %s7242_s24 }
 0x43c   : >> { %2901 = vrot.lane.b32.xlu1 %v8211_v47, %s7242_s24 }
 0x43f   : >> { %2907 = vrot.lane.b32.xlu0 %v8221_v19, %s7242_s24 }
 0x440   : >> { %2905 = vrot.lane.b32.xlu1 %v8219_v3, %s7242_s24 }
 0x443   : >> { %2911 = vrot.lane.b32.xlu0 %v8229_v31, %s7242_s24 }
 0x444   : >> { %2909 = vrot.lane.b32.xlu1 %v8227_v49, %s7242_s24 }
 0x447   : >> { %2915 = vrot.lane.b32.xlu0 %v8237_v56, %s7242_s24 }
 0x448   : >> { %2913 = vrot.lane.b32.xlu1 %v8235_v29, %s7242_s24 }
 0x44b   : >> { %2981 = vrot.lane.b32.xlu0 %v8213_v58, %s7244_s27 }
 0x44c   : >> { %2979 = vrot.lane.b32.xlu1 %v8211_v47, %s7244_s27 }
 0x44f   : >> { %2985 = vrot.lane.b32.xlu0 %v8221_v19, %s7244_s27 }
 0x450   : >> { %2983 = vrot.lane.b32.xlu1 %v8219_v3, %s7244_s27 }
 0x453   : >> { %2989 = vrot.lane.b32.xlu0 %v8229_v31, %s7244_s27 }
 0x454   : >> { %2987 = vrot.lane.b32.xlu1 %v8227_v49, %s7244_s27 }
 0x457   : >> { %2993 = vrot.lane.b32.xlu0 %v8237_v56, %s7244_s27 }
 0x458   : >> { %2991 = vrot.lane.b32.xlu1 %v8235_v29, %s7244_s27 }
 0x45b   : >> { %3057 = vrot.lane.b32.xlu0 %v8213_v58, %s7246_s29 }
 0x45c   : >> { %3055 = vrot.lane.b32.xlu1 %v8211_v47, %s7246_s29 }
 0x45f   : >> { %3061 = vrot.lane.b32.xlu0 %v8221_v19, %s7246_s29 }
 0x460   : >> { %3059 = vrot.lane.b32.xlu1 %v8219_v3, %s7246_s29 }
 0x461   : >> { %v2594_v38 = vpop.permute.xlu0 %2593 }
 0x462   : >> { %v2582_v44 = vpop.permute.xlu1 %2581 }
 0x463   : >> { %v2601_v16 = vsel %vm260_vm0, %v2594_v38, %v2582_v44  ;;  %v2611_v40 = vsel %vm260_vm0, %v2582_v44, %v2594_v38  ;;  %3065 = vrot.lane.b32.xlu0 %v8229_v31, %s7246_s29  ;;  %v2714_v44 = vrot.slane %v2709_v22, %v7466_v15 }
 0x464   : >> { %v2645_v23 = vmul.bf16 %v8336_v24, %v2611_v40  ;;  %v2646_v48 = vmul.bf16 %v2644_v41, %v2601_v16  ;;  %3063 = vrot.lane.b32.xlu1 %v8227_v49, %s7246_s29  ;;  %v2722_v16 = vrot.slane %v2717_v26, %v7466_v15  ;;  %v6274_v40 = vld [vmem:[%s8049_s5 + $0x98] sm:$0xff] }
 0x466   : >> { %3470 = vmatprep.subr.bf16.mxu1 %v2646_v48  ;;  %v6273_v48 = vld [vmem:[%s8049_s5 + $0x90] sm:$0xff] }
 0x467   : >> { %3069 = vrot.lane.b32.xlu0 %v8237_v56, %s7246_s29  ;;  %3471 = vmatpush1.bf16.msra.mxu1 %v2645_v23 }
 0x468   : >> { %3067 = vrot.lane.b32.xlu1 %v8235_v29, %s7246_s29 }
 0x469   : >> { %v2596_v20 = vpop.permute.xlu0 %2595 }
 0x46a   : >> { %v2584_v28 = vpop.permute.xlu1 %2583 }
 0x46b   : >> { %v2602_v43 = vsel %vm260_vm0, %v2596_v20, %v2584_v28  ;;  %v2615_v55 = vsel %vm260_vm0, %v2584_v28, %v2596_v20  ;;  %3135 = vrot.lane.b32.xlu0 %v8213_v58, %s7249_s9 }
 0x46c   : >> { %v2647_v30 = vmul.bf16 %v8336_v24, %v2615_v55  ;;  %v2648_v8 = vmul.bf16 %v2644_v41, %v2602_v43  ;;  %3133 = vrot.lane.b32.xlu1 %v8211_v47, %s7249_s9  ;;  %v6276_v55 = vld [vmem:[%s8049_s5 + $0xa8] sm:$0xff] }
 0x46e   : >> { %3472 = vmatprep.subr.bf16.mxu1 %v2648_v8  ;;  %v6275_v8 = vld [vmem:[%s8049_s5 + $0xa0] sm:$0xff] }
 0x46f   : >> { %3139 = vrot.lane.b32.xlu0 %v8221_v19, %s7249_s9  ;;  %3473 = vmatpush1.bf16.msra.mxu1 %v2647_v30 }
 0x470   : >> { %3137 = vrot.lane.b32.xlu1 %v8219_v3, %s7249_s9 }
 0x471   : >> { %v2598_v57 = vpop.permute.xlu0 %2597 }
 0x472   : >> { %v2586_v60 = vpop.permute.xlu1 %2585 }
 0x473   : >> { %v2603_v7 = vsel %vm260_vm0, %v2598_v57, %v2586_v60  ;;  %v2619_v18 = vsel %vm260_vm0, %v2586_v60, %v2598_v57  ;;  %3143 = vrot.lane.b32.xlu0 %v8229_v31, %s7249_s9 }
 0x474   : >> { %v2649_v63 = vmul.bf16 %v8336_v24, %v2619_v18  ;;  %v2650_v14 = vmul.bf16 %v2644_v41, %v2603_v7  ;;  %3141 = vrot.lane.b32.xlu1 %v8227_v49, %s7249_s9  ;;  %v6278_v18 = vld [vmem:[%s8049_s5 + $0xb8] sm:$0xff] }
 0x476   : >> { %3474 = vmatprep.subr.bf16.mxu1 %v2650_v14  ;;  %v6234_v14 = vcombine.high %v2779_v45, %v2779_v45 }
 0x477   : >> { %3147 = vrot.lane.b32.xlu0 %v8237_v56, %s7249_s9  ;;  %3475 = vmatpush1.bf16.msra.mxu1 %v2649_v63  ;;  %v6233_v63 = vcombine.low %v2779_v45, %v2779_v45 }
 0x478   : >> { %3145 = vrot.lane.b32.xlu1 %v8235_v29, %s7249_s9 }
 0x479   : >> { %v2600_v53 = vpop.permute.xlu0 %2599 }
 0x47a   : >> { %v2588_v33 = vpop.permute.xlu1 %2587 }
 0x47b   : >> { %v2604_v34 = vsel %vm260_vm0, %v2600_v53, %v2588_v33  ;;  %v2623_v35 = vsel %vm260_vm0, %v2588_v33, %v2600_v53  ;;  %3325 = vperm.xlu0 %6875, %v6272_v17   ;;  %v2786_v33 = vpack.i.b16 %v6233_v63, %v6233_v63 }
 0x47c   : >> { %v2651_v39 = vmul.bf16 %v8336_v24, %v2623_v35  ;;  %v2652_v38 = vmul.bf16 %v2644_v41, %v2604_v34  ;;  %3320 = vperm.xlu1 %6876, %v6271_v32   ;;  %v2793_v34 = vpack.i.b16 %v6234_v14, %v6234_v14 }
 0x47d   : >> { %v2670_v23 = vpop.permute.xlu0 %2669 }
 0x47e   : >> { %v2662_v20 = vpop.permute.xlu1 %2661  ;;  %3476 = vmatprep.subr.bf16.mxu1 %v2652_v38 }
 0x47f   : >> { %v2677_v28 = vsel %vm338_vm1, %v2670_v23, %v2662_v20  ;;  %v2687_v43 = vsel %vm338_vm1, %v2662_v20, %v2670_v23  ;;  %3335 = vperm.xlu0 %6875, %v6274_v40   ;;  %3477 = vmatpush1.bf16.msra.mxu1 %v2651_v39  ;;  %v2791_v20 = vrot.slane %v2786_v33, %v7577_v52 }
 0x480   : >> { %v2723_v24 = vmul.bf16 %v2714_v44, %v2687_v43  ;;  %v2724_v41 = vmul.bf16 %v2722_v16, %v2677_v28  ;;  %3330 = vperm.xlu1 %6876, %v6273_v48   ;;  %v2798_v28 = vrot.slane %v2793_v34, %v7577_v52 }
 0x481   : >> { %v2672_v30 = vpop.permute.xlu0 %2671 }
 0x482   : >> { %v2664_v11 = vpop.permute.xlu1 %2663  ;;  %3478 = vmatprep.subr.bf16.mxu1 %v2724_v41 }
 0x483   : >> { %v2678_v12 = vsel %vm338_vm1, %v2672_v30, %v2664_v11  ;;  %v2691_v57 = vsel %vm338_vm1, %v2664_v11, %v2672_v30  ;;  %3345 = vperm.xlu0 %6875, %v6276_v55   ;;  %3479 = vmatpush1.bf16.msra.mxu1 %v2723_v24  ;;  %v2855_v24 = vld [vmem:[%s9278_s3] sm:$0x22] }
 0x484   : >> { %v2725_v60 = vmul.bf16 %v2714_v44, %v2691_v57  ;;  %v2726_v7 = vmul.bf16 %v2722_v16, %v2678_v12  ;;  %3340 = vperm.xlu1 %6876, %v6275_v8  }
 0x485   : >> { %v2674_v1 = vpop.permute.xlu0 %2673 }
 0x486   : >> { %v2666_v17 = vpop.permute.xlu1 %2665  ;;  %3480 = vmatprep.subr.bf16.mxu1 %v2726_v7 }
 0x487   : >> { %v2679_v22 = vsel %vm338_vm1, %v2674_v1, %v2666_v17  ;;  %v2695_v26 = vsel %vm338_vm1, %v2666_v17, %v2674_v1  ;;  %3355 = vperm.xlu0 %6875, %v6278_v18   ;;  %3481 = vmatpush1.bf16.msra.mxu1 %v2725_v60 }
 0x488   : >> { %v2727_v53 = vmul.bf16 %v2714_v44, %v2695_v26  ;;  %v2728_v32 = vmul.bf16 %v2722_v16, %v2679_v22  ;;  %3350 = vperm.xlu1 %6876, %v6277_v4  }
 0x489   : >> { %v2676_v35 = vpop.permute.xlu0 %2675 }
 0x48a   : >> { %v2668_v39 = vpop.permute.xlu1 %2667  ;;  %3482 = vmatprep.subr.bf16.mxu1 %v2728_v32 }
 0x48b   : >> { %v2680_v38 = vsel %vm338_vm1, %v2676_v35, %v2668_v39  ;;  %v2699_v40 = vsel %vm338_vm1, %v2668_v39, %v2676_v35  ;;  %3483 = vmatpush1.bf16.msra.mxu1 %v2727_v53 }
 0x48c   : >> { %v2729_v23 = vmul.bf16 %v2714_v44, %v2699_v40  ;;  %v2730_v48 = vmul.bf16 %v2722_v16, %v2680_v38  ;;  %v6235_v44 = vcombine.low %v2855_v24, %v2855_v24  ;;  %v6236_v16 = vcombine.high %v2855_v24, %v2855_v24 }
 0x48d   : >> { %v2748_v43 = vpop.permute.xlu0 %2747 }
 0x48e   : >> { %v2740_v41 = vpop.permute.xlu1 %2739  ;;  %3484 = vmatprep.subr.bf16.mxu1 %v2730_v48  ;;  %v2862_v63 = vshrl.u32 %v6235_v44, 16  ;;  %v2870_v14 = vshrl.u32 %v6236_v16, 16 }
 0x48f   : >> { %v2755_v55 = vsel %vm418_vm3, %v2748_v43, %v2740_v41  ;;  %v2765_v30 = vsel %vm418_vm3, %v2740_v41, %v2748_v43  ;;  %3485 = vmatpush1.bf16.msra.mxu1 %v2729_v23 }
 0x490   : >> { %v2799_v8 = vmul.bf16 %v2791_v20, %v2765_v30  ;;  %v2800_v45 = vmul.bf16 %v2798_v28, %v2755_v55  ;;  %v2863_v32 = vpack.i.b16 %v2862_v63, %v2862_v63  ;;  %v2871_v33 = vpack.i.b16 %v2870_v14, %v2870_v14 }
 0x491   : >> { %v2750_v11 = vpop.permute.xlu0 %2749 }
 0x492   : >> { %v2742_v12 = vpop.permute.xlu1 %2741  ;;  %3486 = vmatprep.subr.bf16.mxu1 %v2800_v45  ;;  %v2868_v48 = vrot.slane %v2863_v32, %v7577_v52  ;;  %v2876_v43 = vrot.slane %v2871_v33, %v7577_v52 }
 0x493   : >> { %v2756_v57 = vsel %vm418_vm3, %v2750_v11, %v2742_v12  ;;  %v2769_v60 = vsel %vm418_vm3, %v2742_v12, %v2750_v11  ;;  %3487 = vmatpush1.bf16.msra.mxu1 %v2799_v8 }
 0x494   : >> { %v2801_v7 = vmul.bf16 %v2791_v20, %v2769_v60  ;;  %v2802_v18 = vmul.bf16 %v2798_v28, %v2756_v57 }
 0x495   : >> { %v2752_v1 = vpop.permute.xlu0 %2751 }
 0x496   : >> { %v2744_v4 = vpop.permute.xlu1 %2743  ;;  %3488 = vmatprep.subr.bf16.mxu1 %v2802_v18 }
 0x497   : >> { %v2757_v17 = vsel %vm418_vm3, %v2752_v1, %v2744_v4  ;;  %v2773_v22 = vsel %vm418_vm3, %v2744_v4, %v2752_v1  ;;  %3489 = vmatpush1.bf16.msra.mxu1 %v2801_v7 }
 0x498   : >> { %v2803_v26 = vmul.bf16 %v2791_v20, %v2773_v22  ;;  %v2804_v53 = vmul.bf16 %v2798_v28, %v2757_v17 }
 0x499   : >> { %v2754_v34 = vpop.permute.xlu0 %2753 }
 0x49a   : >> { %v2746_v35 = vpop.permute.xlu1 %2745  ;;  %3490 = vmatprep.subr.bf16.mxu1 %v2804_v53 }
 0x49b   : >> { %v2758_v39 = vsel %vm418_vm3, %v2754_v34, %v2746_v35  ;;  %v2777_v38 = vsel %vm418_vm3, %v2746_v35, %v2754_v34  ;;  %3491 = vmatpush1.bf16.msra.mxu1 %v2803_v26  ;;  %v2941_v26 = vld [vmem:[%s9278_s3] sm:$0x44] }
 0x49c   : >> { %v2805_v40 = vmul.bf16 %v2791_v20, %v2777_v38  ;;  %v2806_v23 = vmul.bf16 %v2798_v28, %v2758_v39  ;;  %v6238_v34 = vcombine.high %v2941_v26, %v2941_v26  ;;  %v6931_v39 = vld [vmem:[%s7943_s6 + $0x140] ss:$20 sps:$4 sm:$0xff]  }
 0x49d   : >> { %v2824_v24 = vpop.permute.xlu0 %2823  ;;  %v6940_v38 = vld [vmem:[%s7943_s6 + $0x16c] ss:$20 sps:$4 sm:$0xff]  }
 0x49e   : >> { %v2816_v41 = vpop.permute.xlu1 %2815  ;;  %3492 = vmatprep.subr.bf16.mxu1 %v2806_v23 }
 0x49f   : >> { %v2831_v55 = vsel %vm496_vm5, %v2824_v24, %v2816_v41  ;;  %v2841_v30 = vsel %vm496_vm5, %v2816_v41, %v2824_v24  ;;  %3493 = vmatpush1.bf16.msra.mxu1 %v2805_v40  ;;  %v6237_v40 = vcombine.low %v2941_v26, %v2941_v26  ;;  %v2956_v24 = vshrl.u32 %v6238_v34, 16  ;;  %v6948_v34 = vld [vmem:[%s7943_s6 + $0x1b8] ss:$20 sps:$4 sm:$0xff]  }
 0x4a0   : >> { %v2877_v8 = vmul.bf16 %v2868_v48, %v2841_v30  ;;  %v2878_v45 = vmul.bf16 %v2876_v43, %v2831_v55 }
 0x4a1   : >> { %v2826_v44 = vpop.permute.xlu0 %2825  ;;  %v2957_v55 = vpack.i.b16 %v2956_v24, %v2956_v24 }
 0x4a2   : >> { %v2818_v16 = vpop.permute.xlu1 %2817  ;;  %3494 = vmatprep.subr.bf16.mxu1 %v2878_v45  ;;  %v6943_v45 = vld [vmem:[%s7943_s6 + $0x194] ss:$20 sps:$4 sm:$0xff]  }
 0x4a3   : >> { %v2832_v20 = vsel %vm496_vm5, %v2826_v44, %v2818_v16  ;;  %v2845_v28 = vsel %vm496_vm5, %v2818_v16, %v2826_v44  ;;  %3495 = vmatpush1.bf16.msra.mxu1 %v2877_v8  ;;  %v6942_v8 = vld [vmem:[%s7943_s6 + $0x168] ss:$20 sps:$4 sm:$0xff]   ;;  %v2962_v16 = vrot.slane %v2957_v55, %v7503_v46 }
 0x4a4   : >> { %v2879_v11 = vmul.bf16 %v2868_v48, %v2845_v28  ;;  %v2880_v12 = vmul.bf16 %v2876_v43, %v2832_v20 }
 0x4a5   : >> { %v2828_v57 = vpop.permute.xlu0 %2827 }
 0x4a6   : >> { %v2820_v60 = vpop.permute.xlu1 %2819  ;;  %3496 = vmatprep.subr.bf16.mxu1 %v2880_v12  ;;  %v6945_v12 = vld [vmem:[%s7943_s6 + $0x190] ss:$20 sps:$4 sm:$0xff]  }
 0x4a7   : >> { %v2833_v7 = vsel %vm496_vm5, %v2828_v57, %v2820_v60  ;;  %v2849_v18 = vsel %vm496_vm5, %v2820_v60, %v2828_v57  ;;  %3497 = vmatpush1.bf16.msra.mxu1 %v2879_v11  ;;  %v3019_v60 = vld [vmem:[%s9278_s3] sm:$0x88] }
 0x4a8   : >> { %v2881_v63 = vmul.bf16 %v2868_v48, %v2849_v18  ;;  %v2882_v14 = vmul.bf16 %v2876_v43, %v2833_v7 }
 0x4a9   : >> { %v2830_v1 = vpop.permute.xlu0 %2829 }
 0x4aa   : >> { %v2822_v4 = vpop.permute.xlu1 %2821  ;;  %3498 = vmatprep.subr.bf16.mxu1 %v2882_v14  ;;  %v6240_v14 = vcombine.high %v3019_v60, %v3019_v60 }
 0x4ab   : >> { %v2834_v17 = vsel %vm496_vm5, %v2830_v1, %v2822_v4  ;;  %v2853_v22 = vsel %vm496_vm5, %v2822_v4, %v2830_v1  ;;  %3499 = vmatpush1.bf16.msra.mxu1 %v2881_v63 }
 0x4ac   : >> { %v2883_v53 = vmul.bf16 %v2868_v48, %v2853_v22  ;;  %v2884_v32 = vmul.bf16 %v2876_v43, %v2834_v17  ;;  %v2948_v48 = vshrl.u32 %v6237_v40, 16  ;;  %v6239_v22 = vcombine.low %v3019_v60, %v3019_v60 }
 0x4ad   : >> { %v2904_v33 = vpop.permute.xlu0 %2903 }
 0x4ae   : >> { %v2902_v35 = vpop.permute.xlu1 %2901  ;;  %3500 = vmatprep.subr.bf16.mxu1 %v2884_v32  ;;  %v3033_v32 = vpack.i.b16 %v6240_v14, %v6240_v14  ;;  %v3026_v40 = vpack.i.b16 %v6239_v22, %v6239_v22 }
 0x4af   : >> { %3501 = vmatpush1.bf16.msra.mxu1 %v2883_v53  ;;  %v2917_v28 = vsel %vm584_vm2, %v2902_v35, %v2904_v33 }
 0x4b0   : >> { %3543 = vmatprep.subr.bf16.mxu1 %v8213_v58  ;;  %v2949_v58 = vpack.i.b16 %v2948_v48, %v2948_v48  ;;  %v3038_v48 = vrot.slane %v3033_v32, %v7597_v9 }
 0x4b1   : >> { %v2908_v23 = vpop.permute.xlu0 %2907 }
 0x4b2   : >> { %v2906_v41 = vpop.permute.xlu1 %2905  ;;  %3503 = vmatmul.mubr.bf16.vlgmr.msra.gmra.mrb[16].mxu1 %v6931_v39  ;;  %v6951_v39 = vld [vmem:[%s7943_s6 + $0x14c] ss:$20 sps:$4 sm:$0xff]  }
 0x4b3   : >> { %3544 = vmatpush1.bf16.msra.mxu1 %v8211_v47  ;;  %3512 = vmatprep.mubr.bf16.mxu1 %v6940_v38  ;;  %v2931_v57 = vsel %vm584_vm2, %v2908_v23, %v2906_v41  ;;  %v2918_v18 = vsel %vm584_vm2, %v2906_v41, %v2908_v23 }
 0x4b4   : >> { %3545 = vmatprep.subr.bf16.mxu1 %v8221_v19  ;;  %v2927_v19 = vsel %vm584_vm2, %v2904_v33, %v2902_v35  ;;  %v2966_v63 = vmul.bf16 %v2962_v16, %v2931_v57 }
 0x4b5   : >> { %v2912_v43 = vpop.permute.xlu0 %2911 }
 0x4b6   : >> { %v2910_v30 = vpop.permute.xlu1 %2909 }
 0x4b7   : >> { %3546 = vmatpush1.bf16.msra.mxu1 %v8219_v3  ;;  %v2954_v3 = vrot.slane %v2949_v58, %v7503_v46  ;;  %v2935_v4 = vsel %vm584_vm2, %v2912_v43, %v2910_v30  ;;  %v2919_v26 = vsel %vm584_vm2, %v2910_v30, %v2912_v43  ;;  %v3095_v30 = vld [vmem:[%s9278_s3] sm:$0x88] }
 0x4b8   : >> { %3547 = vmatprep.subr.bf16.mxu1 %v8229_v31  ;;  %v2964_v31 = vmul.bf16 %v2962_v16, %v2927_v19  ;;  %v2968_v53 = vmul.bf16 %v2962_v16, %v2935_v4 }
 0x4b9   : >> { %v2916_v44 = vpop.permute.xlu0 %2915  ;;  %v2963_v7 = vmul.bf16 %v2954_v3, %v2917_v28  ;;  %v2965_v17 = vmul.bf16 %v2954_v3, %v2918_v18  ;;  %v2967_v38 = vmul.bf16 %v2954_v3, %v2919_v26 }
 0x4ba   : >> { %v2914_v47 = vpop.permute.xlu1 %2913  ;;  %3513 = vmatmul.mubr.bf16.gmra.mrb[20].mxu1 %v6942_v8 }
 0x4bb   : >> { %3548 = vmatpush1.bf16.msra.mxu1 %v8227_v49  ;;  %3522 = vmatprep.mubr.bf16.mxu1 %v6943_v45  ;;  %v6946_v49 = vld [vmem:[%s7943_s6 + $0x1bc] ss:$20 sps:$4 sm:$0xff]   ;;  %v2939_v35 = vsel %vm584_vm2, %v2916_v44, %v2914_v47  ;;  %v2920_v24 = vsel %vm584_vm2, %v2914_v47, %v2916_v44  ;;  %v3031_v45 = vrot.slane %v3026_v40, %v7597_v9 }
 0x4bc   : >> { %3549 = vmatprep.subr.bf16.mxu1 %v8237_v56  ;;  %v2970_v41 = vmul.bf16 %v2962_v16, %v2939_v35  ;;  %v2969_v8 = vmul.bf16 %v2954_v3, %v2920_v24  ;;  %v6242_v47 = vcombine.high %v3095_v30, %v3095_v30 }
 0x4bd   : >> { %v2982_v20 = vpop.permute.xlu0 %2981 }
 0x4be   : >> { %v2980_v11 = vpop.permute.xlu1 %2979 }
 0x4bf   : >> { %3550 = vmatpush1.bf16.msra.mxu1 %v8235_v29  ;;  %v3005_v43 = vsel %vm664_vm4, %v2982_v20, %v2980_v11  ;;  %v2995_v44 = vsel %vm664_vm4, %v2980_v11, %v2982_v20 }
 0x4c0   : >> { %3551 = vmatprep.subr.bf16.mxu1 %v2964_v31  ;;  %v3040_v16 = vmul.bf16 %v3038_v48, %v3005_v43  ;;  %v3039_v31 = vmul.bf16 %v3031_v45, %v2995_v44 }
 0x4c1   : >> { %v2986_v56 = vpop.permute.xlu0 %2985 }
 0x4c2   : >> { %v2984_v1 = vpop.permute.xlu1 %2983  ;;  %3523 = vmatmul.mubr.bf16.gmra.mrb[24].mxu1 %v6945_v12  ;;  %v6241_v12 = vcombine.low %v3095_v30, %v3095_v30 }
 0x4c3   : >> { %3552 = vmatpush1.bf16.msra.mxu1 %v2963_v7  ;;  %3532 = vmatprep.mubr.bf16.mxu1 %v6946_v49  ;;  %v3009_v28 = vsel %vm664_vm4, %v2986_v56, %v2984_v1  ;;  %v2996_v60 = vsel %vm664_vm4, %v2984_v1, %v2986_v56  ;;  %v3110_v7 = vshrl.u32 %v6242_v47, 16 }
 0x4c4   : >> { %3553 = vmatprep.subr.bf16.mxu1 %v2966_v63  ;;  %v3042_v49 = vmul.bf16 %v3038_v48, %v3009_v28  ;;  %v3041_v20 = vmul.bf16 %v3031_v45, %v2996_v60  ;;  %v3102_v11 = vshrl.u32 %v6241_v12, 16 }
 0x4c5   : >> { %v2990_v29 = vpop.permute.xlu0 %2989  ;;  %v3111_v4 = vpack.i.b16 %v3110_v7, %v3110_v7 }
 0x4c6   : >> { %v2988_v33 = vpop.permute.xlu1 %2987  ;;  %v3103_v1 = vpack.i.b16 %v3102_v11, %v3102_v11 }
 0x4c7   : >> { %3554 = vmatpush1.bf16.msra.mxu1 %v2965_v17  ;;  %v3013_v18 = vsel %vm664_vm4, %v2990_v29, %v2988_v33  ;;  %v2997_v63 = vsel %vm664_vm4, %v2988_v33, %v2990_v29 }
 0x4c8   : >> { %3555 = vmatprep.subr.bf16.mxu1 %v2968_v53  ;;  %v3044_v14 = vmul.bf16 %v3038_v48, %v3013_v18  ;;  %v3043_v56 = vmul.bf16 %v3031_v45, %v2997_v63 }
 0x4c9   : >> { %v2994_v23 = vpop.permute.xlu0 %2993 }
 0x4ca   : >> { %v2992_v55 = vpop.permute.xlu1 %2991  ;;  %3533 = vmatmul.mubr.bf16.gmra.mrb[28].mxu1 %v6948_v34  ;;  %v3116_v34 = vrot.slane %v3111_v4, %v7597_v9 }
 0x4cb   : >> { %3556 = vmatpush1.bf16.msra.mxu1 %v2967_v38  ;;  %3575 = vmatprep.mubr.bf16.mxu1 %v6951_v39  ;;  %v3017_v26 = vsel %vm664_vm4, %v2994_v23, %v2992_v55  ;;  %v2998_v53 = vsel %vm664_vm4, %v2992_v55, %v2994_v23  ;;  %v3108_v38 = vrot.slane %v3103_v1, %v7597_v9  ;;  %v3173_v23 = vld [vmem:[%s9278_s3 + $0x8] sm:$0x11] }
 0x4cc   : >> { %3557 = vmatprep.subr.bf16.mxu1 %v2970_v41  ;;  %v3046_v32 = vmul.bf16 %v3038_v48, %v3017_v26  ;;  %v3045_v33 = vmul.bf16 %v3031_v45, %v2998_v53  ;;  %v6949_v26 = vld [vmem:[%s7943_s6 + $0x148] ss:$20 sps:$4 sm:$0xff]  }
 0x4cd   : >> { %v3058_v58 = vpop.permute.xlu0 %3057  ;;  %v6952_v1 = vld [vmem:[%s7943_s6 + $0x174] ss:$20 sps:$4 sm:$0xff]  }
 0x4ce   : >> { %v3056_v19 = vpop.permute.xlu1 %3055 }
 0x4cf   : >> { %3558 = vmatpush1.bf16.msra.mxu1 %v2969_v8  ;;  %v3081_v35 = vsel %vm742_vm6, %v3058_v58, %v3056_v19  ;;  %v3071_v40 = vsel %vm742_vm6, %v3056_v19, %v3058_v58  ;;  %v6244_v8 = vcombine.high %v3173_v23, %v3173_v23 }
 0x4d0   : >> { %3559 = vmatprep.subr.bf16.mxu1 %v3040_v16  ;;  %v3118_v24 = vmul.bf16 %v3116_v34, %v3081_v35  ;;  %v3117_v48 = vmul.bf16 %v3108_v38, %v3071_v40  ;;  %v6243_v16 = vcombine.low %v3173_v23, %v3173_v23  ;;  %v6955_v23 = vld [vmem:[%s7943_s6 + $0x19c] ss:$20 sps:$4 sm:$0xff]  }
 0x4d1   : >> { %v3062_v57 = vpop.permute.xlu0 %3061  ;;  %v3187_v28 = vpack.i.b16 %v6244_v8, %v6244_v8  ;;  %v6957_v8 = vld [vmem:[%s7943_s6 + $0x198] ss:$20 sps:$4 sm:$0xff]  }
 0x4d2   : >> { %v3060_v3 = vpop.permute.xlu1 %3059 }
 0x4d3   : >> { %3560 = vmatpush1.bf16.msra.mxu1 %v3039_v31  ;;  %v3085_v41 = vsel %vm742_vm6, %v3062_v57, %v3060_v3  ;;  %v3072_v55 = vsel %vm742_vm6, %v3060_v3, %v3062_v57  ;;  %v3192_v18 = vrot.slane %v3187_v28, %v7466_v15 }
 0x4d4   : >> { %3561 = vmatprep.subr.bf16.mxu1 %v3042_v49  ;;  %v3120_v43 = vmul.bf16 %v3116_v34, %v3085_v41  ;;  %v3119_v58 = vmul.bf16 %v3108_v38, %v3072_v55  ;;  %v3180_v49 = vpack.i.b16 %v6243_v16, %v6243_v16  ;;  %v6962_v16 = vld [vmem:[%s7943_s6 + $0x178] ss:$20 sps:$4 sm:$0xff]  }
 0x4d5   : >> { %v3066_v17 = vpop.permute.xlu0 %3065 }
 0x4d6   : >> { %v3064_v22 = vpop.permute.xlu1 %3063  ;;  %v3185_v63 = vrot.slane %v3180_v49, %v7466_v15 }
 0x4d7   : >> { %3562 = vmatpush1.bf16.msra.mxu1 %v3041_v20  ;;  %v3089_v44 = vsel %vm742_vm6, %v3066_v17, %v3064_v22  ;;  %v3073_v47 = vsel %vm742_vm6, %v3064_v22, %v3066_v17 }
 0x4d8   : >> { %3563 = vmatprep.subr.bf16.mxu1 %v3044_v14  ;;  %v3122_v19 = vmul.bf16 %v3116_v34, %v3089_v44  ;;  %v3121_v57 = vmul.bf16 %v3108_v38, %v3073_v47  ;;  %v6960_v44 = vld [vmem:[%s7943_s6 + $0x1c0] ss:$20 sps:$4 sm:$0xff]  }
 0x4d9   : >> { %v3070_v39 = vpop.permute.xlu0 %3069  ;;  %v6963_v47 = vld [vmem:[%s7943_s6 + $0x1a0] ss:$20 sps:$4 sm:$0xff]  }
 0x4da   : >> { %v3068_v29 = vpop.permute.xlu1 %3067 }
 0x4db   : >> { %3564 = vmatpush1.bf16.msra.mxu1 %v3043_v56  ;;  %v3093_v31 = vsel %vm742_vm6, %v3070_v39, %v3068_v29  ;;  %v3074_v7 = vsel %vm742_vm6, %v3068_v29, %v3070_v39 }
 0x4dc   : >> { %3565 = vmatprep.subr.bf16.mxu1 %v3046_v32  ;;  %v3124_v3 = vmul.bf16 %v3116_v34, %v3093_v31  ;;  %v3123_v11 = vmul.bf16 %v3108_v38, %v3074_v7 }
 0x4dd   : >> { %v3136_v30 = vpop.permute.xlu0 %3135 }
 0x4de   : >> { %v3134_v45 = vpop.permute.xlu1 %3133 }
 0x4df   : >> { %3566 = vmatpush1.bf16.msra.mxu1 %v3045_v33  ;;  %v3159_v20 = vsel %vm822_vm7, %v3136_v30, %v3134_v45  ;;  %v3149_v14 = vsel %vm822_vm7, %v3134_v45, %v3136_v30  ;;  %v6958_v45 = vld [vmem:[%s7943_s6 + $0x1c4] ss:$20 sps:$4 sm:$0xff]  }
 0x4e0   : >> { %3567 = vmatprep.subr.bf16.mxu1 %v3118_v24  ;;  %v3194_v4 = vmul.bf16 %v3192_v18, %v3159_v20  ;;  %v3193_v53 = vmul.bf16 %v3185_v63, %v3149_v14  ;;  %v6954_v24 = vld [vmem:[%s7943_s6 + $0x170] ss:$20 sps:$4 sm:$0xff]  }
 0x4e1   : >> { %v3140_v12 = vpop.permute.xlu0 %3139 }
 0x4e2   : >> { %v3138_v60 = vpop.permute.xlu1 %3137 }
 0x4e3   : >> { %3568 = vmatpush1.bf16.msra.mxu1 %v3117_v48  ;;  %v3163_v56 = vsel %vm822_vm7, %v3140_v12, %v3138_v60  ;;  %v3150_v32 = vsel %vm822_vm7, %v3138_v60, %v3140_v12 }
 0x4e4   : >> { %3569 = vmatprep.subr.bf16.mxu1 %v3120_v43  ;;  %v3196_v34 = vmul.bf16 %v3192_v18, %v3163_v56  ;;  %v3195_v33 = vmul.bf16 %v3185_v63, %v3150_v32 }
 0x4e5   : >> { %v3144_v17 = vpop.permute.xlu0 %3143 }
 0x4e6   : >> { %v3142_v22 = vpop.permute.xlu1 %3141 }
 0x4e7   : >> { %3570 = vmatpush1.bf16.msra.mxu1 %v3119_v58  ;;  %v3167_v35 = vsel %vm822_vm7, %v3144_v17, %v3142_v22  ;;  %v3151_v38 = vsel %vm822_vm7, %v3142_v22, %v3144_v17  ;;  %v6961_v58 = vld [vmem:[%s7943_s6 + $0x150] ss:$20 sps:$4 sm:$0xff]  }
 0x4e8   : >> { %3571 = vmatprep.subr.bf16.mxu1 %v3122_v19  ;;  %v3198_v40 = vmul.bf16 %v3192_v18, %v3167_v35  ;;  %v3197_v48 = vmul.bf16 %v3185_v63, %v3151_v38  ;;  %v6964_v19 = vld [vmem:[%s7943_s6 + $0x1c8] ss:$20 sps:$4 sm:$0xff]  }
 0x4e9   : >> { %v3148_v39 = vpop.permute.xlu0 %3147 }
 0x4ea   : >> { %v3146_v29 = vpop.permute.xlu1 %3145 }
 0x4eb   : >> { %3572 = vmatpush1.bf16.msra.mxu1 %v3121_v57  ;;  %v3171_v41 = vsel %vm822_vm7, %v3148_v39, %v3146_v29  ;;  %v3152_v55 = vsel %vm822_vm7, %v3146_v29, %v3148_v39 }
 0x4ec   : >> { %3573 = vmatprep.subr.bf16.mxu1 %v3124_v3  ;;  %v3200_v43 = vmul.bf16 %v3192_v18, %v3171_v41  ;;  %v3199_v30 = vmul.bf16 %v3185_v63, %v3152_v55 }
 0x4ef   : >> { %3574 = vmatpush1.bf16.msra.mxu1 %v3123_v11 }
 0x4f0   : >> { %3616 = vmatprep.subr.bf16.mxu1 %v3194_v4 }
 0x4f2   : >> { %3576 = vmatmul.mubr.bf16.vlgmr.msra.gmra.mrb[16].mxu1 %v6949_v26 }
 0x4f3   : >> { %3617 = vmatpush1.bf16.msra.mxu1 %v3193_v53  ;;  %3585 = vmatprep.mubr.bf16.mxu1 %v6952_v1 }
 0x4f4   : >> { %3618 = vmatprep.subr.bf16.mxu1 %v3196_v34 }
 0x4f7   : >> { %3619 = vmatpush1.bf16.msra.mxu1 %v3195_v33 }
 0x4f8   : >> { %3620 = vmatprep.subr.bf16.mxu1 %v3198_v40 }
 0x4fa   : >> { %3586 = vmatmul.mubr.bf16.gmra.mrb[20].mxu1 %v6954_v24  ;;  %v3326_v57 = vpop.permute.xlu0 %3325 }
 0x4fb   : >> { %3621 = vmatpush1.bf16.msra.mxu1 %v3197_v48  ;;  %3595 = vmatprep.mubr.bf16.mxu1 %v6955_v23  ;;  %v3321_v28 = vpop.permute.xlu1 %3320 }
 0x4fc   : >> { %3622 = vmatprep.subr.bf16.mxu1 %v3200_v43 }
 0x4fe   : >> { %v3336_v32 = vpop.permute.xlu0 %3335 }
 0x4ff   : >> { %3623 = vmatpush1.bf16.msra.mxu1 %v3199_v30  ;;  %v3331_v22 = vpop.permute.xlu1 %3330 }
 0x502   : >> { %3596 = vmatmul.mubr.bf16.gmra.mrb[24].mxu1 %v6957_v8 }
 0x503   : >> { %3605 = vmatprep.mubr.bf16.mxu1 %v6958_v45  ;;  %v3341_v48 = vpop.permute.xlu1 %3340  ;;  %v3346_v45 = vpop.permute.xlu0 %3345 }
 0x50a   : >> { %3606 = vmatmul.mubr.bf16.gmra.mrb[28].mxu1 %v6960_v44 }
 0x50b   : >> { %3648 = vmatprep.mubr.bf16.mxu1 %v7250_v27 }
 0x512   : >> { %6299 = vmatmul.mubr.msk.bf16.vlgmr.msra.gmra.mrb[16].mxu1 %vm1128_vm8, %v6961_v58 }
 0x513   : >> { %3658 = vmatprep.mubr.bf16.mxu1 %v7250_v27 }
 0x51a   : >> { %6300 = vmatmul.mubr.msk.bf16.gmra.mrb[20].mxu1 %vm1128_vm8, %v6962_v16 }
 0x51b   : >> { %3668 = vmatprep.mubr.bf16.mxu1 %v7250_v27 }
 0x522   : >> { %6301 = vmatmul.mubr.msk.bf16.gmra.mrb[24].mxu1 %vm1128_vm8, %v6963_v47 }
 0x523   : >> { %3678 = vmatprep.mubr.bf16.mxu1 %v7250_v27 }
 0x52a   : >> { %6302 = vmatmul.mubr.msk.bf16.gmra.mrb[28].mxu1 %vm1128_vm8, %v6964_v19 }
 0x52b   : >> { %4821 = vmatprep.mubr.bf16.mxu1 %v7250_v27 }
 0x5e5   : >> { %v3650_v31 = vpop.f32.mrb[16].mxu1 }
 0x5e6   : >> { %v6525_v12 = vadd.f32 %v3650_v31, %v3321_v28  ;;  %v3652_v60 = vpop.f32.mrb[17].mxu1 }
 0x5e7   : >> { %v6526_v49 = vadd.f32 %v3652_v60, %v3321_v28  ;;  %v3654_v7 = vpop.f32.mrb[18].mxu1 }
 0x5e8   : >> { %v6527_v3 = vadd.f32 %v3654_v7, %v3326_v57  ;;  %v3656_v18 = vpop.f32.mrb[19].mxu1  ;;  %v3689_v11 = vmax.f32 %v6525_v12, 0.0 }
 0x5e9   : >> { %v6528_v20 = vadd.f32 %v3656_v18, %v3326_v57  ;;  %v3690_v14 = vmax.f32 %v6526_v49, 0.0  ;;  %v3351_v49 = vpop.permute.xlu1 %3350 }
 0x5ea   : >> { %v3691_v63 = vmax.f32 %v6527_v3, 0.0 }
 0x5eb   : >> { %v3692_v4 = vmax.f32 %v6528_v20, 0.0 }
 0x5ec   : >> { %v8510_v17 = vpack.c.bf16 %v3691_v63, %v3689_v11  ;;  %v3356_v11 = vpop.permute.xlu0 %3355 }
 0x5ed   : >> { %v8512_v26 = vpack.c.bf16 %v3692_v4, %v3690_v14  ;;  %v3660_v56 = vpop.f32.mrb[20].mxu1 }
 0x5ee   : >> { %v6529_v1 = vadd.f32 %v3660_v56, %v3331_v22  ;;  %v3662_v53 = vpop.f32.mrb[21].mxu1  ;;  %3746 = vrot.lane.b32.xlu0 %v8510_v17, %s7243_s26 }
 0x5ef   : >> { %v6530_v34 = vadd.f32 %v3662_v53, %v3331_v22  ;;  %v3664_v35 = vpop.f32.mrb[22].mxu1  ;;  %3734 = vrot.lane.b32.xlu1 %v8512_v26, %s7243_s26 }
 0x5f0   : >> { %v6531_v39 = vadd.f32 %v3664_v35, %v3336_v32  ;;  %v3666_v29 = vpop.f32.mrb[23].mxu1  ;;  %v3693_v38 = vmax.f32 %v6529_v1, 0.0 }
 0x5f1   : >> { %v6532_v33 = vadd.f32 %v3666_v29, %v3336_v32  ;;  %v3694_v24 = vmax.f32 %v6530_v34, 0.0  ;;  %v6977_v29 = vld [vmem:[%s7943_s6 + $0x1e4] ss:$20 sps:$4 sm:$0xff]  }
 0x5f2   : >> { %v3695_v40 = vmax.f32 %v6531_v39, 0.0  ;;  %4655 = vmatprep.mubr.bf16.mxu0 %v6977_v29 }
 0x5f3   : >> { %v3696_v41 = vmax.f32 %v6532_v33, 0.0  ;;  %v3778_v33 = vld [vmem:[%s9278_s3] sm:$0x11] }
 0x5f4   : >> { %v8518_v23 = vpack.c.bf16 %v3695_v40, %v3693_v38  ;;  %v6303_v38 = vcombine.low %v3778_v33, %v3778_v33  ;;  %v6304_v40 = vcombine.high %v3778_v33, %v3778_v33  ;;  %v6349_v33 = vld [vmem:[%s8049_s5 + $0xe0] sm:$0xff] }
 0x5f5   : >> { %v8520_v55 = vpack.c.bf16 %v3696_v41, %v3694_v24  ;;  %v3670_v43 = vpop.f32.mrb[24].mxu1 }
 0x5f6   : >> { %v6533_v30 = vadd.f32 %v3670_v43, %v3341_v48  ;;  %v3672_v8 = vpop.f32.mrb[25].mxu1  ;;  %3748 = vrot.lane.b32.xlu0 %v8518_v23, %s7243_s26  ;;  %v3785_v24 = vpack.i.b16 %v6303_v38, %v6303_v38  ;;  %v3792_v41 = vpack.i.b16 %v6304_v40, %v6304_v40 }
 0x5f7   : >> { %v6534_v44 = vadd.f32 %v3672_v8, %v3341_v48  ;;  %v3674_v58 = vpop.f32.mrb[26].mxu1  ;;  %3736 = vrot.lane.b32.xlu1 %v8520_v55, %s7243_s26  ;;  %4049 = vst [vmem:[#allocation3 + $0x118] sm:$0xff] %v8520_v55 }
 0x5f8   : >> { %v6535_v16 = vadd.f32 %v3674_v58, %v3346_v45  ;;  %v3676_v47 = vpop.f32.mrb[27].mxu1  ;;  %v3697_v28 = vmax.f32 %v6533_v30, 0.0  ;;  %v8636_v48 = vrot.slane %v3785_v24, %v7466_v15  ;;  %v3797_v43 = vrot.slane %v3792_v41, %v7466_v15 }
 0x5f9   : >> { %v6536_v19 = vadd.f32 %v3676_v47, %v3346_v45  ;;  %v3698_v12 = vmax.f32 %v6534_v44, 0.0 }
 0x5fa   : >> { %v3699_v31 = vmax.f32 %v6535_v16, 0.0 }
 0x5fb   : >> { %v3700_v60 = vmax.f32 %v6536_v19, 0.0 }
 0x5fc   : >> { %v8527_v57 = vpack.c.bf16 %v3699_v31, %v3697_v28 }
 0x5fd   : >> { %v8529_v7 = vpack.c.bf16 %v3700_v60, %v3698_v12  ;;  %v3680_v3 = vpop.f32.mrb[28].mxu1 }
 0x5fe   : >> { %v6537_v18 = vadd.f32 %v3680_v3, %v3351_v49  ;;  %v3682_v20 = vpop.f32.mrb[29].mxu1  ;;  %3750 = vrot.lane.b32.xlu0 %v8527_v57, %s7243_s26 }
 0x5ff   : >> { %v6538_v63 = vadd.f32 %v3682_v20, %v3351_v49  ;;  %v3684_v14 = vpop.f32.mrb[30].mxu1  ;;  %3738 = vrot.lane.b32.xlu1 %v8529_v7, %s7243_s26  ;;  %v3854_v49 = vld [vmem:[%s9278_s3] sm:$0x11] }
 0x600   : >> { %v6539_v4 = vadd.f32 %v3684_v14, %v3356_v11  ;;  %v3686_v22 = vpop.f32.mrb[31].mxu1  ;;  %v3701_v1 = vmax.f32 %v6537_v18, 0.0  ;;  %v6305_v3 = vcombine.low %v3854_v49, %v3854_v49  ;;  %v6306_v18 = vcombine.high %v3854_v49, %v3854_v49  ;;  %v3932_v49 = vld [vmem:[%s9278_s3] sm:$0x22] }
 0x601   : >> { %v6540_v56 = vadd.f32 %v3686_v22, %v3356_v11  ;;  %v3702_v32 = vmax.f32 %v6538_v63, 0.0 }
 0x602   : >> { %v3703_v53 = vmax.f32 %v6539_v4, 0.0 }
 0x603   : >> { %v3704_v34 = vmax.f32 %v6540_v56, 0.0  ;;  %v3861_v56 = vshrl.u32 %v6305_v3, 16 }
 0x604   : >> { %v8535_v35 = vpack.c.bf16 %v3703_v53, %v3701_v1  ;;  %v3869_v1 = vshrl.u32 %v6306_v18, 16  ;;  %v6350_v53 = vld [vmem:[%s8049_s5 + $0xe8] sm:$0xff] }
 0x605   : >> { %v8537_v39 = vpack.c.bf16 %v3704_v34, %v3702_v32  ;;  %v3862_v32 = vpack.i.b16 %v3861_v56, %v3861_v56 }
 0x606   : >> { %3752 = vrot.lane.b32.xlu0 %v8535_v35, %s7243_s26  ;;  %v3870_v34 = vpack.i.b16 %v3869_v1, %v3869_v1  ;;  %v6347_v1 = vld [vmem:[%s8049_s5 + $0xd0] sm:$0xff] }
 0x607   : >> { %3740 = vrot.lane.b32.xlu1 %v8537_v39, %s7243_s26 }
 0x60a   : >> { %3822 = vrot.lane.b32.xlu0 %v8510_v17, %s7245_s28 }
 0x60b   : >> { %3814 = vrot.lane.b32.xlu1 %v8512_v26, %s7245_s28 }
 0x60e   : >> { %3824 = vrot.lane.b32.xlu0 %v8518_v23, %s7245_s28 }
 0x60f   : >> { %3816 = vrot.lane.b32.xlu1 %v8520_v55, %s7245_s28 }
 0x612   : >> { %3826 = vrot.lane.b32.xlu0 %v8527_v57, %s7245_s28 }
 0x613   : >> { %3818 = vrot.lane.b32.xlu1 %v8529_v7, %s7245_s28 }
 0x616   : >> { %3828 = vrot.lane.b32.xlu0 %v8535_v35, %s7245_s28 }
 0x617   : >> { %3820 = vrot.lane.b32.xlu1 %v8537_v39, %s7245_s28 }
 0x61a   : >> { %3900 = vrot.lane.b32.xlu0 %v8510_v17, %s7247_s30 }
 0x61b   : >> { %3892 = vrot.lane.b32.xlu1 %v8512_v26, %s7247_s30 }
 0x61e   : >> { %3902 = vrot.lane.b32.xlu0 %v8518_v23, %s7247_s30 }
 0x61f   : >> { %3894 = vrot.lane.b32.xlu1 %v8520_v55, %s7247_s30 }
 0x622   : >> { %3904 = vrot.lane.b32.xlu0 %v8527_v57, %s7247_s30 }
 0x623   : >> { %3896 = vrot.lane.b32.xlu1 %v8529_v7, %s7247_s30 }
 0x626   : >> { %3906 = vrot.lane.b32.xlu0 %v8535_v35, %s7247_s30 }
 0x627   : >> { %3898 = vrot.lane.b32.xlu1 %v8537_v39, %s7247_s30 }
 0x62a   : >> { %3976 = vrot.lane.b32.xlu0 %v8510_v17, %s7248_s8 }
 0x62b   : >> { %3968 = vrot.lane.b32.xlu1 %v8512_v26, %s7248_s8 }
 0x62e   : >> { %3978 = vrot.lane.b32.xlu0 %v8518_v23, %s7248_s8 }
 0x62f   : >> { %3970 = vrot.lane.b32.xlu1 %v8520_v55, %s7248_s8 }
 0x632   : >> { %3980 = vrot.lane.b32.xlu0 %v8527_v57, %s7248_s8 }
 0x633   : >> { %3972 = vrot.lane.b32.xlu1 %v8529_v7, %s7248_s8 }
 0x636   : >> { %3982 = vrot.lane.b32.xlu0 %v8535_v35, %s7248_s8 }
 0x637   : >> { %3974 = vrot.lane.b32.xlu1 %v8537_v39, %s7248_s8 }
 0x63a   : >> { %4056 = vrot.lane.b32.xlu0 %v8512_v26, %s7242_s24 }
 0x63b   : >> { %4054 = vrot.lane.b32.xlu1 %v8510_v17, %s7242_s24 }
 0x63e   : >> { %4060 = vrot.lane.b32.xlu0 %v8520_v55, %s7242_s24 }
 0x63f   : >> { %4058 = vrot.lane.b32.xlu1 %v8518_v23, %s7242_s24 }
 0x642   : >> { %4064 = vrot.lane.b32.xlu0 %v8529_v7, %s7242_s24 }
 0x643   : >> { %4062 = vrot.lane.b32.xlu1 %v8527_v57, %s7242_s24 }
 0x646   : >> { %4068 = vrot.lane.b32.xlu0 %v8537_v39, %s7242_s24 }
 0x647   : >> { %4066 = vrot.lane.b32.xlu1 %v8535_v35, %s7242_s24 }
 0x64a   : >> { %4134 = vrot.lane.b32.xlu0 %v8512_v26, %s7244_s27 }
 0x64b   : >> { %4132 = vrot.lane.b32.xlu1 %v8510_v17, %s7244_s27 }
 0x64e   : >> { %4138 = vrot.lane.b32.xlu0 %v8520_v55, %s7244_s27 }
 0x64f   : >> { %4136 = vrot.lane.b32.xlu1 %v8518_v23, %s7244_s27 }
 0x652   : >> { %4142 = vrot.lane.b32.xlu0 %v8529_v7, %s7244_s27 }
 0x653   : >> { %4140 = vrot.lane.b32.xlu1 %v8527_v57, %s7244_s27 }
 0x656   : >> { %4146 = vrot.lane.b32.xlu0 %v8537_v39, %s7244_s27 }
 0x657   : >> { %4144 = vrot.lane.b32.xlu1 %v8535_v35, %s7244_s27 }
 0x65a   : >> { %4210 = vrot.lane.b32.xlu0 %v8512_v26, %s7246_s29 }
 0x65b   : >> { %4208 = vrot.lane.b32.xlu1 %v8510_v17, %s7246_s29 }
 0x65e   : >> { %4214 = vrot.lane.b32.xlu0 %v8520_v55, %s7246_s29 }
 0x65f   : >> { %4212 = vrot.lane.b32.xlu1 %v8518_v23, %s7246_s29 }
 0x660   : >> { %v3747_v30 = vpop.permute.xlu0 %3746 }
 0x661   : >> { %v3735_v8 = vpop.permute.xlu1 %3734 }
 0x662   : >> { %v3754_v45 = vsel %vm260_vm0, %v3747_v30, %v3735_v8  ;;  %v3764_v44 = vsel %vm260_vm0, %v3735_v8, %v3747_v30  ;;  %4218 = vrot.lane.b32.xlu0 %v8529_v7, %s7246_s29  ;;  %v3867_v8 = vrot.slane %v3862_v32, %v7466_v15 }
 0x663   : >> { %v3798_v58 = vmul.bf16 %v8636_v48, %v3764_v44  ;;  %v3799_v16 = vmul.bf16 %v3797_v43, %v3754_v45  ;;  %4216 = vrot.lane.b32.xlu1 %v8527_v57, %s7246_s29  ;;  %v3875_v45 = vrot.slane %v3870_v34, %v7466_v15  ;;  %v6352_v44 = vld [vmem:[%s8049_s5 + $0xf8] sm:$0xff] }
 0x665   : >> { %4623 = vmatprep.subr.bf16.mxu0 %v3799_v16  ;;  %v6351_v16 = vld [vmem:[%s8049_s5 + $0xf0] sm:$0xff] }
 0x666   : >> { %4222 = vrot.lane.b32.xlu0 %v8537_v39, %s7246_s29  ;;  %4624 = vmatpush1.bf16.msra.mxu0 %v3798_v58 }
 0x667   : >> { %4220 = vrot.lane.b32.xlu1 %v8535_v35, %s7246_s29 }
 0x668   : >> { %v3749_v47 = vpop.permute.xlu0 %3748 }
 0x669   : >> { %v3737_v19 = vpop.permute.xlu1 %3736 }
 0x66a   : >> { %v3755_v28 = vsel %vm260_vm0, %v3749_v47, %v3737_v19  ;;  %v3768_v31 = vsel %vm260_vm0, %v3737_v19, %v3749_v47  ;;  %4288 = vrot.lane.b32.xlu0 %v8512_v26, %s7249_s9 }
 0x66b   : >> { %v3800_v12 = vmul.bf16 %v8636_v48, %v3768_v31  ;;  %v3801_v60 = vmul.bf16 %v3797_v43, %v3755_v28  ;;  %4286 = vrot.lane.b32.xlu1 %v8510_v17, %s7249_s9  ;;  %v6346_v31 = vld [vmem:[%s8049_s5 + $0xc8] sm:$0xff] }
 0x66d   : >> { %4625 = vmatprep.subr.bf16.mxu0 %v3801_v60  ;;  %v6345_v60 = vld [vmem:[%s8049_s5 + $0xc0] sm:$0xff] }
 0x66e   : >> { %4292 = vrot.lane.b32.xlu0 %v8520_v55, %s7249_s9  ;;  %4626 = vmatpush1.bf16.msra.mxu0 %v3800_v12 }
 0x66f   : >> { %4290 = vrot.lane.b32.xlu1 %v8518_v23, %s7249_s9 }
 0x670   : >> { %v3751_v20 = vpop.permute.xlu0 %3750 }
 0x671   : >> { %v3739_v11 = vpop.permute.xlu1 %3738 }
 0x672   : >> { %v3756_v63 = vsel %vm260_vm0, %v3751_v20, %v3739_v11  ;;  %v3772_v14 = vsel %vm260_vm0, %v3739_v11, %v3751_v20  ;;  %4296 = vrot.lane.b32.xlu0 %v8529_v7, %s7249_s9 }
 0x673   : >> { %v3802_v4 = vmul.bf16 %v8636_v48, %v3772_v14  ;;  %v3803_v22 = vmul.bf16 %v3797_v43, %v3756_v63  ;;  %4294 = vrot.lane.b32.xlu1 %v8527_v57, %s7249_s9  ;;  %v6348_v14 = vld [vmem:[%s8049_s5 + $0xd8] sm:$0xff] }
 0x675   : >> { %4627 = vmatprep.subr.bf16.mxu0 %v3803_v22  ;;  %v6308_v22 = vcombine.high %v3932_v49, %v3932_v49 }
 0x676   : >> { %4300 = vrot.lane.b32.xlu0 %v8537_v39, %s7249_s9  ;;  %4628 = vmatpush1.bf16.msra.mxu0 %v3802_v4  ;;  %v6307_v4 = vcombine.low %v3932_v49, %v3932_v49 }
 0x677   : >> { %4298 = vrot.lane.b32.xlu1 %v8535_v35, %s7249_s9 }
 0x678   : >> { %v3753_v29 = vpop.permute.xlu0 %3752 }
 0x679   : >> { %v3741_v38 = vpop.permute.xlu1 %3740 }
 0x67a   : >> { %v3757_v40 = vsel %vm260_vm0, %v3753_v29, %v3741_v38  ;;  %v3776_v24 = vsel %vm260_vm0, %v3741_v38, %v3753_v29  ;;  %4498 = vperm.xlu0 %6875, %v6350_v53   ;;  %v3939_v38 = vpack.i.b16 %v6307_v4, %v6307_v4 }
 0x67b   : >> { %v3804_v41 = vmul.bf16 %v8636_v48, %v3776_v24  ;;  %v3805_v30 = vmul.bf16 %v3797_v43, %v3757_v40  ;;  %4493 = vperm.xlu1 %6876, %v6349_v33   ;;  %v3946_v40 = vpack.i.b16 %v6308_v22, %v6308_v22 }
 0x67c   : >> { %v3823_v58 = vpop.permute.xlu0 %3822 }
 0x67d   : >> { %v3815_v47 = vpop.permute.xlu1 %3814  ;;  %4629 = vmatprep.subr.bf16.mxu0 %v3805_v30 }
 0x67e   : >> { %v3830_v19 = vsel %vm338_vm1, %v3823_v58, %v3815_v47  ;;  %v3840_v28 = vsel %vm338_vm1, %v3815_v47, %v3823_v58  ;;  %4508 = vperm.xlu0 %6875, %v6352_v44   ;;  %4630 = vmatpush1.bf16.msra.mxu0 %v3804_v41  ;;  %v3944_v47 = vrot.slane %v3939_v38, %v7577_v52 }
 0x67f   : >> { %v3876_v48 = vmul.bf16 %v3867_v8, %v3840_v28  ;;  %v3877_v43 = vmul.bf16 %v3875_v45, %v3830_v19  ;;  %4503 = vperm.xlu1 %6876, %v6351_v16   ;;  %v3951_v19 = vrot.slane %v3946_v40, %v7577_v52 }
 0x680   : >> { %v3825_v12 = vpop.permute.xlu0 %3824 }
 0x681   : >> { %v3817_v3 = vpop.permute.xlu1 %3816  ;;  %4631 = vmatprep.subr.bf16.mxu0 %v3877_v43 }
 0x682   : >> { %v3831_v18 = vsel %vm338_vm1, %v3825_v12, %v3817_v3  ;;  %v3844_v20 = vsel %vm338_vm1, %v3817_v3, %v3825_v12  ;;  %4478 = vperm.xlu0 %6875, %v6346_v31   ;;  %4632 = vmatpush1.bf16.msra.mxu0 %v3876_v48  ;;  %v4008_v48 = vld [vmem:[%s9278_s3] sm:$0x22] }
 0x683   : >> { %v3878_v11 = vmul.bf16 %v3867_v8, %v3844_v20  ;;  %v3879_v63 = vmul.bf16 %v3875_v45, %v3831_v18  ;;  %4473 = vperm.xlu1 %6876, %v6345_v60  }
 0x684   : >> { %v3827_v56 = vpop.permute.xlu0 %3826 }
 0x685   : >> { %v3819_v53 = vpop.permute.xlu1 %3818  ;;  %4633 = vmatprep.subr.bf16.mxu0 %v3879_v63 }
 0x686   : >> { %v3832_v32 = vsel %vm338_vm1, %v3827_v56, %v3819_v53  ;;  %v3848_v34 = vsel %vm338_vm1, %v3819_v53, %v3827_v56  ;;  %4488 = vperm.xlu0 %6875, %v6348_v14   ;;  %4634 = vmatpush1.bf16.msra.mxu0 %v3878_v11 }
 0x687   : >> { %v3880_v29 = vmul.bf16 %v3867_v8, %v3848_v34  ;;  %v3881_v33 = vmul.bf16 %v3875_v45, %v3832_v32  ;;  %4483 = vperm.xlu1 %6876, %v6347_v1  }
 0x688   : >> { %v3829_v24 = vpop.permute.xlu0 %3828 }
 0x689   : >> { %v3821_v41 = vpop.permute.xlu1 %3820  ;;  %4635 = vmatprep.subr.bf16.mxu0 %v3881_v33 }
 0x68a   : >> { %v3833_v30 = vsel %vm338_vm1, %v3829_v24, %v3821_v41  ;;  %v3852_v44 = vsel %vm338_vm1, %v3821_v41, %v3829_v24  ;;  %4636 = vmatpush1.bf16.msra.mxu0 %v3880_v29  ;;  %7009 = vset.pattern.permute.xlu0 (%p8885_p3), %v7233_v0 }
 0x68b   : >> { %v3882_v58 = vmul.bf16 %v3867_v8, %v3852_v44  ;;  %v3883_v16 = vmul.bf16 %v3875_v45, %v3833_v30  ;;  %v6309_v8 = vcombine.low %v4008_v48, %v4008_v48  ;;  %v6310_v45 = vcombine.high %v4008_v48, %v4008_v48 }
 0x68c   : >> { %v3901_v28 = vpop.permute.xlu0 %3900 }
 0x68d   : >> { %v3893_v43 = vpop.permute.xlu1 %3892  ;;  %4637 = vmatprep.subr.bf16.mxu0 %v3883_v16  ;;  %v4015_v4 = vshrl.u32 %v6309_v8, 16  ;;  %v4023_v22 = vshrl.u32 %v6310_v45, 16 }
 0x68e   : >> { %v3908_v31 = vsel %vm418_vm3, %v3901_v28, %v3893_v43  ;;  %v3918_v12 = vsel %vm418_vm3, %v3893_v43, %v3901_v28  ;;  %4638 = vmatpush1.bf16.msra.mxu0 %v3882_v58  ;;  %v4094_v43 = vld [vmem:[%s9278_s3] sm:$0x44] }
 0x68f   : >> { %v3952_v60 = vmul.bf16 %v3944_v47, %v3918_v12  ;;  %v3953_v49 = vmul.bf16 %v3951_v19, %v3908_v31  ;;  %v4016_v33 = vpack.i.b16 %v4015_v4, %v4015_v4  ;;  %v4024_v38 = vpack.i.b16 %v4023_v22, %v4023_v22 }
 0x690   : >> { %v3903_v3 = vpop.permute.xlu0 %3902 }
 0x691   : >> { %v3895_v18 = vpop.permute.xlu1 %3894  ;;  %4639 = vmatprep.subr.bf16.mxu0 %v3953_v49  ;;  %v4021_v16 = vrot.slane %v4016_v33, %v7577_v52  ;;  %v4029_v28 = vrot.slane %v4024_v38, %v7577_v52 }
 0x692   : >> { %v3909_v20 = vsel %vm418_vm3, %v3903_v3, %v3895_v18  ;;  %v3922_v11 = vsel %vm418_vm3, %v3895_v18, %v3903_v3  ;;  %4640 = vmatpush1.bf16.msra.mxu0 %v3952_v60 }
 0x693   : >> { %v3954_v63 = vmul.bf16 %v3944_v47, %v3922_v11  ;;  %v3955_v14 = vmul.bf16 %v3951_v19, %v3909_v20 }
 0x694   : >> { %v3905_v56 = vpop.permute.xlu0 %3904 }
 0x695   : >> { %v3897_v1 = vpop.permute.xlu1 %3896  ;;  %4641 = vmatprep.subr.bf16.mxu0 %v3955_v14 }
 0x696   : >> { %v3910_v53 = vsel %vm418_vm3, %v3905_v56, %v3897_v1  ;;  %v3926_v32 = vsel %vm418_vm3, %v3897_v1, %v3905_v56  ;;  %4642 = vmatpush1.bf16.msra.mxu0 %v3954_v63 }
 0x697   : >> { %v3956_v34 = vmul.bf16 %v3944_v47, %v3926_v32  ;;  %v3957_v29 = vmul.bf16 %v3951_v19, %v3910_v53 }
 0x698   : >> { %v3907_v40 = vpop.permute.xlu0 %3906 }
 0x699   : >> { %v3899_v24 = vpop.permute.xlu1 %3898  ;;  %4643 = vmatprep.subr.bf16.mxu0 %v3957_v29 }
 0x69a   : >> { %v3911_v41 = vsel %vm418_vm3, %v3907_v40, %v3899_v24  ;;  %v3930_v30 = vsel %vm418_vm3, %v3899_v24, %v3907_v40  ;;  %4644 = vmatpush1.bf16.msra.mxu0 %v3956_v34 }
 0x69b   : >> { %v3958_v44 = vmul.bf16 %v3944_v47, %v3930_v30  ;;  %v3959_v58 = vmul.bf16 %v3951_v19, %v3911_v41  ;;  %v6311_v47 = vcombine.low %v4094_v43, %v4094_v43  ;;  %v6312_v19 = vcombine.high %v4094_v43, %v4094_v43 }
 0x69c   : >> { %v3977_v48 = vpop.permute.xlu0 %3976 }
 0x69d   : >> { %v3969_v31 = vpop.permute.xlu1 %3968  ;;  %4645 = vmatprep.subr.bf16.mxu0 %v3959_v58  ;;  %v4101_v14 = vshrl.u32 %v6311_v47, 16  ;;  %v4109_v4 = vshrl.u32 %v6312_v19, 16  ;;  %v4172_v19 = vld [vmem:[%s9278_s3] sm:$0x88] }
 0x69e   : >> { %v3984_v12 = vsel %vm496_vm5, %v3977_v48, %v3969_v31  ;;  %v3994_v60 = vsel %vm496_vm5, %v3969_v31, %v3977_v48  ;;  %4646 = vmatpush1.bf16.msra.mxu0 %v3958_v44 }
 0x69f   : >> { %v4030_v49 = vmul.bf16 %v4021_v16, %v3994_v60  ;;  %v4031_v8 = vmul.bf16 %v4029_v28, %v3984_v12  ;;  %v4102_v29 = vpack.i.b16 %v4101_v14, %v4101_v14  ;;  %v4110_v33 = vpack.i.b16 %v4109_v4, %v4109_v4  ;;  %v6975_v12 = vld [vmem:[%s7943_s6 + $0x1e0] ss:$20 sps:$4 sm:$0xff]  }
 0x6a0   : >> { %v3979_v45 = vpop.permute.xlu0 %3978 }
 0x6a1   : >> { %v3971_v3 = vpop.permute.xlu1 %3970  ;;  %4647 = vmatprep.subr.bf16.mxu0 %v4031_v8  ;;  %v8726_v58 = vrot.slane %v4102_v29, %v7503_v46  ;;  %v8729_v48 = vrot.slane %v4110_v33, %v7503_v46  ;;  %v6984_v8 = vld [vmem:[%s7943_s6 + $0x20c] ss:$20 sps:$4 sm:$0xff]  }
 0x6a2   : >> { %v3985_v18 = vsel %vm496_vm5, %v3979_v45, %v3971_v3  ;;  %v3998_v20 = vsel %vm496_vm5, %v3971_v3, %v3979_v45  ;;  %4648 = vmatpush1.bf16.msra.mxu0 %v4030_v49 }
 0x6a3   : >> { %v4032_v11 = vmul.bf16 %v4021_v16, %v3998_v20  ;;  %v4033_v63 = vmul.bf16 %v4029_v28, %v3985_v18 }
 0x6a4   : >> { %v3981_v22 = vpop.permute.xlu0 %3980 }
 0x6a5   : >> { %v3973_v56 = vpop.permute.xlu1 %3972  ;;  %4649 = vmatprep.subr.bf16.mxu0 %v4033_v63  ;;  %v6314_v63 = vcombine.high %v4172_v19, %v4172_v19 }
 0x6a6   : >> { %v3986_v1 = vsel %vm496_vm5, %v3981_v22, %v3973_v56  ;;  %v4002_v53 = vsel %vm496_vm5, %v3973_v56, %v3981_v22  ;;  %4650 = vmatpush1.bf16.msra.mxu0 %v4032_v11  ;;  %v6313_v11 = vcombine.low %v4172_v19, %v4172_v19  ;;  %v6986_v22 = vld [vmem:[%s7943_s6 + $0x208] ss:$20 sps:$4 sm:$0xff]  }
 0x6a7   : >> { %v4034_v32 = vmul.bf16 %v4021_v16, %v4002_v53  ;;  %v4035_v34 = vmul.bf16 %v4029_v28, %v3986_v1 }
 0x6a8   : >> { %v3983_v38 = vpop.permute.xlu0 %3982 }
 0x6a9   : >> { %v3975_v40 = vpop.permute.xlu1 %3974  ;;  %4651 = vmatprep.subr.bf16.mxu0 %v4035_v34  ;;  %v4179_v34 = vpack.i.b16 %v6313_v11, %v6313_v11 }
 0x6aa   : >> { %v3987_v24 = vsel %vm496_vm5, %v3983_v38, %v3975_v40  ;;  %v4006_v41 = vsel %vm496_vm5, %v3975_v40, %v3983_v38  ;;  %4652 = vmatpush1.bf16.msra.mxu0 %v4034_v32 }
 0x6ab   : >> { %v4036_v30 = vmul.bf16 %v4021_v16, %v4006_v41  ;;  %v4037_v44 = vmul.bf16 %v4029_v28, %v3987_v24 }
 0x6ac   : >> { %v4057_v43 = vpop.permute.xlu0 %4056 }
 0x6ad   : >> { %v4055_v31 = vpop.permute.xlu1 %4054  ;;  %4653 = vmatprep.subr.bf16.mxu0 %v4037_v44  ;;  %v4248_v44 = vld [vmem:[%s9278_s3] sm:$0x88] }
 0x6ae   : >> { %v8733_v60 = vsel %vm584_vm2, %v4055_v31, %v4057_v43  ;;  %v4080_v49 = vsel %vm584_vm2, %v4057_v43, %v4055_v31  ;;  %4654 = vmatpush1.bf16.msra.mxu0 %v4036_v30  ;;  %v6989_v43 = vld [vmem:[%s7943_s6 + $0x230] ss:$20 sps:$4 sm:$0xff]  }
 0x6af   : >> { %v4116_v16 = vmul.bf16 %v8726_v58, %v8733_v60  ;;  %v4117_v28 = vmul.bf16 %v8729_v48, %v4080_v49  ;;  %4696 = vmatprep.subr.bf16.mxu0 %v8512_v26  ;;  %v6316_v49 = vcombine.high %v4248_v44, %v4248_v44 }
 0x6b0   : >> { %v4061_v47 = vpop.permute.xlu0 %4060 }
 0x6b1   : >> { %v4059_v45 = vpop.permute.xlu1 %4058  ;;  %4656 = vmatmul.mubr.bf16.vlgmr.msra.gmra.mrb[16].mxu0 %v6975_v12 }
 0x6b2   : >> { %v8745_v3 = vsel %vm584_vm2, %v4059_v45, %v4061_v47  ;;  %v4084_v18 = vsel %vm584_vm2, %v4061_v47, %v4059_v45  ;;  %4697 = vmatpush1.bf16.msra.mxu0 %v8510_v17  ;;  %4665 = vmatprep.mubr.bf16.mxu0 %v6984_v8  ;;  %v6987_v17 = vld [vmem:[%s7943_s6 + $0x234] ss:$20 sps:$4 sm:$0xff]  }
 0x6b3   : >> { %v4118_v26 = vmul.bf16 %v8726_v58, %v8745_v3  ;;  %v4119_v20 = vmul.bf16 %v8729_v48, %v4084_v18  ;;  %4698 = vmatprep.subr.bf16.mxu0 %v8520_v55  ;;  %v4186_v55 = vpack.i.b16 %v6314_v63, %v6314_v63 }
 0x6b4   : >> { %v4065_v14 = vpop.permute.xlu0 %4064 }
 0x6b5   : >> { %v4063_v4 = vpop.permute.xlu1 %4062  ;;  %v8776_v41 = vrot.slane %v4186_v55, %v7597_v9 }
 0x6b6   : >> { %v8755_v56 = vsel %vm584_vm2, %v4063_v4, %v4065_v14  ;;  %v4088_v1 = vsel %vm584_vm2, %v4065_v14, %v4063_v4  ;;  %4699 = vmatpush1.bf16.msra.mxu0 %v8518_v23  ;;  %v6992_v14 = vld [vmem:[%s7943_s6 + $0x258] ss:$20 sps:$4 sm:$0xff]  }
 0x6b7   : >> { %v4120_v53 = vmul.bf16 %v8726_v58, %v8755_v56  ;;  %v4121_v32 = vmul.bf16 %v8729_v48, %v4088_v1  ;;  %4700 = vmatprep.subr.bf16.mxu0 %v8529_v7  ;;  %v8773_v7 = vrot.slane %v4179_v34, %v7597_v9  ;;  %v6995_v56 = vld [vmem:[%s7943_s6 + $0x1ec] ss:$20 sps:$4 sm:$0xff]  }
 0x6b8   : >> { %v4069_v29 = vpop.permute.xlu0 %4068 }
 0x6b9   : >> { %v4067_v33 = vpop.permute.xlu1 %4066  ;;  %4666 = vmatmul.mubr.bf16.gmra.mrb[20].mxu0 %v6986_v22 }
 0x6ba   : >> { %v8765_v38 = vsel %vm584_vm2, %v4067_v33, %v4069_v29  ;;  %v4092_v23 = vsel %vm584_vm2, %v4069_v29, %v4067_v33  ;;  %4701 = vmatpush1.bf16.msra.mxu0 %v8527_v57  ;;  %4675 = vmatprep.mubr.bf16.mxu0 %v6987_v17 }
 0x6bb   : >> { %v4122_v40 = vmul.bf16 %v8726_v58, %v8765_v38  ;;  %v4123_v24 = vmul.bf16 %v8729_v48, %v4092_v23  ;;  %4702 = vmatprep.subr.bf16.mxu0 %v8537_v39  ;;  %v6990_v48 = vld [vmem:[%s7943_s6 + $0x25c] ss:$20 sps:$4 sm:$0xff]   ;;  %v6315_v39 = vcombine.low %v4248_v44, %v4248_v44 }
 0x6bc   : >> { %v4135_v30 = vpop.permute.xlu0 %4134 }
 0x6bd   : >> { %v4133_v57 = vpop.permute.xlu1 %4132  ;;  %v4255_v18 = vshrl.u32 %v6315_v39, 16 }
 0x6be   : >> { %v4148_v31 = vsel %vm664_vm4, %v4133_v57, %v4135_v30  ;;  %v4158_v58 = vsel %vm664_vm4, %v4135_v30, %v4133_v57  ;;  %4703 = vmatpush1.bf16.msra.mxu0 %v8535_v35 }
 0x6bf   : >> { %v4192_v12 = vmul.bf16 %v8773_v7, %v4148_v31  ;;  %v4193_v60 = vmul.bf16 %v8776_v41, %v4158_v58  ;;  %4704 = vmatprep.subr.bf16.mxu0 %v4117_v28  ;;  %v4263_v28 = vshrl.u32 %v6316_v49, 16  ;;  %v4256_v17 = vpack.i.b16 %v4255_v18, %v4255_v18  ;;  %v4326_v31 = vld [vmem:[%s9278_s3 + $0x8] sm:$0x11] }
 0x6c0   : >> { %v4139_v8 = vpop.permute.xlu0 %4138  ;;  %v6317_v49 = vcombine.low %v4326_v31, %v4326_v31 }
 0x6c1   : >> { %v4137_v47 = vpop.permute.xlu1 %4136  ;;  %4676 = vmatmul.mubr.bf16.gmra.mrb[24].mxu0 %v6989_v43  ;;  %v4264_v34 = vpack.i.b16 %v4263_v28, %v4263_v28  ;;  %v8804_v23 = vrot.slane %v4256_v17, %v7597_v9 }
 0x6c2   : >> { %v4149_v19 = vsel %vm664_vm4, %v4137_v47, %v4139_v8  ;;  %v4162_v45 = vsel %vm664_vm4, %v4139_v8, %v4137_v47  ;;  %4705 = vmatpush1.bf16.msra.mxu0 %v4116_v16  ;;  %4685 = vmatprep.mubr.bf16.mxu0 %v6990_v48  ;;  %v6318_v8 = vcombine.high %v4326_v31, %v4326_v31 }
 0x6c3   : >> { %v4194_v35 = vmul.bf16 %v8773_v7, %v4149_v19  ;;  %v4195_v3 = vmul.bf16 %v8776_v41, %v4162_v45  ;;  %4706 = vmatprep.subr.bf16.mxu0 %v4119_v20  ;;  %v8807_v30 = vrot.slane %v4264_v34, %v7597_v9 }
 0x6c4   : >> { %v4143_v11 = vpop.permute.xlu0 %4142 }
 0x6c5   : >> { %v4141_v63 = vpop.permute.xlu1 %4140 }
 0x6c6   : >> { %v4150_v4 = vsel %vm664_vm4, %v4141_v63, %v4143_v11  ;;  %v4166_v22 = vsel %vm664_vm4, %v4143_v11, %v4141_v63  ;;  %4707 = vmatpush1.bf16.msra.mxu0 %v4118_v26  ;;  %v4333_v11 = vpack.i.b16 %v6317_v49, %v6317_v49 }
 0x6c7   : >> { %v4196_v1 = vmul.bf16 %v8773_v7, %v4150_v4  ;;  %v4197_v16 = vmul.bf16 %v8776_v41, %v4166_v22  ;;  %4708 = vmatprep.subr.bf16.mxu0 %v4121_v32 }
 0x6c8   : >> { %v4147_v55 = vpop.permute.xlu0 %4146 }
 0x6c9   : >> { %v4145_v20 = vpop.permute.xlu1 %4144  ;;  %4686 = vmatmul.mubr.bf16.gmra.mrb[28].mxu0 %v6992_v14 }
 0x6ca   : >> { %v4151_v29 = vsel %vm664_vm4, %v4145_v20, %v4147_v55  ;;  %v4170_v33 = vsel %vm664_vm4, %v4147_v55, %v4145_v20  ;;  %4709 = vmatpush1.bf16.msra.mxu0 %v4120_v53  ;;  %4728 = vmatprep.mubr.bf16.mxu0 %v6995_v56 }
 0x6cb   : >> { %v4198_v38 = vmul.bf16 %v8773_v7, %v4151_v29  ;;  %v4199_v26 = vmul.bf16 %v8776_v41, %v4170_v33  ;;  %4710 = vmatprep.subr.bf16.mxu0 %v4123_v24 }
 0x6cc   : >> { %v4211_v32 = vpop.permute.xlu0 %4210 }
 0x6cd   : >> { %v4209_v44 = vpop.permute.xlu1 %4208 }
 0x6ce   : >> { %v4224_v57 = vsel %vm742_vm6, %v4209_v44, %v4211_v32  ;;  %v4234_v43 = vsel %vm742_vm6, %v4211_v32, %v4209_v44  ;;  %4711 = vmatpush1.bf16.msra.mxu0 %v4122_v40 }
 0x6cf   : >> { %v4270_v53 = vmul.bf16 %v8804_v23, %v4224_v57  ;;  %v4271_v7 = vmul.bf16 %v8807_v30, %v4234_v43  ;;  %4712 = vmatprep.subr.bf16.mxu0 %v4193_v60 }
 0x6d0   : >> { %v4215_v41 = vpop.permute.xlu0 %4214 }
 0x6d1   : >> { %v4213_v58 = vpop.permute.xlu1 %4212 }
 0x6d2   : >> { %v4225_v24 = vsel %vm742_vm6, %v4213_v58, %v4215_v41  ;;  %v4238_v48 = vsel %vm742_vm6, %v4215_v41, %v4213_v58  ;;  %4713 = vmatpush1.bf16.msra.mxu0 %v4192_v12  ;;  %v4340_v12 = vpack.i.b16 %v6318_v8, %v6318_v8  ;;  %v7002_v8 = vld [vmem:[%s7943_s6 + $0x240] ss:$20 sps:$4 sm:$0xff]  }
 0x6d3   : >> { %v4272_v39 = vmul.bf16 %v8804_v23, %v4225_v24  ;;  %v4273_v40 = vmul.bf16 %v8807_v30, %v4238_v48  ;;  %4714 = vmatprep.subr.bf16.mxu0 %v4195_v3 }
 0x6d4   : >> { %v4219_v47 = vpop.permute.xlu0 %4218  ;;  %v4345_v17 = vrot.slane %v4340_v12, %v7466_v15  ;;  %v7007_v12 = vld [vmem:[%s7943_s6 + $0x1f0] ss:$20 sps:$4 sm:$0xff]  }
 0x6d5   : >> { %v4217_v60 = vpop.permute.xlu1 %4216 }
 0x6d6   : >> { %v4226_v19 = vsel %vm742_vm6, %v4217_v60, %v4219_v47  ;;  %v4242_v45 = vsel %vm742_vm6, %v4219_v47, %v4217_v60  ;;  %4715 = vmatpush1.bf16.msra.mxu0 %v4194_v35  ;;  %v4338_v35 = vrot.slane %v4333_v11, %v7466_v15  ;;  %v6996_v47 = vld [vmem:[%s7943_s6 + $0x214] ss:$20 sps:$4 sm:$0xff]   ;;  %v6998_v60 = vld [vmem:[%s7943_s6 + $0x210] ss:$20 sps:$4 sm:$0xff]  }
 0x6d7   : >> { %v4274_v18 = vmul.bf16 %v8804_v23, %v4226_v19  ;;  %v4275_v28 = vmul.bf16 %v8807_v30, %v4242_v45  ;;  %4716 = vmatprep.subr.bf16.mxu0 %v4197_v16  ;;  %v7006_v19 = vld [vmem:[%s7943_s6 + $0x268] ss:$20 sps:$4 sm:$0xff]   ;;  %v7005_v11 = vld [vmem:[%s7943_s6 + $0x260] ss:$20 sps:$4 sm:$0xff]  }
 0x6d8   : >> { %v4223_v63 = vpop.permute.xlu0 %4222  ;;  %v6999_v45 = vld [vmem:[%s7943_s6 + $0x23c] ss:$20 sps:$4 sm:$0xff]  }
 0x6d9   : >> { %v4221_v14 = vpop.permute.xlu1 %4220 }
 0x6da   : >> { %v4227_v3 = vsel %vm742_vm6, %v4221_v14, %v4223_v63  ;;  %v4246_v4 = vsel %vm742_vm6, %v4223_v63, %v4221_v14  ;;  %4717 = vmatpush1.bf16.msra.mxu0 %v4196_v1  ;;  %v7008_v63 = vld [vmem:[%s7943_s6 + $0x218] ss:$20 sps:$4 sm:$0xff]  }
 0x6db   : >> { %v4276_v22 = vmul.bf16 %v8804_v23, %v4227_v3  ;;  %v4277_v56 = vmul.bf16 %v8807_v30, %v4246_v4  ;;  %4718 = vmatprep.subr.bf16.mxu0 %v4199_v26 }
 0x6dc   : >> { %v4289_v34 = vpop.permute.xlu0 %4288 }
 0x6dd   : >> { %v4287_v55 = vpop.permute.xlu1 %4286 }
 0x6de   : >> { %v4302_v16 = vsel %vm822_vm7, %v4287_v55, %v4289_v34  ;;  %v4312_v20 = vsel %vm822_vm7, %v4289_v34, %v4287_v55  ;;  %4719 = vmatpush1.bf16.msra.mxu0 %v4198_v38 }
 0x6df   : >> { %v4346_v29 = vmul.bf16 %v4338_v35, %v4302_v16  ;;  %v4347_v33 = vmul.bf16 %v4345_v17, %v4312_v20  ;;  %4720 = vmatprep.subr.bf16.mxu0 %v4271_v7 }
 0x6e0   : >> { %v4293_v1 = vpop.permute.xlu0 %4292 }
 0x6e1   : >> { %v4291_v32 = vpop.permute.xlu1 %4290  ;;  %6485 = vmatprep.subr.bf16.mxu1 %v4347_v33 }
 0x6e2   : >> { %v4303_v23 = vsel %vm822_vm7, %v4291_v32, %v4293_v1  ;;  %v4316_v30 = vsel %vm822_vm7, %v4293_v1, %v4291_v32  ;;  %4721 = vmatpush1.bf16.msra.mxu0 %v4270_v53  ;;  %6489 = vmatpush1.bf16.msra.mxu1 %v4346_v29 }
 0x6e3   : >> { %v4348_v26 = vmul.bf16 %v4338_v35, %v4303_v23  ;;  %v4349_v44 = vmul.bf16 %v4345_v17, %v4316_v30  ;;  %4722 = vmatprep.subr.bf16.mxu0 %v4273_v40 }
 0x6e4   : >> { %v4297_v57 = vpop.permute.xlu0 %4296 }
 0x6e5   : >> { %v4295_v43 = vpop.permute.xlu1 %4294  ;;  %6486 = vmatprep.subr.bf16.mxu1 %v4349_v44 }
 0x6e6   : >> { %v4304_v38 = vsel %vm822_vm7, %v4295_v43, %v4297_v57  ;;  %v4320_v41 = vsel %vm822_vm7, %v4297_v57, %v4295_v43  ;;  %4723 = vmatpush1.bf16.msra.mxu0 %v4272_v39  ;;  %6490 = vmatpush1.bf16.msra.mxu1 %v4348_v26  ;;  %v6993_v39 = vld [vmem:[%s7943_s6 + $0x1e8] ss:$20 sps:$4 sm:$0xff]  }
 0x6e7   : >> { %v4350_v7 = vmul.bf16 %v4338_v35, %v4304_v38  ;;  %v4351_v31 = vmul.bf16 %v4345_v17, %v4320_v41  ;;  %4724 = vmatprep.subr.bf16.mxu0 %v4275_v28  ;;  %v7003_v28 = vld [vmem:[%s7943_s6 + $0x264] ss:$20 sps:$4 sm:$0xff]  }
 0x6e8   : >> { %v4301_v53 = vpop.permute.xlu0 %4300 }
 0x6e9   : >> { %v4299_v58 = vpop.permute.xlu1 %4298  ;;  %6487 = vmatprep.subr.bf16.mxu1 %v4351_v31 }
 0x6ea   : >> { %v4305_v24 = vsel %vm822_vm7, %v4299_v58, %v4301_v53  ;;  %v4324_v48 = vsel %vm822_vm7, %v4301_v53, %v4299_v58  ;;  %4725 = vmatpush1.bf16.msra.mxu0 %v4274_v18  ;;  %6491 = vmatpush1.bf16.msra.mxu1 %v4350_v7  ;;  %v7001_v18 = vld [vmem:[%s7943_s6 + $0x238] ss:$20 sps:$4 sm:$0xff]  }
 0x6eb   : >> { %v4352_v40 = vmul.bf16 %v4338_v35, %v4305_v24  ;;  %v4353_v49 = vmul.bf16 %v4345_v17, %v4324_v48  ;;  %4726 = vmatprep.subr.bf16.mxu0 %v4277_v56 }
 0x6ed   : >> { %6488 = vmatprep.subr.bf16.mxu1 %v4353_v49 }
 0x6ee   : >> { %4727 = vmatpush1.bf16.msra.mxu0 %v4276_v22  ;;  %6492 = vmatpush1.bf16.msra.mxu1 %v4352_v40 }
 0x6ef   : >> { %4769 = vmatprep.subr.bf16.mxu0 %v4347_v33 }
 0x6f1   : >> { %4729 = vmatmul.mubr.bf16.vlgmr.msra.gmra.mrb[16].mxu0 %v6993_v39  ;;  %6375 = vmatmul.mubr.msk.bf16.vlgmr.msra.gmra.mrb[32].mxu1 %vm1128_vm8, %v7002_v8 }
 0x6f2   : >> { %4770 = vmatpush1.bf16.msra.mxu0 %v4346_v29  ;;  %4738 = vmatprep.mubr.bf16.mxu0 %v6996_v47 }
 0x6f3   : >> { %4771 = vmatprep.subr.bf16.mxu0 %v4349_v44  ;;  %4831 = vmatprep.mubr.bf16.mxu1 %v7250_v27 }
 0x6f6   : >> { %4772 = vmatpush1.bf16.msra.mxu0 %v4348_v26 }
 0x6f7   : >> { %4773 = vmatprep.subr.bf16.mxu0 %v4351_v31 }
 0x6f9   : >> { %4739 = vmatmul.mubr.bf16.gmra.mrb[20].mxu0 %v6998_v60  ;;  %6376 = vmatmul.mubr.msk.bf16.gmra.mrb[36].mxu1 %vm1128_vm8, %v7006_v19  ;;  %v4499_v33 = vpop.permute.xlu0 %4498 }
 0x6fa   : >> { %4774 = vmatpush1.bf16.msra.mxu0 %v4350_v7  ;;  %4748 = vmatprep.mubr.bf16.mxu0 %v6999_v45  ;;  %v4494_v55 = vpop.permute.xlu1 %4493 }
 0x6fb   : >> { %4775 = vmatprep.subr.bf16.mxu0 %v4353_v49 }
 0x6fe   : >> { %4776 = vmatpush1.bf16.msra.mxu0 %v4352_v40  ;;  %v4504_v31 = vpop.permute.xlu1 %4503  ;;  %v4509_v40 = vpop.permute.xlu0 %4508 }
 0x701   : >> { %4749 = vmatmul.mubr.bf16.gmra.mrb[24].mxu0 %v7001_v18 }
 0x702   : >> { %4758 = vmatprep.mubr.bf16.mxu0 %v7003_v28 }
 0x709   : >> { %4759 = vmatmul.mubr.bf16.gmra.mrb[28].mxu0 %v7005_v11 }
 0x70a   : >> { %4801 = vmatprep.mubr.bf16.mxu0 %v7250_v27 }
 0x711   : >> { %6373 = vmatmul.mubr.msk.bf16.vlgmr.msra.gmra.mrb[16].mxu0 %vm1128_vm8, %v7007_v12 }
 0x712   : >> { %4811 = vmatprep.mubr.bf16.mxu0 %v7250_v27 }
 0x719   : >> { %6374 = vmatmul.mubr.msk.bf16.gmra.mrb[20].mxu0 %vm1128_vm8, %v7008_v63 }
 0x7c4   : >> { %v4823_v14 = vpop.f32.mrb[32].mxu1 }
 0x7c5   : >> { %v4825_v3 = vpop.f32.mrb[33].mxu1 }
 0x7c6   : >> { %v4827_v4 = vpop.f32.mrb[34].mxu1 }
 0x7c7   : >> { %v4829_v22 = vpop.f32.mrb[35].mxu1 }
 0x7cc   : >> { %v4833_v56 = vpop.f32.mrb[36].mxu1 }
 0x7cd   : >> { %v4835_v35 = vpop.f32.mrb[37].mxu1 }
 0x7ce   : >> { %v4837_v17 = vpop.f32.mrb[38].mxu1 }
 0x7cf   : >> { %v4839_v34 = vpop.f32.mrb[39].mxu1 }
 0x7d4   : >> { %v4750_v16 = vpop.f32.mrb[24].mxu0 }
 0x7d5   : >> { %v6549_v20 = vadd.f32 %v4750_v16, %v4494_v55  ;;  %v4752_v29 = vpop.f32.mrb[25].mxu0 }
 0x7d6   : >> { %v6551_v1 = vadd.f32 %v4752_v29, %v4494_v55  ;;  %v4754_v32 = vpop.f32.mrb[26].mxu0 }
 0x7d7   : >> { %v6553_v23 = vadd.f32 %v4754_v32, %v4499_v33  ;;  %v6550_v27 = vadd.f32 %v6549_v20, %v4823_v14  ;;  %v4756_v30 = vpop.f32.mrb[27].mxu0  ;;  %v4479_v20 = vpop.permute.xlu0 %4478 }
 0x7d8   : >> { %v6555_v26 = vadd.f32 %v4756_v30, %v4499_v33  ;;  %v6552_v44 = vadd.f32 %v6551_v1, %v4825_v3 }
 0x7d9   : >> { %v4850_v57 = vmax.f32 %v6550_v27, 0.0  ;;  %v6554_v43 = vadd.f32 %v6553_v23, %v4827_v4  ;;  %v4474_v4 = vpop.permute.xlu1 %4473 }
 0x7da   : >> { %v4851_v38 = vmax.f32 %v6552_v44, 0.0  ;;  %v6556_v41 = vadd.f32 %v6555_v26, %v4829_v22 }
 0x7db   : >> { %v4852_v7 = vmax.f32 %v6554_v43, 0.0  ;;  %v8857_v61 = vadd.f32 %v7192_v61, %v4850_v57  }
 0x7dc   : >> { %v4853_v53 = vmax.f32 %v6556_v41, 0.0  ;;  %v4760_v58 = vpop.f32.mrb[28].mxu0  ;;  %v8863_v2 = vadd.f32 %v7188_v2, %v4851_v38  }
 0x7dd   : >> { %v8860_v10 = vadd.f32 %v7184_v10, %v4852_v7   ;;  %v6557_v24 = vadd.f32 %v4760_v58, %v4504_v31  ;;  %v4762_v48 = vpop.f32.mrb[29].mxu0  ;;  %v4484_v44 = vpop.permute.xlu1 %4483 }
 0x7de   : >> { %v8866_v62 = vadd.f32 %v7180_v62, %v4853_v53   ;;  %v6559_v49 = vadd.f32 %v4762_v48, %v4504_v31  ;;  %v4764_v39 = vpop.f32.mrb[30].mxu0  ;;  %v4489_v7 = vpop.permute.xlu0 %4488 }
 0x7df   : >> { %v4878_v8 = vpack.c.bf16 %v8860_v10, %v8857_v61  ;;  %v6561_v47 = vadd.f32 %v4764_v39, %v4509_v40  ;;  %v6558_v60 = vadd.f32 %v6557_v24, %v4833_v56  ;;  %v4766_v19 = vpop.f32.mrb[31].mxu0 }
 0x7e0   : >> { %v4879_v45 = vpack.c.bf16 %v8866_v62, %v8863_v2  ;;  %v6563_v18 = vadd.f32 %v4766_v19, %v4509_v40  ;;  %v6560_v28 = vadd.f32 %v6559_v49, %v4835_v35  ;;  %v7028_v62 = vld [vmem:[#allocation4 + $0xa04] ss:$20 sps:$4 sm:$0xff] (%p8885_p3)  }
 0x7e1   : >> { %4886 = vst [vmem:[#allocation2 + $0x20] sm:$0xff] %v4878_v8  ;;  %v4854_v11 = vmax.f32 %v6558_v60, 0.0  ;;  %v6562_v12 = vadd.f32 %v6561_v47, %v4837_v17  ;;  %5813 = vmatprep.mubr.bf16.mxu1 (%p8885_p3), %v7028_v62 }
 0x7e2   : >> { %4887 = vst [vmem:[#allocation2 + $0x28] sm:$0xff] %v4879_v45  ;;  %v4855_v63 = vmax.f32 %v6560_v28, 0.0  ;;  %v6564_v14 = vadd.f32 %v6563_v18, %v4839_v34 }
 0x7e3   : >> { %v4856_v3 = vmax.f32 %v6562_v12, 0.0  ;;  %v4870_v36 = vadd.f32 %v7176_v36, %v4854_v11   ;;  %v5262_v12 = vld [vmem:[%s9278_s3] sm:$0x44] (%p8885_p3) }
 0x7e4   : >> { %v4857_v22 = vmax.f32 %v6564_v14, 0.0  ;;  %v4803_v55 = vpop.f32.mrb[16].mxu0  ;;  %v4871_v42 = vadd.f32 %v7172_v42, %v4855_v63  }
 0x7e5   : >> { %v4872_v37 = vadd.f32 %v7168_v37, %v4856_v3   ;;  %v6541_v56 = vadd.f32 %v4803_v55, %v4474_v4  ;;  %v4805_v16 = vpop.f32.mrb[17].mxu0 }
 0x7e6   : >> { %v4873_v6 = vadd.f32 %v7164_v6, %v4857_v22   ;;  %v6542_v35 = vadd.f32 %v4805_v16, %v4474_v4  ;;  %v4807_v17 = vpop.f32.mrb[18].mxu0  ;;  %v6386_v16 = vcombine.high (%p8885_p3), %v5262_v12, %v5262_v12 }
 0x7e7   : >> { %v4880_v29 = vpack.c.bf16 %v4872_v37, %v4870_v36  ;;  %v4842_v33 = vmax.f32 %v6541_v56, 0.0  ;;  %v6543_v34 = vadd.f32 %v4807_v17, %v4479_v20  ;;  %v4809_v1 = vpop.f32.mrb[19].mxu0  ;;  %v5022_v37 = vld [vmem:[%s9278_s3] sm:$0x11] (%p8885_p3)  ;;  %v6385_v56 = vcombine.low (%p8885_p3), %v5262_v12, %v5262_v12 }
 0x7e8   : >> { %v4881_v32 = vpack.c.bf16 %v4873_v6, %v4871_v42  ;;  %v4843_v23 = vmax.f32 %v6542_v35, 0.0  ;;  %v6544_v27 = vadd.f32 %v4809_v1, %v4479_v20  ;;  %v8943_v11 = vld [vmem:[#allocation2 + $0x20] sm:$0xff] (%p8885_p3) }
 0x7e9   : >> { %4888 = vst [vmem:[#allocation2 + $0x30] sm:$0xff] %v4880_v29  ;;  %v4844_v30 = vmax.f32 %v6543_v34, 0.0  ;;  %v4858_v5 = vadd.f32 %v7224_v5, %v4842_v33   ;;  %v8945_v61 = vld [vmem:[#allocation2 + $0x28] sm:$0xff] (%p8885_p3) }
 0x7ea   : >> { %4889 = vst [vmem:[#allocation2 + $0x38] sm:$0xff] %v4881_v32  ;;  %v4845_v26 = vmax.f32 %v6544_v27, 0.0  ;;  %v4859_v13 = vadd.f32 %v7220_v13, %v4843_v23  }
 0x7eb   : >> { %v4860_v21 = vadd.f32 %v7216_v21, %v4844_v30   ;;  %v5269_v30 = vshrl.u32 (%p8885_p3), %v6385_v56, 16 }
 0x7ec   : >> { %v4861_v25 = vadd.f32 %v7212_v25, %v4845_v26   ;;  %v4813_v57 = vpop.f32.mrb[20].mxu0 }
 0x7ed   : >> { %v4874_v43 = vpack.c.bf16 %v4860_v21, %v4858_v5  ;;  %v6545_v38 = vadd.f32 %v4813_v57, %v4484_v44  ;;  %v4815_v41 = vpop.f32.mrb[21].mxu0  ;;  %v7031_v21 = vld [vmem:[#allocation4 + $0xa0c] ss:$20 sps:$4 sm:$0xff] (%p8885_p3)  }
 0x7ee   : >> { %v4875_v31 = vpack.c.bf16 %v4861_v25, %v4859_v13  ;;  %v6546_v53 = vadd.f32 %v4815_v41, %v4484_v44  ;;  %v4817_v58 = vpop.f32.mrb[22].mxu0  ;;  %5872 = vmatprep.mubr.bf16.mxu0 (%p8885_p3), %v7031_v21  ;;  %v4946_v13 = vld [vmem:[%s9278_s3] sm:$0x11] (%p8885_p3) }
 0x7ef   : >> { %4882 = vst [vmem:[#allocation2] sm:$0xff] %v4874_v43  ;;  %v4846_v24 = vmax.f32 %v6545_v38, 0.0  ;;  %v6547_v48 = vadd.f32 %v4817_v58, %v4489_v7  ;;  %v4819_v40 = vpop.f32.mrb[23].mxu0  ;;  %v6377_v25 = vcombine.low (%p8885_p3), %v4946_v13, %v4946_v13  ;;  %v6378_v36 = vcombine.high (%p8885_p3), %v4946_v13, %v4946_v13 }
 0x7f0   : >> { %4883 = vst [vmem:[#allocation2 + $0x8] sm:$0xff] %v4875_v31  ;;  %v4847_v49 = vmax.f32 %v6546_v53, 0.0  ;;  %v6548_v39 = vadd.f32 %v4819_v40, %v4489_v7  ;;  %v8947_v10 = vld [vmem:[#allocation2 + $0x30] sm:$0xff] (%p8885_p3)  ;;  %v5277_v43 = vshrl.u32 (%p8885_p3), %v6386_v16, 16 }
 0x7f1   : >> { %v4848_v8 = vmax.f32 %v6547_v48, 0.0  ;;  %v4862_v50 = vadd.f32 %v7208_v50, %v4846_v24   ;;  %v8949_v2 = vld [vmem:[#allocation2 + $0x38] sm:$0xff] (%p8885_p3)  ;;  %v4953_v42 = vpack.i.b16 (%p8885_p3), %v6377_v25, %v6377_v25  ;;  %v4960_v6 = vpack.i.b16 (%p8885_p3), %v6378_v36, %v6378_v36 }
 0x7f2   : >> { %v4849_v47 = vmax.f32 %v6548_v39, 0.0  ;;  %v4863_v51 = vadd.f32 %v7204_v51, %v4847_v49   ;;  %v5270_v48 = vpack.i.b16 (%p8885_p3), %v5269_v30, %v5269_v30  ;;  %v5278_v40 = vpack.i.b16 (%p8885_p3), %v5277_v43, %v5277_v43  ;;  %v5340_v30 = vld [vmem:[%s9278_s3] sm:$0x88] (%p8885_p3) }
 0x7f3   : >> { %v4864_v59 = vadd.f32 %v7200_v59, %v4848_v8   ;;  %v4958_v63 = vrot.slane (%p8885_p3), %v4953_v42, %v7466_v15  ;;  %v4965_v14 = vrot.slane (%p8885_p3), %v4960_v6, %v7466_v15 }
 0x7f4   : >> { %v4865_v54 = vadd.f32 %v7196_v54, %v4849_v47  }
 0x7f5   : >> { %v4876_v60 = vpack.c.bf16 %v4864_v59, %v4862_v50  ;;  %1396 = sbr.rel (!%p8885_p3) target bundleno = 535 (0x217), region = 86 }
 0x7f6   : >> { %v4877_v19 = vpack.c.bf16 %v4865_v54, %v4863_v51  ;;  %v8941_v5 = vld [vmem:[#allocation2] sm:$0xff] (%p8885_p3)  ;;  %v6379_v51 = vcombine.low (%p8885_p3), %v5022_v37, %v5022_v37  ;;  %v6380_v54 = vcombine.high (%p8885_p3), %v5022_v37, %v5022_v37 }
 0x7f7   : >> { %4884 = vst [vmem:[#allocation2 + $0x10] sm:$0xff] %v4876_v60  ;;  %v8931_v18 = vld [vmem:[#allocation2 + $0x8] sm:$0xff] (%p8885_p3) }
 0x7f8   : >> { %4885 = vst [vmem:[#allocation2 + $0x18] sm:$0xff] %v4877_v19  ;;  %4902 = vrot.lane.b32.xlu0 (%p8885_p3), %v8931_v18, %s7234_s7  ;;  %5840 = vmatprep.subr.bf16.mxu0 (%p8885_p3), %v8931_v18  ;;  %v5029_v22 = vshrl.u32 (%p8885_p3), %v6379_v51, 16  ;;  %v5037_v55 = vshrl.u32 (%p8885_p3), %v6380_v54, 16  ;;  %v6393_v54 = vld [vmem:[%s9277_s2 + $0x400] sm:$0xff] (%p8885_p3) }
 0x7f9   : > { %5841 = vmatpush1.bf16.msra.mxu0 (%p8885_p3), %v8941_v5 }
 0x7fa   : > { %v5030_v57 = vpack.i.b16 (%p8885_p3), %v5029_v22, %v5029_v22  ;;  %v5038_v7 = vpack.i.b16 (%p8885_p3), %v5037_v55, %v5037_v55 }
 0x7fc   : > { %4914 = vrot.lane.b32.xlu0 %v8941_v5, %s7234_s7  ;;  %v9103_v8 = vrot.slane %v5030_v57, %v7466_v15  ;;  %v9106_v47 = vrot.slane %v5038_v7, %v7466_v15 }
 0x7fe   : > { %v8933_v28 = vld [vmem:[#allocation2 + $0x10] sm:$0xff] }
 0x7ff   : > { %v8929_v45 = vld [vmem:[#allocation2 + $0x18] sm:$0xff] }
 0x800   : > { %4904 = vrot.lane.b32.xlu1 %v8929_v45, %s7234_s7  ;;  %5217 = vst [vmem:[#allocation3 + $0x118] sm:$0xff] %v8929_v45  ;;  %5842 = vmatprep.subr.bf16.mxu0 %v8929_v45 }
 0x801   : > { %5843 = vmatpush1.bf16.msra.mxu0 %v8933_v28  ;;  %4906 = vrot.lane.b32.xlu0 %v8945_v61, %s7234_s7 }
 0x802   : > { %5844 = vmatprep.subr.bf16.mxu0 %v8945_v61 }
 0x804   : > { %4916 = vrot.lane.b32.xlu1 %v8933_v28, %s7234_s7 }
 0x805   : > { %5845 = vmatpush1.bf16.msra.mxu0 %v8943_v11  ;;  %4908 = vrot.lane.b32.xlu0 %v8949_v2, %s7234_s7 }
 0x806   : > { %5846 = vmatprep.subr.bf16.mxu0 %v8949_v2 }
 0x808   : > { %4918 = vrot.lane.b32.xlu1 %v8943_v11, %s7234_s7 }
 0x809   : > { %5847 = vmatpush1.bf16.msra.mxu0 %v8947_v10  ;;  %4982 = vrot.lane.b32.xlu0 %v8931_v18, %s7235_s16 }
 0x80c   : > { %4920 = vrot.lane.b32.xlu1 %v8947_v10, %s7234_s7 }
 0x80d   : > { %5222 = vrot.lane.b32.xlu0 %v8941_v5, %s7236_s18 }
 0x810   : > { %4990 = vrot.lane.b32.xlu1 %v8941_v5, %s7235_s16 }
 0x811   : > { %4984 = vrot.lane.b32.xlu0 %v8929_v45, %s7235_s16 }
 0x814   : > { %5224 = vrot.lane.b32.xlu1 %v8931_v18, %s7236_s18 }
 0x815   : > { %5226 = vrot.lane.b32.xlu0 %v8933_v28, %s7236_s18 }
 0x818   : > { %4992 = vrot.lane.b32.xlu1 %v8933_v28, %s7235_s16 }
 0x819   : > { %4986 = vrot.lane.b32.xlu0 %v8945_v61, %s7235_s16 }
 0x81c   : > { %5228 = vrot.lane.b32.xlu1 %v8929_v45, %s7236_s18 }
 0x81d   : > { %5230 = vrot.lane.b32.xlu0 %v8943_v11, %s7236_s18 }
 0x820   : > { %4994 = vrot.lane.b32.xlu1 %v8943_v11, %s7235_s16 }
 0x821   : > { %4988 = vrot.lane.b32.xlu0 %v8949_v2, %s7235_s16 }
 0x824   : > { %5232 = vrot.lane.b32.xlu1 %v8945_v61, %s7236_s18 }
 0x825   : > { %5234 = vrot.lane.b32.xlu0 %v8947_v10, %s7236_s18 }
 0x828   : > { %4996 = vrot.lane.b32.xlu1 %v8947_v10, %s7235_s16 }
 0x829   : > { %5060 = vrot.lane.b32.xlu0 %v8931_v18, %s7237_s19 }
 0x82c   : > { %5236 = vrot.lane.b32.xlu1 %v8949_v2, %s7236_s18 }
 0x82d   : > { %5300 = vrot.lane.b32.xlu0 %v8941_v5, %s7238_s20 }
 0x830   : > { %5068 = vrot.lane.b32.xlu1 %v8941_v5, %s7237_s19 }
 0x831   : > { %5062 = vrot.lane.b32.xlu0 %v8929_v45, %s7237_s19 }
 0x834   : > { %5302 = vrot.lane.b32.xlu1 %v8931_v18, %s7238_s20 }
 0x835   : > { %5304 = vrot.lane.b32.xlu0 %v8933_v28, %s7238_s20 }
 0x838   : > { %5070 = vrot.lane.b32.xlu1 %v8933_v28, %s7237_s19 }
 0x839   : > { %5064 = vrot.lane.b32.xlu0 %v8945_v61, %s7237_s19 }
 0x83c   : > { %5306 = vrot.lane.b32.xlu1 %v8929_v45, %s7238_s20 }
 0x83d   : > { %5308 = vrot.lane.b32.xlu0 %v8943_v11, %s7238_s20 }
 0x840   : > { %5072 = vrot.lane.b32.xlu1 %v8943_v11, %s7237_s19 }
 0x841   : > { %5066 = vrot.lane.b32.xlu0 %v8949_v2, %s7237_s19 }
 0x844   : > { %5310 = vrot.lane.b32.xlu1 %v8945_v61, %s7238_s20 }
 0x845   : > { %5312 = vrot.lane.b32.xlu0 %v8947_v10, %s7238_s20 }
 0x848   : > { %5074 = vrot.lane.b32.xlu1 %v8947_v10, %s7237_s19 }
 0x849   : > { %5136 = vrot.lane.b32.xlu0 %v8931_v18, %s7239_s21 }
 0x84c   : > { %5314 = vrot.lane.b32.xlu1 %v8949_v2, %s7238_s20 }
 0x84d   : > { %5376 = vrot.lane.b32.xlu0 %v8941_v5, %s7240_s22 }
 0x850   : > { %5144 = vrot.lane.b32.xlu1 %v8941_v5, %s7239_s21 }
 0x851   : > { %5138 = vrot.lane.b32.xlu0 %v8929_v45, %s7239_s21 }
 0x854   : > { %5378 = vrot.lane.b32.xlu1 %v8931_v18, %s7240_s22 }
 0x855   : > { %5380 = vrot.lane.b32.xlu0 %v8933_v28, %s7240_s22 }
 0x858   : > { %5146 = vrot.lane.b32.xlu1 %v8933_v28, %s7239_s21 }
 0x859   : > { %5140 = vrot.lane.b32.xlu0 %v8945_v61, %s7239_s21 }
 0x85c   : > { %5382 = vrot.lane.b32.xlu1 %v8929_v45, %s7240_s22 }
 0x85d   : > { %5384 = vrot.lane.b32.xlu0 %v8943_v11, %s7240_s22 }
 0x860   : > { %5148 = vrot.lane.b32.xlu1 %v8943_v11, %s7239_s21 }
 0x861   : > { %5142 = vrot.lane.b32.xlu0 %v8949_v2, %s7239_s21 }
 0x864   : > { %5386 = vrot.lane.b32.xlu1 %v8945_v61, %s7240_s22 }
 0x865   : > { %5388 = vrot.lane.b32.xlu0 %v8947_v10, %s7240_s22 }
 0x868   : > { %5150 = vrot.lane.b32.xlu1 %v8947_v10, %s7239_s21 }
 0x869   : > { %5454 = vrot.lane.b32.xlu0 %v8941_v5, %s7241_s25 }
 0x86a   : > { %v4903_v59 = vpop.permute.xlu0 %4902 }
 0x86c   : > { %5390 = vrot.lane.b32.xlu1 %v8949_v2, %s7240_s22 }
 0x86d   : > { %5458 = vrot.lane.b32.xlu0 %v8933_v28, %s7241_s25 }
 0x86e   : > { %v4915_v4 = vpop.permute.xlu0 %4914 }
 0x86f   : > { %v4922_v17 = vsel %vm260_vm0, %v4915_v4, %v4903_v59  ;;  %v4932_v29 = vsel %vm260_vm0, %v4903_v59, %v4915_v4 }
 0x870   : > { %5456 = vrot.lane.b32.xlu1 %v8931_v18, %s7241_s25  ;;  %v4966_v1 = vmul.bf16 %v4958_v63, %v4932_v29  ;;  %v4967_v32 = vmul.bf16 %v4965_v14, %v4922_v17 }
 0x871   : > { %5462 = vrot.lane.b32.xlu0 %v8943_v11, %s7241_s25  ;;  %v9113_v11 = vrot.slane %v5270_v48, %v7503_v46 }
 0x872   : > { %v4905_v50 = vpop.permute.xlu1 %4904  ;;  %5781 = vmatprep.subr.bf16.mxu1 %v4967_v32 }
 0x873   : > { %v4907_v27 = vpop.permute.xlu0 %4906  ;;  %5782 = vmatpush1.bf16.msra.mxu1 %v4966_v1 }
 0x874   : > { %5460 = vrot.lane.b32.xlu1 %v8929_v45, %s7241_s25 }
 0x875   : > { %5466 = vrot.lane.b32.xlu0 %v8947_v10, %s7241_s25 }
 0x876   : > { %v4917_v3 = vpop.permute.xlu1 %4916 }
 0x877   : > { %v4923_v20 = vsel %vm260_vm0, %v4917_v3, %v4905_v50  ;;  %v4936_v35 = vsel %vm260_vm0, %v4905_v50, %v4917_v3  ;;  %v4909_v53 = vpop.permute.xlu0 %4908 }
 0x878   : > { %v4968_v33 = vmul.bf16 %v4958_v63, %v4936_v35  ;;  %v4969_v34 = vmul.bf16 %v4965_v14, %v4923_v20  ;;  %5464 = vrot.lane.b32.xlu1 %v8945_v61, %s7241_s25  ;;  %v9116_v61 = vrot.slane %v5278_v40, %v7503_v46  ;;  %v5100_v35 = vld [vmem:[%s9278_s3] sm:$0x22] }
 0x879   : > { %5638 = vperm.xlu0 %7009, %v6393_v54   ;;  %v6381_v1 = vcombine.low %v5100_v35, %v5100_v35  ;;  %v6382_v32 = vcombine.high %v5100_v35, %v5100_v35 }
 0x87a   : > { %v4919_v23 = vpop.permute.xlu1 %4918  ;;  %5783 = vmatprep.subr.bf16.mxu1 %v4969_v34 }
 0x87b   : > { %v4924_v26 = vsel %vm260_vm0, %v4919_v23, %v4907_v27  ;;  %v4940_v44 = vsel %vm260_vm0, %v4907_v27, %v4919_v23  ;;  %5784 = vmatpush1.bf16.msra.mxu1 %v4968_v33  ;;  %v4983_v19 = vpop.permute.xlu0 %4982 }
 0x87c   : > { %v4970_v38 = vmul.bf16 %v4958_v63, %v4940_v44  ;;  %v4971_v41 = vmul.bf16 %v4965_v14, %v4924_v26  ;;  %5468 = vrot.lane.b32.xlu1 %v8949_v2, %s7241_s25 }
 0x87e   : > { %v4921_v31 = vpop.permute.xlu1 %4920  ;;  %5785 = vmatprep.subr.bf16.mxu1 %v4971_v41  ;;  %v5114_v41 = vpack.i.b16 %v6382_v32, %v6382_v32 }
 0x87f   : > { %v4925_v58 = vsel %vm260_vm0, %v4921_v31, %v4909_v53  ;;  %v4944_v24 = vsel %vm260_vm0, %v4909_v53, %v4921_v31  ;;  %5786 = vmatpush1.bf16.msra.mxu1 %v4970_v38  ;;  %v5223_v2 = vpop.permute.xlu0 %5222  ;;  %v5107_v38 = vpack.i.b16 %v6381_v1, %v6381_v1  ;;  %v6387_v53 = vcombine.low %v5340_v30, %v5340_v30  ;;  %v5416_v1 = vld [vmem:[%s9278_s3] sm:$0x88] }
 0x880   : > { %v4972_v49 = vmul.bf16 %v4958_v63, %v4944_v24  ;;  %v4973_v39 = vmul.bf16 %v4965_v14, %v4925_v58  ;;  %v6388_v58 = vcombine.high %v5340_v30, %v5340_v30 }
 0x882   : > { %v4991_v60 = vpop.permute.xlu1 %4990  ;;  %5787 = vmatprep.subr.bf16.mxu1 %v4973_v39  ;;  %v9154_v39 = vrot.slane %v5107_v38, %v7577_v52  ;;  %v6389_v38 = vcombine.low %v5416_v1, %v5416_v1 }
 0x883   : > { %v4998_v45 = vsel %vm338_vm1, %v4991_v60, %v4983_v19  ;;  %v5008_v18 = vsel %vm338_vm1, %v4983_v19, %v4991_v60  ;;  %5788 = vmatpush1.bf16.msra.mxu1 %v4972_v49  ;;  %v4985_v37 = vpop.permute.xlu0 %4984  ;;  %v9157_v60 = vrot.slane %v5114_v41, %v7577_v52  ;;  %v5347_v19 = vpack.i.b16 %v6387_v53, %v6387_v53 }
 0x884   : > { %v5044_v28 = vmul.bf16 %v9103_v8, %v5008_v18  ;;  %v5045_v5 = vmul.bf16 %v9106_v47, %v4998_v45  ;;  %v5354_v45 = vpack.i.b16 %v6388_v58, %v6388_v58  ;;  %v6390_v41 = vcombine.high %v5416_v1, %v5416_v1 }
 0x886   : > { %v5225_v10 = vpop.permute.xlu1 %5224  ;;  %5789 = vmatprep.subr.bf16.mxu1 %v5045_v5 }
 0x887   : > { %v5238_v62 = vsel %vm584_vm2, %v5223_v2, %v5225_v10  ;;  %v5248_v21 = vsel %vm584_vm2, %v5225_v10, %v5223_v2  ;;  %5790 = vmatpush1.bf16.msra.mxu1 %v5044_v28  ;;  %v5227_v51 = vpop.permute.xlu0 %5226 }
 0x888   : > { %v5284_v13 = vmul.bf16 %v9113_v11, %v5238_v62  ;;  %v5285_v25 = vmul.bf16 %v9116_v61, %v5248_v21  ;;  %v9166_v21 = vrot.slane %v5347_v19, %v7597_v9 }
 0x88a   : > { %v4993_v36 = vpop.permute.xlu1 %4992  ;;  %5848 = vmatprep.subr.bf16.mxu0 %v5285_v25 }
 0x88b   : > { %v4999_v42 = vsel %vm338_vm1, %v4993_v36, %v4985_v37  ;;  %v5012_v46 = vsel %vm338_vm1, %v4985_v37, %v4993_v36  ;;  %5849 = vmatpush1.bf16.msra.mxu0 %v5284_v13  ;;  %v4987_v22 = vpop.permute.xlu0 %4986 }
 0x88c   : > { %v5046_v6 = vmul.bf16 %v9103_v8, %v5012_v46  ;;  %v5047_v50 = vmul.bf16 %v9106_v47, %v4999_v42 }
 0x88e   : > { %v5229_v59 = vpop.permute.xlu1 %5228  ;;  %5791 = vmatprep.subr.bf16.mxu1 %v5047_v50 }
 0x88f   : > { %v5239_v12 = vsel %vm584_vm2, %v5227_v51, %v5229_v59  ;;  %v5252_v63 = vsel %vm584_vm2, %v5229_v59, %v5227_v51  ;;  %5792 = vmatpush1.bf16.msra.mxu1 %v5046_v6  ;;  %v5231_v29 = vpop.permute.xlu0 %5230 }
 0x890   : > { %v5286_v14 = vmul.bf16 %v9113_v11, %v5239_v12  ;;  %v5287_v3 = vmul.bf16 %v9116_v61, %v5252_v63 }
 0x892   : > { %v4995_v4 = vpop.permute.xlu1 %4994  ;;  %5850 = vmatprep.subr.bf16.mxu0 %v5287_v3 }
 0x893   : > { %v5000_v55 = vsel %vm338_vm1, %v4995_v4, %v4987_v22  ;;  %v5016_v56 = vsel %vm338_vm1, %v4987_v22, %v4995_v4  ;;  %5851 = vmatpush1.bf16.msra.mxu0 %v5286_v14  ;;  %v4989_v44 = vpop.permute.xlu0 %4988 }
 0x894   : > { %v5048_v16 = vmul.bf16 %v9103_v8, %v5016_v56  ;;  %v5049_v20 = vmul.bf16 %v9106_v47, %v5000_v55  ;;  %v5176_v55 = vld [vmem:[%s9278_s3] sm:$0x22] }
 0x896   : > { %v5233_v17 = vpop.permute.xlu1 %5232  ;;  %5793 = vmatprep.subr.bf16.mxu1 %v5049_v20 }
 0x897   : > { %v5240_v33 = vsel %vm584_vm2, %v5231_v29, %v5233_v17  ;;  %v5256_v34 = vsel %vm584_vm2, %v5233_v17, %v5231_v29  ;;  %5794 = vmatpush1.bf16.msra.mxu1 %v5048_v16  ;;  %v5235_v48 = vpop.permute.xlu0 %5234  ;;  %v6383_v17 = vcombine.low %v5176_v55, %v5176_v55  ;;  %v6384_v29 = vcombine.high %v5176_v55, %v5176_v55 }
 0x898   : > { %v5288_v23 = vmul.bf16 %v9113_v11, %v5240_v33  ;;  %v5289_v27 = vmul.bf16 %v9116_v61, %v5256_v34 }
 0x89a   : > { %v4997_v26 = vpop.permute.xlu1 %4996  ;;  %5852 = vmatprep.subr.bf16.mxu0 %v5289_v27 }
 0x89b   : > { %v5001_v57 = vsel %vm338_vm1, %v4997_v26, %v4989_v44  ;;  %v5020_v43 = vsel %vm338_vm1, %v4989_v44, %v4997_v26  ;;  %5853 = vmatpush1.bf16.msra.mxu0 %v5288_v23  ;;  %v5061_v28 = vpop.permute.xlu0 %5060  ;;  %v5183_v26 = vshrl.u32 %v6383_v17, 16  ;;  %v5191_v44 = vshrl.u32 %v6384_v29, 16 }
 0x89c   : > { %v5050_v7 = vmul.bf16 %v9103_v8, %v5020_v43  ;;  %v5051_v31 = vmul.bf16 %v9106_v47, %v5001_v57 }
 0x89e   : > { %v5237_v24 = vpop.permute.xlu1 %5236  ;;  %5795 = vmatprep.subr.bf16.mxu1 %v5051_v31 }
 0x89f   : > { %v5241_v40 = vsel %vm584_vm2, %v5235_v48, %v5237_v24  ;;  %v5260_v49 = vsel %vm584_vm2, %v5237_v24, %v5235_v48  ;;  %5796 = vmatpush1.bf16.msra.mxu1 %v5050_v7  ;;  %v5301_v13 = vpop.permute.xlu0 %5300  ;;  %v5184_v24 = vpack.i.b16 %v5183_v26, %v5183_v26  ;;  %v5192_v48 = vpack.i.b16 %v5191_v44, %v5191_v44 }
 0x8a0   : > { %v5290_v8 = vmul.bf16 %v9113_v11, %v5241_v40  ;;  %v5291_v47 = vmul.bf16 %v9116_v61, %v5260_v49  ;;  %v9169_v11 = vrot.slane %v5354_v45, %v7597_v9 }
 0x8a2   : > { %v5069_v18 = vpop.permute.xlu1 %5068  ;;  %5854 = vmatprep.subr.bf16.mxu0 %v5291_v47  ;;  %v5431_v47 = vshrl.u32 %v6390_v41, 16 }
 0x8a3   : > { %v5076_v5 = vsel %vm418_vm3, %v5069_v18, %v5061_v28  ;;  %v5086_v10 = vsel %vm418_vm3, %v5061_v28, %v5069_v18  ;;  %5855 = vmatpush1.bf16.msra.mxu0 %v5290_v8  ;;  %v5063_v6 = vpop.permute.xlu0 %5062  ;;  %v5423_v8 = vshrl.u32 %v6389_v38, 16 }
 0x8a4   : > { %v5120_v2 = vmul.bf16 %v9154_v39, %v5086_v10  ;;  %v5121_v62 = vmul.bf16 %v9157_v60, %v5076_v5  ;;  %v9204_v5 = vrot.slane %v5184_v24, %v7577_v52  ;;  %v9207_v10 = vrot.slane %v5192_v48, %v7577_v52 }
 0x8a6   : > { %v5303_v61 = vpop.permute.xlu1 %5302  ;;  %5797 = vmatprep.subr.bf16.mxu1 %v5121_v62  ;;  %v5432_v62 = vpack.i.b16 %v5431_v47, %v5431_v47  ;;  %v7026_v47 = vld [vmem:[#allocation4 + $0xa00] ss:$20 sps:$4 sm:$0xff]  }
 0x8a7   : > { %v5316_v25 = vsel %vm664_vm4, %v5301_v13, %v5303_v61  ;;  %v5326_v36 = vsel %vm664_vm4, %v5303_v61, %v5301_v13  ;;  %5798 = vmatpush1.bf16.msra.mxu1 %v5120_v2  ;;  %v5305_v63 = vpop.permute.xlu0 %5304  ;;  %v5424_v2 = vpack.i.b16 %v5423_v8, %v5423_v8 }
 0x8a8   : > { %v5360_v37 = vmul.bf16 %v9166_v21, %v5316_v25  ;;  %v5361_v42 = vmul.bf16 %v9169_v11, %v5326_v36 }
 0x8aa   : > { %v5071_v46 = vpop.permute.xlu1 %5070  ;;  %5856 = vmatprep.subr.bf16.mxu0 %v5361_v42  ;;  %v9216_v42 = vrot.slane %v5424_v2, %v7597_v9 }
 0x8ab   : > { %v5077_v50 = vsel %vm418_vm3, %v5071_v46, %v5063_v6  ;;  %v5090_v59 = vsel %vm418_vm3, %v5063_v6, %v5071_v46  ;;  %5857 = vmatpush1.bf16.msra.mxu0 %v5360_v37  ;;  %v5065_v16 = vpop.permute.xlu0 %5064 }
 0x8ac   : > { %v5122_v51 = vmul.bf16 %v9154_v39, %v5090_v59  ;;  %v5123_v54 = vmul.bf16 %v9157_v60, %v5077_v50 }
 0x8ae   : > { %v5307_v12 = vpop.permute.xlu1 %5306  ;;  %5799 = vmatprep.subr.bf16.mxu1 %v5123_v54 }
 0x8af   : > { %v5317_v14 = vsel %vm664_vm4, %v5305_v63, %v5307_v12  ;;  %v5330_v3 = vsel %vm664_vm4, %v5307_v12, %v5305_v63  ;;  %5800 = vmatpush1.bf16.msra.mxu1 %v5122_v51  ;;  %v5309_v23 = vpop.permute.xlu0 %5308 }
 0x8b0   : > { %v5362_v4 = vmul.bf16 %v9166_v21, %v5317_v14  ;;  %v5363_v22 = vmul.bf16 %v9169_v11, %v5330_v3 }
 0x8b2   : > { %v5073_v56 = vpop.permute.xlu1 %5072  ;;  %5858 = vmatprep.subr.bf16.mxu0 %v5363_v22 }
 0x8b3   : > { %v5078_v20 = vsel %vm418_vm3, %v5073_v56, %v5065_v16  ;;  %v5094_v35 = vsel %vm418_vm3, %v5065_v16, %v5073_v56  ;;  %5859 = vmatpush1.bf16.msra.mxu0 %v5362_v4  ;;  %v5067_v31 = vpop.permute.xlu0 %5066 }
 0x8b4   : > { %v5124_v33 = vmul.bf16 %v9154_v39, %v5094_v35  ;;  %v5125_v34 = vmul.bf16 %v9157_v60, %v5078_v20 }
 0x8b6   : > { %v5311_v32 = vpop.permute.xlu1 %5310  ;;  %5801 = vmatprep.subr.bf16.mxu1 %v5125_v34 }
 0x8b7   : > { %v5318_v27 = vsel %vm664_vm4, %v5309_v23, %v5311_v32  ;;  %v5334_v30 = vsel %vm664_vm4, %v5311_v32, %v5309_v23  ;;  %5802 = vmatpush1.bf16.msra.mxu1 %v5124_v33  ;;  %v5313_v45 = vpop.permute.xlu0 %5312  ;;  %v5494_v32 = vld [vmem:[%s9278_s3 + $0x8] sm:$0x11] }
 0x8b8   : > { %v5364_v57 = vmul.bf16 %v9166_v21, %v5318_v27  ;;  %v5365_v43 = vmul.bf16 %v9169_v11, %v5334_v30  ;;  %v6392_v38 = vcombine.high %v5494_v32, %v5494_v32 }
 0x8ba   : > { %v5075_v7 = vpop.permute.xlu1 %5074  ;;  %5860 = vmatprep.subr.bf16.mxu0 %v5365_v43  ;;  %v6391_v43 = vcombine.low %v5494_v32, %v5494_v32  ;;  %v7050_v32 = vld [vmem:[#allocation4 + $0xa60] ss:$20 sps:$4 sm:$0xff]  }
 0x8bb   : > { %v5079_v53 = vsel %vm418_vm3, %v5075_v7, %v5067_v31  ;;  %v5098_v58 = vsel %vm418_vm3, %v5067_v31, %v5075_v7  ;;  %5861 = vmatpush1.bf16.msra.mxu0 %v5364_v57  ;;  %v5137_v13 = vpop.permute.xlu0 %5136 }
 0x8bc   : > { %v5126_v40 = vmul.bf16 %v9154_v39, %v5098_v58  ;;  %v5127_v49 = vmul.bf16 %v9157_v60, %v5079_v53  ;;  %v5501_v48 = vpack.i.b16 %v6391_v43, %v6391_v43 }
 0x8be   : > { %v5315_v19 = vpop.permute.xlu1 %5314  ;;  %5803 = vmatprep.subr.bf16.mxu1 %v5127_v49 }
 0x8bf   : > { %v5319_v18 = vsel %vm664_vm4, %v5313_v45, %v5315_v19  ;;  %v5338_v28 = vsel %vm664_vm4, %v5315_v19, %v5313_v45  ;;  %5804 = vmatpush1.bf16.msra.mxu1 %v5126_v40  ;;  %v5377_v46 = vpop.permute.xlu0 %5376  ;;  %v5508_v40 = vpack.i.b16 %v6392_v38, %v6392_v38 }
 0x8c0   : > { %v5366_v39 = vmul.bf16 %v9166_v21, %v5319_v18  ;;  %v5367_v60 = vmul.bf16 %v9169_v11, %v5338_v28  ;;  %v9219_v21 = vrot.slane %v5432_v62, %v7597_v9  ;;  %v7032_v18 = vld [vmem:[#allocation4 + $0xa2c] ss:$20 sps:$4 sm:$0xff]   ;;  %v7029_v62 = vld [vmem:[#allocation4 + $0xa08] ss:$20 sps:$4 sm:$0xff]  }
 0x8c2   : > { %v5145_v61 = vpop.permute.xlu1 %5144  ;;  %5862 = vmatprep.subr.bf16.mxu0 %v5367_v60 }
 0x8c3   : > { %v5152_v25 = vsel %vm496_vm5, %v5145_v61, %v5137_v13  ;;  %v5162_v36 = vsel %vm496_vm5, %v5137_v13, %v5145_v61  ;;  %5863 = vmatpush1.bf16.msra.mxu0 %v5366_v39  ;;  %v5139_v12 = vpop.permute.xlu0 %5138 }
 0x8c4   : > { %v5198_v37 = vmul.bf16 %v9204_v5, %v5162_v36  ;;  %v5199_v52 = vmul.bf16 %v9207_v10, %v5152_v25 }
 0x8c6   : > { %v5379_v11 = vpop.permute.xlu1 %5378  ;;  %5805 = vmatprep.subr.bf16.mxu1 %v5199_v52 }
 0x8c7   : > { %v5392_v6 = vsel %vm742_vm6, %v5377_v46, %v5379_v11  ;;  %v5402_v50 = vsel %vm742_vm6, %v5379_v11, %v5377_v46  ;;  %5806 = vmatpush1.bf16.msra.mxu1 %v5198_v37  ;;  %v5381_v22 = vpop.permute.xlu0 %5380  ;;  %v7035_v37 = vld [vmem:[#allocation4 + $0xa34] ss:$20 sps:$4 sm:$0xff]  }
 0x8c8   : > { %v5438_v59 = vmul.bf16 %v9216_v42, %v5392_v6  ;;  %v5439_v51 = vmul.bf16 %v9219_v21, %v5402_v50  ;;  %v7038_v50 = vld [vmem:[#allocation4 + $0xa54] ss:$20 sps:$4 sm:$0xff]  }
 0x8ca   : > { %v5147_v54 = vpop.permute.xlu1 %5146  ;;  %5864 = vmatprep.subr.bf16.mxu0 %v5439_v51  ;;  %v7037_v51 = vld [vmem:[#allocation4 + $0xa30] ss:$20 sps:$4 sm:$0xff]  }
 0x8cb   : > { %v5153_v63 = vsel %vm496_vm5, %v5147_v54, %v5139_v12  ;;  %v5166_v9 = vsel %vm496_vm5, %v5139_v12, %v5147_v54  ;;  %5865 = vmatpush1.bf16.msra.mxu0 %v5438_v59  ;;  %v5141_v17 = vpop.permute.xlu0 %5140  ;;  %v7041_v12 = vld [vmem:[#allocation4 + $0xa5c] ss:$20 sps:$4 sm:$0xff]  }
 0x8cc   : > { %v5200_v14 = vmul.bf16 %v9204_v5, %v5166_v9  ;;  %v5201_v3 = vmul.bf16 %v9207_v10, %v5153_v63 }
 0x8ce   : > { %v5383_v4 = vpop.permute.xlu1 %5382  ;;  %5807 = vmatprep.subr.bf16.mxu1 %v5201_v3 }
 0x8cf   : > { %v5393_v55 = vsel %vm742_vm6, %v5381_v22, %v5383_v4  ;;  %v5406_v56 = vsel %vm742_vm6, %v5383_v4, %v5381_v22  ;;  %5808 = vmatpush1.bf16.msra.mxu1 %v5200_v14  ;;  %v5385_v27 = vpop.permute.xlu0 %5384  ;;  %v7040_v22 = vld [vmem:[#allocation4 + $0xa50] ss:$20 sps:$4 sm:$0xff]  }
 0x8d0   : > { %v5440_v16 = vmul.bf16 %v9216_v42, %v5393_v55  ;;  %v5441_v20 = vmul.bf16 %v9219_v21, %v5406_v56  ;;  %v7044_v56 = vld [vmem:[#allocation4 + $0xa7c] ss:$20 sps:$4 sm:$0xff]  }
 0x8d2   : > { %v5149_v35 = vpop.permute.xlu1 %5148  ;;  %5866 = vmatprep.subr.bf16.mxu0 %v5441_v20 }
 0x8d3   : > { %v5154_v29 = vsel %vm496_vm5, %v5149_v35, %v5141_v17  ;;  %v5170_v33 = vsel %vm496_vm5, %v5141_v17, %v5149_v35  ;;  %5867 = vmatpush1.bf16.msra.mxu0 %v5440_v16  ;;  %v5143_v7 = vpop.permute.xlu0 %5142 }
 0x8d4   : > { %v5202_v34 = vmul.bf16 %v9204_v5, %v5170_v33  ;;  %v5203_v1 = vmul.bf16 %v9207_v10, %v5154_v29  ;;  %v7043_v29 = vld [vmem:[#allocation4 + $0xa58] ss:$20 sps:$4 sm:$0xff]  }
 0x8d5   : > { %v7047_v33 = vld [vmem:[#allocation4 + $0xa84] ss:$20 sps:$4 sm:$0xff]  }
 0x8d6   : > { %v5387_v23 = vpop.permute.xlu1 %5386  ;;  %5809 = vmatprep.subr.bf16.mxu1 %v5203_v1  ;;  %v7049_v1 = vld [vmem:[#allocation4 + $0xa80] ss:$20 sps:$4 sm:$0xff]  }
 0x8d7   : > { %v5394_v30 = vsel %vm742_vm6, %v5385_v27, %v5387_v23  ;;  %v5410_v26 = vsel %vm742_vm6, %v5387_v23, %v5385_v27  ;;  %5810 = vmatpush1.bf16.msra.mxu1 %v5202_v34  ;;  %v5389_v8 = vpop.permute.xlu0 %5388  ;;  %v7046_v34 = vld [vmem:[#allocation4 + $0xa78] ss:$20 sps:$4 sm:$0xff]   ;;  %v7051_v23 = vld [vmem:[#allocation4 + $0xa10] ss:$20 sps:$4 sm:$0xff]   ;;  %v7052_v27 = vld [vmem:[#allocation4 + $0xa88] ss:$20 sps:$4 sm:$0xff]  }
 0x8d8   : > { %v5442_v44 = vmul.bf16 %v9216_v42, %v5394_v30  ;;  %v5443_v57 = vmul.bf16 %v9219_v21, %v5410_v26  ;;  %v7053_v30 = vld [vmem:[#allocation4 + $0xa38] ss:$20 sps:$4 sm:$0xff]  }
 0x8da   : > { %v5151_v41 = vpop.permute.xlu1 %5150  ;;  %5868 = vmatprep.subr.bf16.mxu0 %v5443_v57 }
 0x8db   : > { %v5155_v31 = vsel %vm496_vm5, %v5151_v41, %v5143_v7  ;;  %v5174_v53 = vsel %vm496_vm5, %v5143_v7, %v5151_v41  ;;  %5869 = vmatpush1.bf16.msra.mxu0 %v5442_v44  ;;  %v5455_v2 = vpop.permute.xlu0 %5454 }
 0x8dc   : > { %v5204_v58 = vmul.bf16 %v9204_v5, %v5174_v53  ;;  %v5205_v24 = vmul.bf16 %v9207_v10, %v5155_v31  ;;  %v5506_v5 = vrot.slane %v5501_v48, %v7466_v15  ;;  %v5513_v10 = vrot.slane %v5508_v40, %v7466_v15 }
 0x8de   : > { %v5391_v49 = vpop.permute.xlu1 %5390  ;;  %5811 = vmatprep.subr.bf16.mxu1 %v5205_v24 }
 0x8df   : > { %v5395_v19 = vsel %vm742_vm6, %v5389_v8, %v5391_v49  ;;  %v5414_v45 = vsel %vm742_vm6, %v5391_v49, %v5389_v8  ;;  %5812 = vmatpush1.bf16.msra.mxu1 %v5204_v58 }
 0x8e0   : > { %v5444_v28 = vmul.bf16 %v9216_v42, %v5395_v19  ;;  %v5445_v39 = vmul.bf16 %v9219_v21, %v5414_v45  ;;  %v5459_v42 = vpop.permute.xlu0 %5458  ;;  %v7034_v21 = vld [vmem:[#allocation4 + $0xa28] ss:$20 sps:$4 sm:$0xff]  }
 0x8e2   : > { %v5457_v60 = vpop.permute.xlu1 %5456  ;;  %5870 = vmatprep.subr.bf16.mxu0 %v5445_v39  ;;  %5814 = vmatmul.mubr.bf16.vlgmr.msra.gmra.mrb[0].mxu1 %v7026_v47 }
 0x8e3   : > { %v5470_v61 = vsel %vm822_vm7, %v5455_v2, %v5457_v60  ;;  %v5480_v13 = vsel %vm822_vm7, %v5457_v60, %v5455_v2  ;;  %5871 = vmatpush1.bf16.msra.mxu0 %v5444_v28  ;;  %5821 = vmatprep.mubr.bf16.mxu1 %v7032_v18 }
 0x8e4   : > { %v5514_v25 = vmul.bf16 %v5506_v5, %v5470_v61  ;;  %v5515_v36 = vmul.bf16 %v5513_v10, %v5480_v13  ;;  %v5463_v54 = vpop.permute.xlu0 %5462 }
 0x8e6   : > { %v5461_v52 = vpop.permute.xlu1 %5460  ;;  %5873 = vmatmul.mubr.bf16.vlgmr.msra.gmra.mrb[0].mxu0 %v7029_v62  ;;  %5899 = vmatprep.subr.bf16.mxu0 %v5515_v36 }
 0x8e7   : > { %v5471_v15 = vsel %vm822_vm7, %v5459_v42, %v5461_v52  ;;  %v5484_v11 = vsel %vm822_vm7, %v5461_v52, %v5459_v42  ;;  %6637 = vmatprep.subr.bf16.mxu1 %v5515_v36  ;;  %5900 = vmatpush1.bf16.msra.mxu0 %v5514_v25 }
 0x8e8   : > { %v5516_v46 = vmul.bf16 %v5506_v5, %v5471_v15  ;;  %v5517_v6 = vmul.bf16 %v5513_v10, %v5484_v11  ;;  %6641 = vmatpush1.bf16.msra.mxu1 %v5514_v25  ;;  %5880 = vmatprep.mubr.bf16.mxu0 %v7035_v37  ;;  %v5467_v55 = vpop.permute.xlu0 %5466 }
 0x8ea   : > { %v5465_v59 = vpop.permute.xlu1 %5464  ;;  %5822 = vmatmul.mubr.bf16.gmra.mrb[4].mxu1 %v7034_v21  ;;  %5901 = vmatprep.subr.bf16.mxu0 %v5517_v6 }
 0x8eb   : > { %6638 = vmatprep.subr.bf16.mxu1 %v5517_v6  ;;  %5902 = vmatpush1.bf16.msra.mxu0 %v5516_v46  ;;  %v5472_v63 = vsel %vm822_vm7, %v5463_v54, %v5465_v59  ;;  %v5488_v9 = vsel %vm822_vm7, %v5465_v59, %v5463_v54 }
 0x8ec   : > { %6642 = vmatpush1.bf16.msra.mxu1 %v5516_v46  ;;  %5827 = vmatprep.mubr.bf16.mxu1 %v7038_v50  ;;  %v5518_v14 = vmul.bf16 %v5506_v5, %v5472_v63  ;;  %v5519_v3 = vmul.bf16 %v5513_v10, %v5488_v9 }
 0x8ee   : > { %5881 = vmatmul.mubr.bf16.gmra.mrb[4].mxu0 %v7037_v51  ;;  %v5469_v4 = vpop.permute.xlu1 %5468  ;;  %5903 = vmatprep.subr.bf16.mxu0 %v5519_v3 }
 0x8ef   : > { %5886 = vmatprep.mubr.bf16.mxu0 %v7041_v12  ;;  %v5473_v16 = vsel %vm822_vm7, %v5467_v55, %v5469_v4  ;;  %v5492_v20 = vsel %vm822_vm7, %v5469_v4, %v5467_v55  ;;  %6639 = vmatprep.subr.bf16.mxu1 %v5519_v3 }
 0x8f0   : > { %5904 = vmatpush1.bf16.msra.mxu0 %v5518_v14  ;;  %v5520_v35 = vmul.bf16 %v5506_v5, %v5473_v16  ;;  %v5521_v17 = vmul.bf16 %v5513_v10, %v5492_v20  ;;  %6643 = vmatpush1.bf16.msra.mxu1 %v5518_v14 }
 0x8f2   : > { %5828 = vmatmul.mubr.bf16.gmra.mrb[8].mxu1 %v7040_v22  ;;  %5905 = vmatprep.subr.bf16.mxu0 %v5521_v17 }
 0x8f3   : > { %5833 = vmatprep.mubr.bf16.mxu1 %v7044_v56  ;;  %6640 = vmatprep.subr.bf16.mxu1 %v5521_v17 }
 0x8f4   : > { %5906 = vmatpush1.bf16.msra.mxu0 %v5520_v35  ;;  %6644 = vmatpush1.bf16.msra.mxu1 %v5520_v35 }
 0x8f6   : > { %5887 = vmatmul.mubr.bf16.gmra.mrb[8].mxu0 %v7043_v29 }
 0x8f7   : > { %5892 = vmatprep.mubr.bf16.mxu0 %v7047_v33 }
 0x8f8   : > { %v5639_v13 = vpop.permute.xlu0 %5638 }
 0x8fa   : > { %5834 = vmatmul.mubr.bf16.gmra.mrb[12].mxu1 %v7046_v34 }
 0x8fb   : > { %5945 = vmatprep.mubr.bf16.mxu1 %v7233_v0 }
 0x8fe   : > { %5893 = vmatmul.mubr.bf16.gmra.mrb[12].mxu0 %v7049_v1 }
 0x8ff   : > { %5931 = vmatprep.mubr.bf16.mxu0 %v7233_v0 }
 0x902   : > { %6423 = vmatmul.mubr.msk.bf16.vlgmr.msra.gmra.mrb[16].mxu1 %vm1128_vm8, %v7050_v32 }
 0x903   : > { %5951 = vmatprep.mubr.bf16.mxu1 %v7233_v0 }
 0x906   : > { %6421 = vmatmul.mubr.msk.bf16.vlgmr.msra.gmra.mrb[0].mxu0 %vm1128_vm8, %v7051_v23 }
 0x907   : > { %5939 = vmatprep.mubr.bf16.mxu0 %v7233_v0 }
 0x90a   : > { %6424 = vmatmul.mubr.msk.bf16.gmra.mrb[20].mxu1 %vm1128_vm8, %v7052_v27 }
 0x90e   : > { %6422 = vmatmul.mubr.msk.bf16.gmra.mrb[16].mxu0 %vm1128_vm8, %v7053_v30 }
 0x9b5   : > { %v5815_v26 = vpop.f32.mrb[0].mxu1 }
 0x9b6   : > { %v5817_v44 = vpop.f32.mrb[1].mxu1  ;;  %v5816_v52 = vadd.f32 %v5815_v26, %v5639_v13 }
 0x9b7   : > { %v5819_v57 = vpop.f32.mrb[2].mxu1  ;;  %v5818_v21 = vadd.f32 %v5817_v44, %v5639_v13 }
 0x9b8   : > { %v5820_v43 = vpop.f32.mrb[3].mxu1 }
 0x9bd   : > { %v5823_v38 = vpop.f32.mrb[4].mxu1 }
 0x9be   : > { %v5824_v41 = vpop.f32.mrb[5].mxu1 }
 0x9bf   : > { %v5825_v7 = vpop.f32.mrb[6].mxu1 }
 0x9c0   : > { %v5826_v31 = vpop.f32.mrb[7].mxu1 }
 0x9c1   : > { %v5882_v53 = vpop.f32.mrb[4].mxu0 }
 0x9c2   : > { %v5883_v58 = vpop.f32.mrb[5].mxu0 }
 0x9c3   : > { %v5884_v24 = vpop.f32.mrb[6].mxu0 }
 0x9c4   : > { %v5885_v48 = vpop.f32.mrb[7].mxu0 }
 0x9c5   : > { %v5829_v40 = vpop.f32.mrb[8].mxu1 }
 0x9c6   : > { %v5830_v49 = vpop.f32.mrb[9].mxu1 }
 0x9c7   : > { %v5831_v0 = vpop.f32.mrb[10].mxu1 }
 0x9c8   : > { %v5832_v8 = vpop.f32.mrb[11].mxu1 }
 0x9c9   : > { %v5888_v47 = vpop.f32.mrb[8].mxu0 }
 0x9ca   : > { %v5889_v19 = vpop.f32.mrb[9].mxu0 }
 0x9cb   : > { %v5890_v45 = vpop.f32.mrb[10].mxu0 }
 0x9cc   : > { %v5891_v18 = vpop.f32.mrb[11].mxu0 }
 0x9cd   : > { %v5835_v28 = vpop.f32.mrb[12].mxu1 }
 0x9ce   : > { %v5836_v39 = vpop.f32.mrb[13].mxu1 }
 0x9cf   : > { %v5837_v5 = vpop.f32.mrb[14].mxu1 }
 0x9d0   : > { %v5838_v10 = vpop.f32.mrb[15].mxu1 }
 0x9d1   : > { %v5894_v60 = vpop.f32.mrb[12].mxu0 }
 0x9d2   : > { %v5895_v2 = vpop.f32.mrb[13].mxu0 }
 0x9d3   : > { %v5896_v62 = vpop.f32.mrb[14].mxu0 }
 0x9d4   : > { %v5897_v61 = vpop.f32.mrb[15].mxu0 }
 0x9d5   : > { %v5947_v25 = vpop.f32.mrb[16].mxu1 }
 0x9d6   : > { %v5948_v36 = vpop.f32.mrb[17].mxu1 }
 0x9d7   : > { %v5949_v37 = vpop.f32.mrb[18].mxu1 }
 0x9d8   : > { %v5950_v42 = vpop.f32.mrb[19].mxu1 }
 0x9d9   : > { %v5933_v15 = vpop.f32.mrb[0].mxu0 }
 0x9da   : > { %v6646_v11 = vadd.f32 %v5933_v15, %v5816_v52  ;;  %v5935_v46 = vpop.f32.mrb[1].mxu0 }
 0x9db   : > { %v6648_v6 = vadd.f32 %v5935_v46, %v5818_v21  ;;  %v5937_v50 = vpop.f32.mrb[2].mxu0 }
 0x9dc   : > { %5958 = vst [vmem:[%s7340_s17] sm:$0xff] %v6646_v11  ;;  %v5938_v59 = vpop.f32.mrb[3].mxu0 }
 0x9dd   : > { %5959 = vst [vmem:[%s7340_s17 + $0x8] sm:$0xff] %v6648_v6  ;;  %v5953_v51 = vpop.f32.mrb[20].mxu1 }
 0x9de   : > { %v5954_v54 = vpop.f32.mrb[21].mxu1 }
 0x9df   : > { %v5955_v12 = vpop.f32.mrb[22].mxu1 }
 0x9e0   : > { %v5956_v63 = vpop.f32.mrb[23].mxu1 }
 0x9e1   : > { %v5941_v9 = vpop.f32.mrb[16].mxu0 }
 0x9e2   : > { %v5942_v14 = vpop.f32.mrb[17].mxu0 }
 0x9e3   : > { %v5943_v3 = vpop.f32.mrb[18].mxu0 }
 0x9e4   : > { %v5944_v4 = vpop.f32.mrb[19].mxu0 }
 0x9e5 PF: > { %s15_s15 = sadd.s32 1, %s7160_s15  }
 0x9e6   : > { %p12_p5 = scmp.ge.s32.totalorder %s15_s15, 4  }
 0x9e8   :  { %14 = sbr.rel (!%p12_p5) target bundleno = 1 (0x1), region = 97 }
 0x9ef   :  { %5981 = vsyncpa [#allocation5], 1 }
 0x9f0   :  { %5983 = vsyncpa [#allocation5 + $0x1], 1 }

</bundles_post_ra>
